<compile_context>
chip_gen: v7x
topology: tpu7x:2x2x1
jax: 0.10.0
libtpu: 0.0.40
codegen_flags: <defaults>
</compile_context>

<pallas_src>
import functools

import jax
import jax.numpy as jnp
import numpy as np
from jax.experimental import pallas as pl
from jax.experimental.pallas import tpu as pltpu


# ----------------------------------------------------------------------------
# Pallas kernel
# ----------------------------------------------------------------------------
def bilstm_pool_kernel(x_ref,
                       wih0f_ref, whh0f_ref, b0f_ref,
                       wih0b_ref, whh0b_ref, b0b_ref,
                       wih1f_ref, whh1f_ref, b1f_ref,
                       wih1b_ref, whh1b_ref, b1b_ref,
                       wout_ref, bout_ref,
                       y_ref,
                       xp_ref, seq0_ref, seq1_ref,
                       *, seq_len, batch, hidden):
  H = hidden

  def run_direction(whh, seq_ref, col_off, reverse):
    """Serial LSTM recurrence for one direction.

    Reads the precomputed fused input projection (x_t @ Wih + b) from xp_ref
    and writes h_t into seq_ref[t*B:(t+1)*B, col_off:col_off+H].  Fully
    unrolled; only h @ Whh (one (B,H)@(H,4H) MXU matmul) is on the serial
    path per step.
    """
    h = jnp.zeros((batch, H), jnp.float32)
    c = jnp.zeros((batch, H), jnp.float32)
    steps = range(seq_len - 1, -1, -1) if reverse else range(seq_len)
    for t in steps:
      g = xp_ref[pl.ds(t * batch, batch), :] + jnp.dot(
          h, whh, preferred_element_type=jnp.float32)      # (B, 4H)
      i_g = jax.nn.sigmoid(g[:, 0 * H:1 * H])   # PyTorch gate order i,f,g,o
      f_g = jax.nn.sigmoid(g[:, 1 * H:2 * H])
      g_g = jnp.tanh(g[:, 2 * H:3 * H])
      o_g = jax.nn.sigmoid(g[:, 3 * H:4 * H])
      c = f_g * c + i_g * g_g
      h = o_g * jnp.tanh(c)
      seq_ref[pl.ds(t * batch, batch), col_off:col_off + H] = h

  x = x_ref[...]                              # (T*B, E)

  # ---------------- layer 0 (input = embeddings) ----------------
  xp_ref[...] = jnp.dot(x, wih0f_ref[...],
                        preferred_element_type=jnp.float32) + b0f_ref[...]
  run_direction(whh0f_ref[...], seq0_ref, 0, reverse=False)

  xp_ref[...] = jnp.dot(x, wih0b_ref[...],
                        preferred_element_type=jnp.float32) + b0b_ref[...]
  run_direction(whh0b_ref[...], seq0_ref, H, reverse=True)

  # ---------------- layer 1 (input = [fwd | bwd] of layer 0) ----------------
  # TODO(synk): nn.LSTM inter-layer dropout is identity at inference; no
  # stochastic dropout is implemented in-kernel.
  s0 = seq0_ref[...]                          # (T*B, 2H)
  xp_ref[...] = jnp.dot(s0, wih1f_ref[...],
                        preferred_element_type=jnp.float32) + b1f_ref[...]
  run_direction(whh1f_ref[...], seq1_ref, 0, reverse=False)

  xp_ref[...] = jnp.dot(s0, wih1b_ref[...],
                        preferred_element_type=jnp.float32) + b1b_ref[...]
  run_direction(whh1b_ref[...], seq1_ref, H, reverse=True)

  # -------- pooling (last step, max over T, mean over T) + linear head ------
  # NOTE: pooling uses the full padded length T and ignores `length`, exactly
  # like the reference module.
  last = seq1_ref[pl.ds((seq_len - 1) * batch, batch), :]   # (B, 2H)
  maxp = seq1_ref[pl.ds(0, batch), :]
  sump = maxp
  for t in range(1, seq_len):
    blk = seq1_ref[pl.ds(t * batch, batch), :]
    maxp = jnp.maximum(maxp, blk)
    sump = sump + blk
  avgp = sump * jnp.float32(1.0 / seq_len)

  # Head as VPU multiply + lane reduction (avoids an N=1 MXU matmul).
  w = wout_ref[...]                           # (3, 2H): rows act on max/avg/last
  y = (jnp.sum(maxp * w[0:1, :], axis=-1, keepdims=True)
       + jnp.sum(avgp * w[1:2, :], axis=-1, keepdims=True)
       + jnp.sum(last * w[2:3, :], axis=-1, keepdims=True))
  y_ref[...] = y + bout_ref[...]


# ----------------------------------------------------------------------------
# Wrapper
# ----------------------------------------------------------------------------
def bilstm_pool_forward(sents, length, embedding, params, *, hidden):
  """Mirrors BiLSTMPoolOld.forward (eval mode). `length` is unused, like the
  reference module."""
  del length
  # Embedding lookup + transpose to time-major, flattened to (T*B, E) so the
  # kernel's hoisted input projection is a single 2-D MXU matmul.
  x = jnp.take(embedding, sents, axis=0)                # (B, T, E)
  x = jnp.transpose(x, (1, 0, 2)).astype(jnp.float32)   # (T, B, E)
  seq_len, batch, embed_dim = x.shape
  x = x.reshape(seq_len * batch, embed_dim)             # (T*B, E)

  args = (x,
          params["wih0f"], params["whh0f"], params["b0f"],
          params["wih0b"], params["whh0b"], params["b0b"],
          params["wih1f"], params["whh1f"], params["b1f"],
          params["wih1b"], params["whh1b"], params["b1b"],
          params["wout"], params["bout"])

  def fullspec(a):
    nd = a.ndim
    return pl.BlockSpec(a.shape, lambda i, nd=nd: (0,) * nd)

  kernel = functools.partial(bilstm_pool_kernel, seq_len=seq_len, batch=batch,
                             hidden=hidden)
  return pl.pallas_call(
      kernel,
      out_shape=jax.ShapeDtypeStruct((batch, 1), jnp.float32),
      grid=(1,),
      in_specs=[fullspec(a) for a in args],
      out_specs=pl.BlockSpec((batch, 1), lambda i: (0, 0)),
      scratch_shapes=[
          pltpu.VMEM((seq_len * batch, 4 * hidden), jnp.float32),  # xp
          pltpu.VMEM((seq_len * batch, 2 * hidden), jnp.float32),  # seq0
          pltpu.VMEM((seq_len * batch, 2 * hidden), jnp.float32),  # seq1
      ],
      compiler_params=pltpu.CompilerParams(
          dimension_semantics=("arbitrary",)),
  )(*args)


# ----------------------------------------------------------------------------
# Deterministic parameter init (synthetic weights; shapes from __init__)
# ----------------------------------------------------------------------------
def init_params(key, *, vocab, embed_dim, hidden):
  ks = list(jax.random.split(key, 16))
  nrm = lambda k, shape: (0.1 * jax.random.normal(k, shape)).astype(jnp.float32)
  params = {}
  # Fused per-(layer, direction) weights, gate order (i, f, g, o) along 4H:
  #   wih (in_dim, 4H), whh (H, 4H), combined bias b_ih + b_hh as (1, 4H).
  i = 0
  for layer, in_dim in ((0, embed_dim), (1, 2 * hidden)):
    for d in ("f", "b"):
      params[f"wih{layer}{d}"] = nrm(ks[i], (in_dim, 4 * hidden)); i += 1
      params[f"whh{layer}{d}"] = nrm(ks[i], (hidden, 4 * hidden)); i += 1
      params[f"b{layer}{d}"] = nrm(ks[i], (1, 4 * hidden)); i += 1
  # hidden2label weight stored as (3, 2H): rows act on [max, avg, last] pools.
  params["wout"] = nrm(ks[i], (3, 2 * hidden)); i += 1
  params["bout"] = nrm(ks[i], (1, 1)); i += 1
  embedding = nrm(jax.random.PRNGKey(1234), (vocab, embed_dim))
  return embedding, params


# ----------------------------------------------------------------------------
# Pure NumPy reference (for correctness check)
# ----------------------------------------------------------------------------
def _sigmoid(x):
  return 1.0 / (1.0 + np.exp(-x))


def reference_forward(sents, embedding, params, *, hidden):
  emb = np.asarray(embedding)
  x = emb[np.asarray(sents)]                      # (B, T, E)
  x = np.transpose(x, (1, 0, 2)).astype(np.float32)
  T, B, _ = x.shape
  H = hidden

  def run_dir(inp, wih, whh, b, reverse):
    wih, whh, b = np.asarray(wih), np.asarray(whh), np.asarray(b)
    h = np.zeros((B, H), np.float32)
    c = np.zeros((B, H), np.float32)
    out = np.zeros((T, B, H), np.float32)
    order = range(T - 1, -1, -1) if reverse else range(T)
    for t in order:
      g = inp[t] @ wih + h @ whh + b              # (B, 4H)
      i_g, f_g = _sigmoid(g[:, 0:H]), _sigmoid(g[:, H:2 * H])
      g_g, o_g = np.tanh(g[:, 2 * H:3 * H]), _sigmoid(g[:, 3 * H:4 * H])
      c = f_g * c + i_g * g_g
      h = o_g * np.tanh(c)
      out[t] = h
    return out

  o0 = np.concatenate(
      [run_dir(x, params["wih0f"], params["whh0f"], params["b0f"], False),
       run_dir(x, params["wih0b"], params["whh0b"], params["b0b"], True)],
      axis=-1)
  o1f = run_dir(o0, params["wih1f"], params["whh1f"], params["b1f"], False)
  o1b = run_dir(o0, params["wih1b"], params["whh1b"], params["b1b"], True)
  lstm_out = np.concatenate([o1f, o1b], axis=-1)  # (T, B, 2H)
  last = lstm_out[-1]
  maxp = lstm_out.max(axis=0)
  avgp = lstm_out.mean(axis=0)
  wout = np.asarray(params["wout"])               # (3, 2H)
  bout = np.asarray(params["bout"])
  return ((maxp * wout[0]).sum(-1, keepdims=True)
          + (avgp * wout[1]).sum(-1, keepdims=True)
          + (last * wout[2]).sum(-1, keepdims=True) + bout)


# ----------------------------------------------------------------------------
if __name__ == "__main__":
  VOCAB, EMBED, HIDDEN = 64, 32, 32
  BATCH, SEQ = 8, 8

  key = jax.random.PRNGKey(0)
  k_sents, k_params = jax.random.split(key)
  sents = jax.random.randint(k_sents, (BATCH, SEQ), 0, VOCAB, dtype=jnp.int32)
  length = jnp.full((BATCH,), SEQ, dtype=jnp.int32)   # unused, as in the module
  embedding, params = init_params(k_params, vocab=VOCAB, embed_dim=EMBED,
                                  hidden=HIDDEN)

  y = bilstm_pool_forward(sents, length, embedding, params, hidden=HIDDEN)
  y = jax.block_until_ready(y)

  y_ref = reference_forward(sents, embedding, params, hidden=HIDDEN)
  assert y.shape == (BATCH, 1)
  assert np.allclose(np.asarray(y), y_ref, rtol=1e-3, atol=1e-3), (
      np.max(np.abs(np.asarray(y) - y_ref)))
  print("KERNEL_OK")
</pallas_src>

<mosaic_0001>
module attributes {stable_mosaic.version = 11 : i64} {
  func.func @bilstm_pool_kernel(%arg0: i32, %arg1: memref<64x32xf32, #tpu.memory_space<vmem>>, %arg2: memref<32x128xf32, #tpu.memory_space<vmem>>, %arg3: memref<32x128xf32, #tpu.memory_space<vmem>>, %arg4: memref<1x128xf32, #tpu.memory_space<vmem>>, %arg5: memref<32x128xf32, #tpu.memory_space<vmem>>, %arg6: memref<32x128xf32, #tpu.memory_space<vmem>>, %arg7: memref<1x128xf32, #tpu.memory_space<vmem>>, %arg8: memref<64x128xf32, #tpu.memory_space<vmem>>, %arg9: memref<32x128xf32, #tpu.memory_space<vmem>>, %arg10: memref<1x128xf32, #tpu.memory_space<vmem>>, %arg11: memref<64x128xf32, #tpu.memory_space<vmem>>, %arg12: memref<32x128xf32, #tpu.memory_space<vmem>>, %arg13: memref<1x128xf32, #tpu.memory_space<vmem>>, %arg14: memref<3x64xf32, #tpu.memory_space<vmem>>, %arg15: memref<1x1xf32, #tpu.memory_space<vmem>>, %arg16: memref<8x1xf32, #tpu.memory_space<vmem>>, %arg17: memref<64x128xf32, #tpu.memory_space<vmem>>, %arg18: memref<64x64xf32, #tpu.memory_space<vmem>>, %arg19: memref<64x64xf32, #tpu.memory_space<vmem>>) attributes {dimension_semantics = [#tpu.dimension_semantics<arbitrary>], iteration_bounds = array<i64: 1>, scalar_prefetch = 0 : i64, scratch_operands = 3 : i64, tpu.core_type = #tpu.core_type<tc>, window_params = [{pipeline_mode = #tpu.pipeline_mode<synchronous>, transform_indices = @transform_0, window_bounds = array<i64: 64, 32>}, {pipeline_mode = #tpu.pipeline_mode<synchronous>, transform_indices = @transform_1, window_bounds = array<i64: 32, 128>}, {pipeline_mode = #tpu.pipeline_mode<synchronous>, transform_indices = @transform_2, window_bounds = array<i64: 32, 128>}, {pipeline_mode = #tpu.pipeline_mode<synchronous>, transform_indices = @transform_3, window_bounds = array<i64: 1, 128>}, {pipeline_mode = #tpu.pipeline_mode<synchronous>, transform_indices = @transform_4, window_bounds = array<i64: 32, 128>}, {pipeline_mode = #tpu.pipeline_mode<synchronous>, transform_indices = @transform_5, window_bounds = array<i64: 32, 128>}, {pipeline_mode = #tpu.pipeline_mode<synchronous>, transform_indices = @transform_6, window_bounds = array<i64: 1, 128>}, {pipeline_mode = #tpu.pipeline_mode<synchronous>, transform_indices = @transform_7, window_bounds = array<i64: 64, 128>}, {pipeline_mode = #tpu.pipeline_mode<synchronous>, transform_indices = @transform_8, window_bounds = array<i64: 32, 128>}, {pipeline_mode = #tpu.pipeline_mode<synchronous>, transform_indices = @transform_9, window_bounds = array<i64: 1, 128>}, {pipeline_mode = #tpu.pipeline_mode<synchronous>, transform_indices = @transform_10, window_bounds = array<i64: 64, 128>}, {pipeline_mode = #tpu.pipeline_mode<synchronous>, transform_indices = @transform_11, window_bounds = array<i64: 32, 128>}, {pipeline_mode = #tpu.pipeline_mode<synchronous>, transform_indices = @transform_12, window_bounds = array<i64: 1, 128>}, {pipeline_mode = #tpu.pipeline_mode<synchronous>, transform_indices = @transform_13, window_bounds = array<i64: 3, 64>}, {pipeline_mode = #tpu.pipeline_mode<synchronous>, transform_indices = @transform_14, window_bounds = array<i64: 1, 1>}, {pipeline_mode = #tpu.pipeline_mode<synchronous>, transform_indices = @transform_15, window_bounds = array<i64: 8, 1>}]} {
    %c0 = arith.constant 0 : index
    %c0_0 = arith.constant 0 : index
    %0 = vector.load %arg1[%c0, %c0_0] : memref<64x32xf32, #tpu.memory_space<vmem>>, vector<64x32xf32>
    %c0_1 = arith.constant 0 : index
    %c0_2 = arith.constant 0 : index
    %1 = vector.load %arg2[%c0_1, %c0_2] : memref<32x128xf32, #tpu.memory_space<vmem>>, vector<32x128xf32>
    %cst = arith.constant dense<0.000000e+00> : vector<64x128xf32>
    %2 = tpu.matmul %0, %1, %cst {dimension_numbers = #tpu.dot_dimension_numbers<[1], [0], [0], [1], [0, 0, 1, 1], [], []>} : vector<64x32xf32>, vector<32x128xf32>, vector<64x128xf32> -> vector<64x128xf32>
    %c0_3 = arith.constant 0 : index
    %c0_4 = arith.constant 0 : index
    %3 = vector.load %arg4[%c0_3, %c0_4] : memref<1x128xf32, #tpu.memory_space<vmem>>, vector<1x128xf32>
    %4 = vector.broadcast %3 : vector<1x128xf32> to vector<64x128xf32>
    %5 = arith.addf %2, %4 : vector<64x128xf32>
    %c0_5 = arith.constant 0 : index
    %c0_6 = arith.constant 0 : index
    %6 = vector.load %arg17[%c0_5, %c0_6] : memref<64x128xf32, #tpu.memory_space<vmem>>, vector<64x128xf32>
    tpu.vector_store %arg17[%c0_5, %c0_6], %5 {strides = array<i32>} : memref<64x128xf32, #tpu.memory_space<vmem>>, vector<64x128xf32>,
    %c0_7 = arith.constant 0 : index
    %c0_8 = arith.constant 0 : index
    %7 = vector.load %arg3[%c0_7, %c0_8] : memref<32x128xf32, #tpu.memory_space<vmem>>, vector<32x128xf32>
    %cst_9 = arith.constant 0.000000e+00 : f32
    %8 = vector.broadcast %cst_9 : f32 to vector<8x32xf32>
    %cst_10 = arith.constant 0.000000e+00 : f32
    %9 = vector.broadcast %cst_10 : f32 to vector<8x32xf32>
    %c0_11 = arith.constant 0 : index
    %c0_12 = arith.constant 0 : index
    %10 = vector.load %arg17[%c0_11, %c0_12] : memref<64x128xf32, #tpu.memory_space<vmem>>, vector<8x128xf32>
    %cst_13 = arith.constant dense<0.000000e+00> : vector<8x128xf32>
    %11 = tpu.matmul %8, %7, %cst_13 {dimension_numbers = #tpu.dot_dimension_numbers<[1], [0], [0], [1], [0, 0, 1, 1], [], []>} : vector<8x32xf32>, vector<32x128xf32>, vector<8x128xf32> -> vector<8x128xf32>
    %12 = arith.addf %10, %11 : vector<8x128xf32>
    %13 = vector.extract_strided_slice %12 {offsets = [0, 0], sizes = [8, 32], strides = [1, 1]} : vector<8x128xf32> to vector<8x32xf32>
    %14 = arith.negf %13 : vector<8x32xf32>
    %15 = math.exp %14 : vector<8x32xf32>
    %cst_14 = arith.constant 1.000000e+00 : f32
    %16 = vector.broadcast %cst_14 : f32 to vector<8x32xf32>
    %17 = arith.addf %16, %15 : vector<8x32xf32>
    %18 = arith.divf %16, %17 : vector<8x32xf32>
    %19 = vector.extract_strided_slice %12 {offsets = [0, 32], sizes = [8, 32], strides = [1, 1]} : vector<8x128xf32> to vector<8x32xf32>
    %20 = arith.negf %19 : vector<8x32xf32>
    %21 = math.exp %20 : vector<8x32xf32>
    %cst_15 = arith.constant 1.000000e+00 : f32
    %22 = vector.broadcast %cst_15 : f32 to vector<8x32xf32>
    %23 = arith.addf %22, %21 : vector<8x32xf32>
    %24 = arith.divf %22, %23 : vector<8x32xf32>
    %25 = vector.extract_strided_slice %12 {offsets = [0, 64], sizes = [8, 32], strides = [1, 1]} : vector<8x128xf32> to vector<8x32xf32>
    %26 = math.tanh %25 : vector<8x32xf32>
    %27 = vector.extract_strided_slice %12 {offsets = [0, 96], sizes = [8, 32], strides = [1, 1]} : vector<8x128xf32> to vector<8x32xf32>
    %28 = arith.negf %27 : vector<8x32xf32>
    %29 = math.exp %28 : vector<8x32xf32>
    %cst_16 = arith.constant 1.000000e+00 : f32
    %30 = vector.broadcast %cst_16 : f32 to vector<8x32xf32>
    %31 = arith.addf %30, %29 : vector<8x32xf32>
    %32 = arith.divf %30, %31 : vector<8x32xf32>
    %33 = arith.mulf %24, %9 : vector<8x32xf32>
    %34 = arith.mulf %18, %26 : vector<8x32xf32>
    %35 = arith.addf %33, %34 : vector<8x32xf32>
    %36 = math.tanh %35 : vector<8x32xf32>
    %37 = arith.mulf %32, %36 : vector<8x32xf32>
    %c0_17 = arith.constant 0 : index
    %c0_18 = arith.constant 0 : index
    %38 = vector.load %arg18[%c0_17, %c0_18] : memref<64x64xf32, #tpu.memory_space<vmem>>, vector<8x32xf32>
    tpu.vector_store %arg18[%c0_17, %c0_18], %37 {strides = array<i32>} : memref<64x64xf32, #tpu.memory_space<vmem>>, vector<8x32xf32>,
    %c8 = arith.constant 8 : index
    %c0_19 = arith.constant 0 : index
    %39 = vector.load %arg17[%c8, %c0_19] : memref<64x128xf32, #tpu.memory_space<vmem>>, vector<8x128xf32>
    %cst_20 = arith.constant dense<0.000000e+00> : vector<8x128xf32>
    %40 = tpu.matmul %37, %7, %cst_20 {dimension_numbers = #tpu.dot_dimension_numbers<[1], [0], [0], [1], [0, 0, 1, 1], [], []>} : vector<8x32xf32>, vector<32x128xf32>, vector<8x128xf32> -> vector<8x128xf32>
    %41 = arith.addf %39, %40 : vector<8x128xf32>
    %42 = vector.extract_strided_slice %41 {offsets = [0, 0], sizes = [8, 32], strides = [1, 1]} : vector<8x128xf32> to vector<8x32xf32>
    %43 = arith.negf %42 : vector<8x32xf32>
    %44 = math.exp %43 : vector<8x32xf32>
    %cst_21 = arith.constant 1.000000e+00 : f32
    %45 = vector.broadcast %cst_21 : f32 to vector<8x32xf32>
    %46 = arith.addf %45, %44 : vector<8x32xf32>
    %47 = arith.divf %45, %46 : vector<8x32xf32>
    %48 = vector.extract_strided_slice %41 {offsets = [0, 32], sizes = [8, 32], strides = [1, 1]} : vector<8x128xf32> to vector<8x32xf32>
    %49 = arith.negf %48 : vector<8x32xf32>
    %50 = math.exp %49 : vector<8x32xf32>
    %cst_22 = arith.constant 1.000000e+00 : f32
    %51 = vector.broadcast %cst_22 : f32 to vector<8x32xf32>
    %52 = arith.addf %51, %50 : vector<8x32xf32>
    %53 = arith.divf %51, %52 : vector<8x32xf32>
    %54 = vector.extract_strided_slice %41 {offsets = [0, 64], sizes = [8, 32], strides = [1, 1]} : vector<8x128xf32> to vector<8x32xf32>
    %55 = math.tanh %54 : vector<8x32xf32>
    %56 = vector.extract_strided_slice %41 {offsets = [0, 96], sizes = [8, 32], strides = [1, 1]} : vector<8x128xf32> to vector<8x32xf32>
    %57 = arith.negf %56 : vector<8x32xf32>
    %58 = math.exp %57 : vector<8x32xf32>
    %cst_23 = arith.constant 1.000000e+00 : f32
    %59 = vector.broadcast %cst_23 : f32 to vector<8x32xf32>
    %60 = arith.addf %59, %58 : vector<8x32xf32>
    %61 = arith.divf %59, %60 : vector<8x32xf32>
    %62 = arith.mulf %53, %35 : vector<8x32xf32>
    %63 = arith.mulf %47, %55 : vector<8x32xf32>
    %64 = arith.addf %62, %63 : vector<8x32xf32>
    %65 = math.tanh %64 : vector<8x32xf32>
    %66 = arith.mulf %61, %65 : vector<8x32xf32>
    %c8_24 = arith.constant 8 : index
    %c0_25 = arith.constant 0 : index
    %67 = vector.load %arg18[%c8_24, %c0_25] : memref<64x64xf32, #tpu.memory_space<vmem>>, vector<8x32xf32>
    tpu.vector_store %arg18[%c8_24, %c0_25], %66 {strides = array<i32>} : memref<64x64xf32, #tpu.memory_space<vmem>>, vector<8x32xf32>,
    %c16 = arith.constant 16 : index
    %c0_26 = arith.constant 0 : index
    %68 = vector.load %arg17[%c16, %c0_26] : memref<64x128xf32, #tpu.memory_space<vmem>>, vector<8x128xf32>
    %cst_27 = arith.constant dense<0.000000e+00> : vector<8x128xf32>
    %69 = tpu.matmul %66, %7, %cst_27 {dimension_numbers = #tpu.dot_dimension_numbers<[1], [0], [0], [1], [0, 0, 1, 1], [], []>} : vector<8x32xf32>, vector<32x128xf32>, vector<8x128xf32> -> vector<8x128xf32>
    %70 = arith.addf %68, %69 : vector<8x128xf32>
    %71 = vector.extract_strided_slice %70 {offsets = [0, 0], sizes = [8, 32], strides = [1, 1]} : vector<8x128xf32> to vector<8x32xf32>
    %72 = arith.negf %71 : vector<8x32xf32>
    %73 = math.exp %72 : vector<8x32xf32>
    %cst_28 = arith.constant 1.000000e+00 : f32
    %74 = vector.broadcast %cst_28 : f32 to vector<8x32xf32>
    %75 = arith.addf %74, %73 : vector<8x32xf32>
    %76 = arith.divf %74, %75 : vector<8x32xf32>
    %77 = vector.extract_strided_slice %70 {offsets = [0, 32], sizes = [8, 32], strides = [1, 1]} : vector<8x128xf32> to vector<8x32xf32>
    %78 = arith.negf %77 : vector<8x32xf32>
    %79 = math.exp %78 : vector<8x32xf32>
    %cst_29 = arith.constant 1.000000e+00 : f32
    %80 = vector.broadcast %cst_29 : f32 to vector<8x32xf32>
    %81 = arith.addf %80, %79 : vector<8x32xf32>
    %82 = arith.divf %80, %81 : vector<8x32xf32>
    %83 = vector.extract_strided_slice %70 {offsets = [0, 64], sizes = [8, 32], strides = [1, 1]} : vector<8x128xf32> to vector<8x32xf32>
    %84 = math.tanh %83 : vector<8x32xf32>
    %85 = vector.extract_strided_slice %70 {offsets = [0, 96], sizes = [8, 32], strides = [1, 1]} : vector<8x128xf32> to vector<8x32xf32>
    %86 = arith.negf %85 : vector<8x32xf32>
    %87 = math.exp %86 : vector<8x32xf32>
    %cst_30 = arith.constant 1.000000e+00 : f32
    %88 = vector.broadcast %cst_30 : f32 to vector<8x32xf32>
    %89 = arith.addf %88, %87 : vector<8x32xf32>
    %90 = arith.divf %88, %89 : vector<8x32xf32>
    %91 = arith.mulf %82, %64 : vector<8x32xf32>
    %92 = arith.mulf %76, %84 : vector<8x32xf32>
    %93 = arith.addf %91, %92 : vector<8x32xf32>
    %94 = math.tanh %93 : vector<8x32xf32>
    %95 = arith.mulf %90, %94 : vector<8x32xf32>
    %c16_31 = arith.constant 16 : index
    %c0_32 = arith.constant 0 : index
    %96 = vector.load %arg18[%c16_31, %c0_32] : memref<64x64xf32, #tpu.memory_space<vmem>>, vector<8x32xf32>
    tpu.vector_store %arg18[%c16_31, %c0_32], %95 {strides = array<i32>} : memref<64x64xf32, #tpu.memory_space<vmem>>, vector<8x32xf32>,
    %c24 = arith.constant 24 : index
    %c0_33 = arith.constant 0 : index
    %97 = vector.load %arg17[%c24, %c0_33] : memref<64x128xf32, #tpu.memory_space<vmem>>, vector<8x128xf32>
    %cst_34 = arith.constant dense<0.000000e+00> : vector<8x128xf32>
    %98 = tpu.matmul %95, %7, %cst_34 {dimension_numbers = #tpu.dot_dimension_numbers<[1], [0], [0], [1], [0, 0, 1, 1], [], []>} : vector<8x32xf32>, vector<32x128xf32>, vector<8x128xf32> -> vector<8x128xf32>
    %99 = arith.addf %97, %98 : vector<8x128xf32>
    %100 = vector.extract_strided_slice %99 {offsets = [0, 0], sizes = [8, 32], strides = [1, 1]} : vector<8x128xf32> to vector<8x32xf32>
    %101 = arith.negf %100 : vector<8x32xf32>
    %102 = math.exp %101 : vector<8x32xf32>
    %cst_35 = arith.constant 1.000000e+00 : f32
    %103 = vector.broadcast %cst_35 : f32 to vector<8x32xf32>
    %104 = arith.addf %103, %102 : vector<8x32xf32>
    %105 = arith.divf %103, %104 : vector<8x32xf32>
    %106 = vector.extract_strided_slice %99 {offsets = [0, 32], sizes = [8, 32], strides = [1, 1]} : vector<8x128xf32> to vector<8x32xf32>
    %107 = arith.negf %106 : vector<8x32xf32>
    %108 = math.exp %107 : vector<8x32xf32>
    %cst_36 = arith.constant 1.000000e+00 : f32
    %109 = vector.broadcast %cst_36 : f32 to vector<8x32xf32>
    %110 = arith.addf %109, %108 : vector<8x32xf32>
    %111 = arith.divf %109, %110 : vector<8x32xf32>
    %112 = vector.extract_strided_slice %99 {offsets = [0, 64], sizes = [8, 32], strides = [1, 1]} : vector<8x128xf32> to vector<8x32xf32>
    %113 = math.tanh %112 : vector<8x32xf32>
    %114 = vector.extract_strided_slice %99 {offsets = [0, 96], sizes = [8, 32], strides = [1, 1]} : vector<8x128xf32> to vector<8x32xf32>
    %115 = arith.negf %114 : vector<8x32xf32>
    %116 = math.exp %115 : vector<8x32xf32>
    %cst_37 = arith.constant 1.000000e+00 : f32
    %117 = vector.broadcast %cst_37 : f32 to vector<8x32xf32>
    %118 = arith.addf %117, %116 : vector<8x32xf32>
    %119 = arith.divf %117, %118 : vector<8x32xf32>
    %120 = arith.mulf %111, %93 : vector<8x32xf32>
    %121 = arith.mulf %105, %113 : vector<8x32xf32>
    %122 = arith.addf %120, %121 : vector<8x32xf32>
    %123 = math.tanh %122 : vector<8x32xf32>
    %124 = arith.mulf %119, %123 : vector<8x32xf32>
    %c24_38 = arith.constant 24 : index
    %c0_39 = arith.constant 0 : index
    %125 = vector.load %arg18[%c24_38, %c0_39] : memref<64x64xf32, #tpu.memory_space<vmem>>, vector<8x32xf32>
    tpu.vector_store %arg18[%c24_38, %c0_39], %124 {strides = array<i32>} : memref<64x64xf32, #tpu.memory_space<vmem>>, vector<8x32xf32>,
    %c32 = arith.constant 32 : index
    %c0_40 = arith.constant 0 : index
    %126 = vector.load %arg17[%c32, %c0_40] : memref<64x128xf32, #tpu.memory_space<vmem>>, vector<8x128xf32>
    %cst_41 = arith.constant dense<0.000000e+00> : vector<8x128xf32>
    %127 = tpu.matmul %124, %7, %cst_41 {dimension_numbers = #tpu.dot_dimension_numbers<[1], [0], [0], [1], [0, 0, 1, 1], [], []>} : vector<8x32xf32>, vector<32x128xf32>, vector<8x128xf32> -> vector<8x128xf32>
    %128 = arith.addf %126, %127 : vector<8x128xf32>
    %129 = vector.extract_strided_slice %128 {offsets = [0, 0], sizes = [8, 32], strides = [1, 1]} : vector<8x128xf32> to vector<8x32xf32>
    %130 = arith.negf %129 : vector<8x32xf32>
    %131 = math.exp %130 : vector<8x32xf32>
    %cst_42 = arith.constant 1.000000e+00 : f32
    %132 = vector.broadcast %cst_42 : f32 to vector<8x32xf32>
    %133 = arith.addf %132, %131 : vector<8x32xf32>
    %134 = arith.divf %132, %133 : vector<8x32xf32>
    %135 = vector.extract_strided_slice %128 {offsets = [0, 32], sizes = [8, 32], strides = [1, 1]} : vector<8x128xf32> to vector<8x32xf32>
    %136 = arith.negf %135 : vector<8x32xf32>
    %137 = math.exp %136 : vector<8x32xf32>
    %cst_43 = arith.constant 1.000000e+00 : f32
    %138 = vector.broadcast %cst_43 : f32 to vector<8x32xf32>
    %139 = arith.addf %138, %137 : vector<8x32xf32>
    %140 = arith.divf %138, %139 : vector<8x32xf32>
    %141 = vector.extract_strided_slice %128 {offsets = [0, 64], sizes = [8, 32], strides = [1, 1]} : vector<8x128xf32> to vector<8x32xf32>
    %142 = math.tanh %141 : vector<8x32xf32>
    %143 = vector.extract_strided_slice %128 {offsets = [0, 96], sizes = [8, 32], strides = [1, 1]} : vector<8x128xf32> to vector<8x32xf32>
    %144 = arith.negf %143 : vector<8x32xf32>
    %145 = math.exp %144 : vector<8x32xf32>
    %cst_44 = arith.constant 1.000000e+00 : f32
    %146 = vector.broadcast %cst_44 : f32 to vector<8x32xf32>
    %147 = arith.addf %146, %145 : vector<8x32xf32>
    %148 = arith.divf %146, %147 : vector<8x32xf32>
    %149 = arith.mulf %140, %122 : vector<8x32xf32>
    %150 = arith.mulf %134, %142 : vector<8x32xf32>
    %151 = arith.addf %149, %150 : vector<8x32xf32>
    %152 = math.tanh %151 : vector<8x32xf32>
    %153 = arith.mulf %148, %152 : vector<8x32xf32>
    %c32_45 = arith.constant 32 : index
    %c0_46 = arith.constant 0 : index
    %154 = vector.load %arg18[%c32_45, %c0_46] : memref<64x64xf32, #tpu.memory_space<vmem>>, vector<8x32xf32>
    tpu.vector_store %arg18[%c32_45, %c0_46], %153 {strides = array<i32>} : memref<64x64xf32, #tpu.memory_space<vmem>>, vector<8x32xf32>,
    %c40 = arith.constant 40 : index
    %c0_47 = arith.constant 0 : index
    %155 = vector.load %arg17[%c40, %c0_47] : memref<64x128xf32, #tpu.memory_space<vmem>>, vector<8x128xf32>
    %cst_48 = arith.constant dense<0.000000e+00> : vector<8x128xf32>
    %156 = tpu.matmul %153, %7, %cst_48 {dimension_numbers = #tpu.dot_dimension_numbers<[1], [0], [0], [1], [0, 0, 1, 1], [], []>} : vector<8x32xf32>, vector<32x128xf32>, vector<8x128xf32> -> vector<8x128xf32>
    %157 = arith.addf %155, %156 : vector<8x128xf32>
    %158 = vector.extract_strided_slice %157 {offsets = [0, 0], sizes = [8, 32], strides = [1, 1]} : vector<8x128xf32> to vector<8x32xf32>
    %159 = arith.negf %158 : vector<8x32xf32>
    %160 = math.exp %159 : vector<8x32xf32>
    %cst_49 = arith.constant 1.000000e+00 : f32
    %161 = vector.broadcast %cst_49 : f32 to vector<8x32xf32>
    %162 = arith.addf %161, %160 : vector<8x32xf32>
    %163 = arith.divf %161, %162 : vector<8x32xf32>
    %164 = vector.extract_strided_slice %157 {offsets = [0, 32], sizes = [8, 32], strides = [1, 1]} : vector<8x128xf32> to vector<8x32xf32>
    %165 = arith.negf %164 : vector<8x32xf32>
    %166 = math.exp %165 : vector<8x32xf32>
    %cst_50 = arith.constant 1.000000e+00 : f32
    %167 = vector.broadcast %cst_50 : f32 to vector<8x32xf32>
    %168 = arith.addf %167, %166 : vector<8x32xf32>
    %169 = arith.divf %167, %168 : vector<8x32xf32>
    %170 = vector.extract_strided_slice %157 {offsets = [0, 64], sizes = [8, 32], strides = [1, 1]} : vector<8x128xf32> to vector<8x32xf32>
    %171 = math.tanh %170 : vector<8x32xf32>
    %172 = vector.extract_strided_slice %157 {offsets = [0, 96], sizes = [8, 32], strides = [1, 1]} : vector<8x128xf32> to vector<8x32xf32>
    %173 = arith.negf %172 : vector<8x32xf32>
    %174 = math.exp %173 : vector<8x32xf32>
    %cst_51 = arith.constant 1.000000e+00 : f32
    %175 = vector.broadcast %cst_51 : f32 to vector<8x32xf32>
    %176 = arith.addf %175, %174 : vector<8x32xf32>
    %177 = arith.divf %175, %176 : vector<8x32xf32>
    %178 = arith.mulf %169, %151 : vector<8x32xf32>
    %179 = arith.mulf %163, %171 : vector<8x32xf32>
    %180 = arith.addf %178, %179 : vector<8x32xf32>
    %181 = math.tanh %180 : vector<8x32xf32>
    %182 = arith.mulf %177, %181 : vector<8x32xf32>
    %c40_52 = arith.constant 40 : index
    %c0_53 = arith.constant 0 : index
    %183 = vector.load %arg18[%c40_52, %c0_53] : memref<64x64xf32, #tpu.memory_space<vmem>>, vector<8x32xf32>
    tpu.vector_store %arg18[%c40_52, %c0_53], %182 {strides = array<i32>} : memref<64x64xf32, #tpu.memory_space<vmem>>, vector<8x32xf32>,
    %c48 = arith.constant 48 : index
    %c0_54 = arith.constant 0 : index
    %184 = vector.load %arg17[%c48, %c0_54] : memref<64x128xf32, #tpu.memory_space<vmem>>, vector<8x128xf32>
    %cst_55 = arith.constant dense<0.000000e+00> : vector<8x128xf32>
    %185 = tpu.matmul %182, %7, %cst_55 {dimension_numbers = #tpu.dot_dimension_numbers<[1], [0], [0], [1], [0, 0, 1, 1], [], []>} : vector<8x32xf32>, vector<32x128xf32>, vector<8x128xf32> -> vector<8x128xf32>
    %186 = arith.addf %184, %185 : vector<8x128xf32>
    %187 = vector.extract_strided_slice %186 {offsets = [0, 0], sizes = [8, 32], strides = [1, 1]} : vector<8x128xf32> to vector<8x32xf32>
    %188 = arith.negf %187 : vector<8x32xf32>
    %189 = math.exp %188 : vector<8x32xf32>
    %cst_56 = arith.constant 1.000000e+00 : f32
    %190 = vector.broadcast %cst_56 : f32 to vector<8x32xf32>
    %191 = arith.addf %190, %189 : vector<8x32xf32>
    %192 = arith.divf %190, %191 : vector<8x32xf32>
    %193 = vector.extract_strided_slice %186 {offsets = [0, 32], sizes = [8, 32], strides = [1, 1]} : vector<8x128xf32> to vector<8x32xf32>
    %194 = arith.negf %193 : vector<8x32xf32>
    %195 = math.exp %194 : vector<8x32xf32>
    %cst_57 = arith.constant 1.000000e+00 : f32
    %196 = vector.broadcast %cst_57 : f32 to vector<8x32xf32>
    %197 = arith.addf %196, %195 : vector<8x32xf32>
    %198 = arith.divf %196, %197 : vector<8x32xf32>
    %199 = vector.extract_strided_slice %186 {offsets = [0, 64], sizes = [8, 32], strides = [1, 1]} : vector<8x128xf32> to vector<8x32xf32>
    %200 = math.tanh %199 : vector<8x32xf32>
    %201 = vector.extract_strided_slice %186 {offsets = [0, 96], sizes = [8, 32], strides = [1, 1]} : vector<8x128xf32> to vector<8x32xf32>
    %202 = arith.negf %201 : vector<8x32xf32>
    %203 = math.exp %202 : vector<8x32xf32>
    %cst_58 = arith.constant 1.000000e+00 : f32
    %204 = vector.broadcast %cst_58 : f32 to vector<8x32xf32>
    %205 = arith.addf %204, %203 : vector<8x32xf32>
    %206 = arith.divf %204, %205 : vector<8x32xf32>
    %207 = arith.mulf %198, %180 : vector<8x32xf32>
    %208 = arith.mulf %192, %200 : vector<8x32xf32>
    %209 = arith.addf %207, %208 : vector<8x32xf32>
    %210 = math.tanh %209 : vector<8x32xf32>
    %211 = arith.mulf %206, %210 : vector<8x32xf32>
    %c48_59 = arith.constant 48 : index
    %c0_60 = arith.constant 0 : index
    %212 = vector.load %arg18[%c48_59, %c0_60] : memref<64x64xf32, #tpu.memory_space<vmem>>, vector<8x32xf32>
    tpu.vector_store %arg18[%c48_59, %c0_60], %211 {strides = array<i32>} : memref<64x64xf32, #tpu.memory_space<vmem>>, vector<8x32xf32>,
    %c56 = arith.constant 56 : index
    %c0_61 = arith.constant 0 : index
    %213 = vector.load %arg17[%c56, %c0_61] : memref<64x128xf32, #tpu.memory_space<vmem>>, vector<8x128xf32>
    %cst_62 = arith.constant dense<0.000000e+00> : vector<8x128xf32>
    %214 = tpu.matmul %211, %7, %cst_62 {dimension_numbers = #tpu.dot_dimension_numbers<[1], [0], [0], [1], [0, 0, 1, 1], [], []>} : vector<8x32xf32>, vector<32x128xf32>, vector<8x128xf32> -> vector<8x128xf32>
    %215 = arith.addf %213, %214 : vector<8x128xf32>
    %216 = vector.extract_strided_slice %215 {offsets = [0, 0], sizes = [8, 32], strides = [1, 1]} : vector<8x128xf32> to vector<8x32xf32>
    %217 = arith.negf %216 : vector<8x32xf32>
    %218 = math.exp %217 : vector<8x32xf32>
    %cst_63 = arith.constant 1.000000e+00 : f32
    %219 = vector.broadcast %cst_63 : f32 to vector<8x32xf32>
    %220 = arith.addf %219, %218 : vector<8x32xf32>
    %221 = arith.divf %219, %220 : vector<8x32xf32>
    %222 = vector.extract_strided_slice %215 {offsets = [0, 32], sizes = [8, 32], strides = [1, 1]} : vector<8x128xf32> to vector<8x32xf32>
    %223 = arith.negf %222 : vector<8x32xf32>
    %224 = math.exp %223 : vector<8x32xf32>
    %cst_64 = arith.constant 1.000000e+00 : f32
    %225 = vector.broadcast %cst_64 : f32 to vector<8x32xf32>
    %226 = arith.addf %225, %224 : vector<8x32xf32>
    %227 = arith.divf %225, %226 : vector<8x32xf32>
    %228 = vector.extract_strided_slice %215 {offsets = [0, 64], sizes = [8, 32], strides = [1, 1]} : vector<8x128xf32> to vector<8x32xf32>
    %229 = math.tanh %228 : vector<8x32xf32>
    %230 = vector.extract_strided_slice %215 {offsets = [0, 96], sizes = [8, 32], strides = [1, 1]} : vector<8x128xf32> to vector<8x32xf32>
    %231 = arith.negf %230 : vector<8x32xf32>
    %232 = math.exp %231 : vector<8x32xf32>
    %cst_65 = arith.constant 1.000000e+00 : f32
    %233 = vector.broadcast %cst_65 : f32 to vector<8x32xf32>
    %234 = arith.addf %233, %232 : vector<8x32xf32>
    %235 = arith.divf %233, %234 : vector<8x32xf32>
    %236 = arith.mulf %227, %209 : vector<8x32xf32>
    %237 = arith.mulf %221, %229 : vector<8x32xf32>
    %238 = arith.addf %236, %237 : vector<8x32xf32>
    %239 = math.tanh %238 : vector<8x32xf32>
    %240 = arith.mulf %235, %239 : vector<8x32xf32>
    %c56_66 = arith.constant 56 : index
    %c0_67 = arith.constant 0 : index
    %241 = vector.load %arg18[%c56_66, %c0_67] : memref<64x64xf32, #tpu.memory_space<vmem>>, vector<8x32xf32>
    tpu.vector_store %arg18[%c56_66, %c0_67], %240 {strides = array<i32>} : memref<64x64xf32, #tpu.memory_space<vmem>>, vector<8x32xf32>,
    %c0_68 = arith.constant 0 : index
    %c0_69 = arith.constant 0 : index
    %242 = vector.load %arg5[%c0_68, %c0_69] : memref<32x128xf32, #tpu.memory_space<vmem>>, vector<32x128xf32>
    %cst_70 = arith.constant dense<0.000000e+00> : vector<64x128xf32>
    %243 = tpu.matmul %0, %242, %cst_70 {dimension_numbers = #tpu.dot_dimension_numbers<[1], [0], [0], [1], [0, 0, 1, 1], [], []>} : vector<64x32xf32>, vector<32x128xf32>, vector<64x128xf32> -> vector<64x128xf32>
    %c0_71 = arith.constant 0 : index
    %c0_72 = arith.constant 0 : index
    %244 = vector.load %arg7[%c0_71, %c0_72] : memref<1x128xf32, #tpu.memory_space<vmem>>, vector<1x128xf32>
    %245 = vector.broadcast %244 : vector<1x128xf32> to vector<64x128xf32>
    %246 = arith.addf %243, %245 : vector<64x128xf32>
    %c0_73 = arith.constant 0 : index
    %c0_74 = arith.constant 0 : index
    %247 = vector.load %arg17[%c0_73, %c0_74] : memref<64x128xf32, #tpu.memory_space<vmem>>, vector<64x128xf32>
    tpu.vector_store %arg17[%c0_73, %c0_74], %246 {strides = array<i32>} : memref<64x128xf32, #tpu.memory_space<vmem>>, vector<64x128xf32>,
    %c0_75 = arith.constant 0 : index
    %c0_76 = arith.constant 0 : index
    %248 = vector.load %arg6[%c0_75, %c0_76] : memref<32x128xf32, #tpu.memory_space<vmem>>, vector<32x128xf32>
    %cst_77 = arith.constant 0.000000e+00 : f32
    %249 = vector.broadcast %cst_77 : f32 to vector<8x32xf32>
    %cst_78 = arith.constant 0.000000e+00 : f32
    %250 = vector.broadcast %cst_78 : f32 to vector<8x32xf32>
    %c56_79 = arith.constant 56 : index
    %c0_80 = arith.constant 0 : index
    %251 = vector.load %arg17[%c56_79, %c0_80] : memref<64x128xf32, #tpu.memory_space<vmem>>, vector<8x128xf32>
    %cst_81 = arith.constant dense<0.000000e+00> : vector<8x128xf32>
    %252 = tpu.matmul %249, %248, %cst_81 {dimension_numbers = #tpu.dot_dimension_numbers<[1], [0], [0], [1], [0, 0, 1, 1], [], []>} : vector<8x32xf32>, vector<32x128xf32>, vector<8x128xf32> -> vector<8x128xf32>
    %253 = arith.addf %251, %252 : vector<8x128xf32>
    %254 = vector.extract_strided_slice %253 {offsets = [0, 0], sizes = [8, 32], strides = [1, 1]} : vector<8x128xf32> to vector<8x32xf32>
    %255 = arith.negf %254 : vector<8x32xf32>
    %256 = math.exp %255 : vector<8x32xf32>
    %cst_82 = arith.constant 1.000000e+00 : f32
    %257 = vector.broadcast %cst_82 : f32 to vector<8x32xf32>
    %258 = arith.addf %257, %256 : vector<8x32xf32>
    %259 = arith.divf %257, %258 : vector<8x32xf32>
    %260 = vector.extract_strided_slice %253 {offsets = [0, 32], sizes = [8, 32], strides = [1, 1]} : vector<8x128xf32> to vector<8x32xf32>
    %261 = arith.negf %260 : vector<8x32xf32>
    %262 = math.exp %261 : vector<8x32xf32>
    %cst_83 = arith.constant 1.000000e+00 : f32
    %263 = vector.broadcast %cst_83 : f32 to vector<8x32xf32>
    %264 = arith.addf %263, %262 : vector<8x32xf32>
    %265 = arith.divf %263, %264 : vector<8x32xf32>
    %266 = vector.extract_strided_slice %253 {offsets = [0, 64], sizes = [8, 32], strides = [1, 1]} : vector<8x128xf32> to vector<8x32xf32>
    %267 = math.tanh %266 : vector<8x32xf32>
    %268 = vector.extract_strided_slice %253 {offsets = [0, 96], sizes = [8, 32], strides = [1, 1]} : vector<8x128xf32> to vector<8x32xf32>
    %269 = arith.negf %268 : vector<8x32xf32>
    %270 = math.exp %269 : vector<8x32xf32>
    %cst_84 = arith.constant 1.000000e+00 : f32
    %271 = vector.broadcast %cst_84 : f32 to vector<8x32xf32>
    %272 = arith.addf %271, %270 : vector<8x32xf32>
    %273 = arith.divf %271, %272 : vector<8x32xf32>
    %274 = arith.mulf %265, %250 : vector<8x32xf32>
    %275 = arith.mulf %259, %267 : vector<8x32xf32>
    %276 = arith.addf %274, %275 : vector<8x32xf32>
    %277 = math.tanh %276 : vector<8x32xf32>
    %278 = arith.mulf %273, %277 : vector<8x32xf32>
    %c56_85 = arith.constant 56 : index
    %c32_86 = arith.constant 32 : index
    %279 = vector.load %arg18[%c56_85, %c32_86] : memref<64x64xf32, #tpu.memory_space<vmem>>, vector<8x32xf32>
    tpu.vector_store %arg18[%c56_85, %c32_86], %278 {strides = array<i32>} : memref<64x64xf32, #tpu.memory_space<vmem>>, vector<8x32xf32>,
    %c48_87 = arith.constant 48 : index
    %c0_88 = arith.constant 0 : index
    %280 = vector.load %arg17[%c48_87, %c0_88] : memref<64x128xf32, #tpu.memory_space<vmem>>, vector<8x128xf32>
    %cst_89 = arith.constant dense<0.000000e+00> : vector<8x128xf32>
    %281 = tpu.matmul %278, %248, %cst_89 {dimension_numbers = #tpu.dot_dimension_numbers<[1], [0], [0], [1], [0, 0, 1, 1], [], []>} : vector<8x32xf32>, vector<32x128xf32>, vector<8x128xf32> -> vector<8x128xf32>
    %282 = arith.addf %280, %281 : vector<8x128xf32>
    %283 = vector.extract_strided_slice %282 {offsets = [0, 0], sizes = [8, 32], strides = [1, 1]} : vector<8x128xf32> to vector<8x32xf32>
    %284 = arith.negf %283 : vector<8x32xf32>
    %285 = math.exp %284 : vector<8x32xf32>
    %cst_90 = arith.constant 1.000000e+00 : f32
    %286 = vector.broadcast %cst_90 : f32 to vector<8x32xf32>
    %287 = arith.addf %286, %285 : vector<8x32xf32>
    %288 = arith.divf %286, %287 : vector<8x32xf32>
    %289 = vector.extract_strided_slice %282 {offsets = [0, 32], sizes = [8, 32], strides = [1, 1]} : vector<8x128xf32> to vector<8x32xf32>
    %290 = arith.negf %289 : vector<8x32xf32>
    %291 = math.exp %290 : vector<8x32xf32>
    %cst_91 = arith.constant 1.000000e+00 : f32
    %292 = vector.broadcast %cst_91 : f32 to vector<8x32xf32>
    %293 = arith.addf %292, %291 : vector<8x32xf32>
    %294 = arith.divf %292, %293 : vector<8x32xf32>
    %295 = vector.extract_strided_slice %282 {offsets = [0, 64], sizes = [8, 32], strides = [1, 1]} : vector<8x128xf32> to vector<8x32xf32>
    %296 = math.tanh %295 : vector<8x32xf32>
    %297 = vector.extract_strided_slice %282 {offsets = [0, 96], sizes = [8, 32], strides = [1, 1]} : vector<8x128xf32> to vector<8x32xf32>
    %298 = arith.negf %297 : vector<8x32xf32>
    %299 = math.exp %298 : vector<8x32xf32>
    %cst_92 = arith.constant 1.000000e+00 : f32
    %300 = vector.broadcast %cst_92 : f32 to vector<8x32xf32>
    %301 = arith.addf %300, %299 : vector<8x32xf32>
    %302 = arith.divf %300, %301 : vector<8x32xf32>
    %303 = arith.mulf %294, %276 : vector<8x32xf32>
    %304 = arith.mulf %288, %296 : vector<8x32xf32>
    %305 = arith.addf %303, %304 : vector<8x32xf32>
    %306 = math.tanh %305 : vector<8x32xf32>
    %307 = arith.mulf %302, %306 : vector<8x32xf32>
    %c48_93 = arith.constant 48 : index
    %c32_94 = arith.constant 32 : index
    %308 = vector.load %arg18[%c48_93, %c32_94] : memref<64x64xf32, #tpu.memory_space<vmem>>, vector<8x32xf32>
    tpu.vector_store %arg18[%c48_93, %c32_94], %307 {strides = array<i32>} : memref<64x64xf32, #tpu.memory_space<vmem>>, vector<8x32xf32>,
    %c40_95 = arith.constant 40 : index
    %c0_96 = arith.constant 0 : index
    %309 = vector.load %arg17[%c40_95, %c0_96] : memref<64x128xf32, #tpu.memory_space<vmem>>, vector<8x128xf32>
    %cst_97 = arith.constant dense<0.000000e+00> : vector<8x128xf32>
    %310 = tpu.matmul %307, %248, %cst_97 {dimension_numbers = #tpu.dot_dimension_numbers<[1], [0], [0], [1], [0, 0, 1, 1], [], []>} : vector<8x32xf32>, vector<32x128xf32>, vector<8x128xf32> -> vector<8x128xf32>
    %311 = arith.addf %309, %310 : vector<8x128xf32>
    %312 = vector.extract_strided_slice %311 {offsets = [0, 0], sizes = [8, 32], strides = [1, 1]} : vector<8x128xf32> to vector<8x32xf32>
    %313 = arith.negf %312 : vector<8x32xf32>
    %314 = math.exp %313 : vector<8x32xf32>
    %cst_98 = arith.constant 1.000000e+00 : f32
    %315 = vector.broadcast %cst_98 : f32 to vector<8x32xf32>
    %316 = arith.addf %315, %314 : vector<8x32xf32>
    %317 = arith.divf %315, %316 : vector<8x32xf32>
    %318 = vector.extract_strided_slice %311 {offsets = [0, 32], sizes = [8, 32], strides = [1, 1]} : vector<8x128xf32> to vector<8x32xf32>
    %319 = arith.negf %318 : vector<8x32xf32>
    %320 = math.exp %319 : vector<8x32xf32>
    %cst_99 = arith.constant 1.000000e+00 : f32
    %321 = vector.broadcast %cst_99 : f32 to vector<8x32xf32>
    %322 = arith.addf %321, %320 : vector<8x32xf32>
    %323 = arith.divf %321, %322 : vector<8x32xf32>
    %324 = vector.extract_strided_slice %311 {offsets = [0, 64], sizes = [8, 32], strides = [1, 1]} : vector<8x128xf32> to vector<8x32xf32>
    %325 = math.tanh %324 : vector<8x32xf32>
    %326 = vector.extract_strided_slice %311 {offsets = [0, 96], sizes = [8, 32], strides = [1, 1]} : vector<8x128xf32> to vector<8x32xf32>
    %327 = arith.negf %326 : vector<8x32xf32>
    %328 = math.exp %327 : vector<8x32xf32>
    %cst_100 = arith.constant 1.000000e+00 : f32
    %329 = vector.broadcast %cst_100 : f32 to vector<8x32xf32>
    %330 = arith.addf %329, %328 : vector<8x32xf32>
    %331 = arith.divf %329, %330 : vector<8x32xf32>
    %332 = arith.mulf %323, %305 : vector<8x32xf32>
    %333 = arith.mulf %317, %325 : vector<8x32xf32>
    %334 = arith.addf %332, %333 : vector<8x32xf32>
    %335 = math.tanh %334 : vector<8x32xf32>
    %336 = arith.mulf %331, %335 : vector<8x32xf32>
    %c40_101 = arith.constant 40 : index
    %c32_102 = arith.constant 32 : index
    %337 = vector.load %arg18[%c40_101, %c32_102] : memref<64x64xf32, #tpu.memory_space<vmem>>, vector<8x32xf32>
    tpu.vector_store %arg18[%c40_101, %c32_102], %336 {strides = array<i32>} : memref<64x64xf32, #tpu.memory_space<vmem>>, vector<8x32xf32>,
    %c32_103 = arith.constant 32 : index
    %c0_104 = arith.constant 0 : index
    %338 = vector.load %arg17[%c32_103, %c0_104] : memref<64x128xf32, #tpu.memory_space<vmem>>, vector<8x128xf32>
    %cst_105 = arith.constant dense<0.000000e+00> : vector<8x128xf32>
    %339 = tpu.matmul %336, %248, %cst_105 {dimension_numbers = #tpu.dot_dimension_numbers<[1], [0], [0], [1], [0, 0, 1, 1], [], []>} : vector<8x32xf32>, vector<32x128xf32>, vector<8x128xf32> -> vector<8x128xf32>
    %340 = arith.addf %338, %339 : vector<8x128xf32>
    %341 = vector.extract_strided_slice %340 {offsets = [0, 0], sizes = [8, 32], strides = [1, 1]} : vector<8x128xf32> to vector<8x32xf32>
    %342 = arith.negf %341 : vector<8x32xf32>
    %343 = math.exp %342 : vector<8x32xf32>
    %cst_106 = arith.constant 1.000000e+00 : f32
    %344 = vector.broadcast %cst_106 : f32 to vector<8x32xf32>
    %345 = arith.addf %344, %343 : vector<8x32xf32>
    %346 = arith.divf %344, %345 : vector<8x32xf32>
    %347 = vector.extract_strided_slice %340 {offsets = [0, 32], sizes = [8, 32], strides = [1, 1]} : vector<8x128xf32> to vector<8x32xf32>
    %348 = arith.negf %347 : vector<8x32xf32>
    %349 = math.exp %348 : vector<8x32xf32>
    %cst_107 = arith.constant 1.000000e+00 : f32
    %350 = vector.broadcast %cst_107 : f32 to vector<8x32xf32>
    %351 = arith.addf %350, %349 : vector<8x32xf32>
    %352 = arith.divf %350, %351 : vector<8x32xf32>
    %353 = vector.extract_strided_slice %340 {offsets = [0, 64], sizes = [8, 32], strides = [1, 1]} : vector<8x128xf32> to vector<8x32xf32>
    %354 = math.tanh %353 : vector<8x32xf32>
    %355 = vector.extract_strided_slice %340 {offsets = [0, 96], sizes = [8, 32], strides = [1, 1]} : vector<8x128xf32> to vector<8x32xf32>
    %356 = arith.negf %355 : vector<8x32xf32>
    %357 = math.exp %356 : vector<8x32xf32>
    %cst_108 = arith.constant 1.000000e+00 : f32
    %358 = vector.broadcast %cst_108 : f32 to vector<8x32xf32>
    %359 = arith.addf %358, %357 : vector<8x32xf32>
    %360 = arith.divf %358, %359 : vector<8x32xf32>
    %361 = arith.mulf %352, %334 : vector<8x32xf32>
    %362 = arith.mulf %346, %354 : vector<8x32xf32>
    %363 = arith.addf %361, %362 : vector<8x32xf32>
    %364 = math.tanh %363 : vector<8x32xf32>
    %365 = arith.mulf %360, %364 : vector<8x32xf32>
    %c32_109 = arith.constant 32 : index
    %c32_110 = arith.constant 32 : index
    %366 = vector.load %arg18[%c32_109, %c32_110] : memref<64x64xf32, #tpu.memory_space<vmem>>, vector<8x32xf32>
    tpu.vector_store %arg18[%c32_109, %c32_110], %365 {strides = array<i32>} : memref<64x64xf32, #tpu.memory_space<vmem>>, vector<8x32xf32>,
    %c24_111 = arith.constant 24 : index
    %c0_112 = arith.constant 0 : index
    %367 = vector.load %arg17[%c24_111, %c0_112] : memref<64x128xf32, #tpu.memory_space<vmem>>, vector<8x128xf32>
    %cst_113 = arith.constant dense<0.000000e+00> : vector<8x128xf32>
    %368 = tpu.matmul %365, %248, %cst_113 {dimension_numbers = #tpu.dot_dimension_numbers<[1], [0], [0], [1], [0, 0, 1, 1], [], []>} : vector<8x32xf32>, vector<32x128xf32>, vector<8x128xf32> -> vector<8x128xf32>
    %369 = arith.addf %367, %368 : vector<8x128xf32>
    %370 = vector.extract_strided_slice %369 {offsets = [0, 0], sizes = [8, 32], strides = [1, 1]} : vector<8x128xf32> to vector<8x32xf32>
    %371 = arith.negf %370 : vector<8x32xf32>
    %372 = math.exp %371 : vector<8x32xf32>
    %cst_114 = arith.constant 1.000000e+00 : f32
    %373 = vector.broadcast %cst_114 : f32 to vector<8x32xf32>
    %374 = arith.addf %373, %372 : vector<8x32xf32>
    %375 = arith.divf %373, %374 : vector<8x32xf32>
    %376 = vector.extract_strided_slice %369 {offsets = [0, 32], sizes = [8, 32], strides = [1, 1]} : vector<8x128xf32> to vector<8x32xf32>
    %377 = arith.negf %376 : vector<8x32xf32>
    %378 = math.exp %377 : vector<8x32xf32>
    %cst_115 = arith.constant 1.000000e+00 : f32
    %379 = vector.broadcast %cst_115 : f32 to vector<8x32xf32>
    %380 = arith.addf %379, %378 : vector<8x32xf32>
    %381 = arith.divf %379, %380 : vector<8x32xf32>
    %382 = vector.extract_strided_slice %369 {offsets = [0, 64], sizes = [8, 32], strides = [1, 1]} : vector<8x128xf32> to vector<8x32xf32>
    %383 = math.tanh %382 : vector<8x32xf32>
    %384 = vector.extract_strided_slice %369 {offsets = [0, 96], sizes = [8, 32], strides = [1, 1]} : vector<8x128xf32> to vector<8x32xf32>
    %385 = arith.negf %384 : vector<8x32xf32>
    %386 = math.exp %385 : vector<8x32xf32>
    %cst_116 = arith.constant 1.000000e+00 : f32
    %387 = vector.broadcast %cst_116 : f32 to vector<8x32xf32>
    %388 = arith.addf %387, %386 : vector<8x32xf32>
    %389 = arith.divf %387, %388 : vector<8x32xf32>
    %390 = arith.mulf %381, %363 : vector<8x32xf32>
    %391 = arith.mulf %375, %383 : vector<8x32xf32>
    %392 = arith.addf %390, %391 : vector<8x32xf32>
    %393 = math.tanh %392 : vector<8x32xf32>
    %394 = arith.mulf %389, %393 : vector<8x32xf32>
    %c24_117 = arith.constant 24 : index
    %c32_118 = arith.constant 32 : index
    %395 = vector.load %arg18[%c24_117, %c32_118] : memref<64x64xf32, #tpu.memory_space<vmem>>, vector<8x32xf32>
    tpu.vector_store %arg18[%c24_117, %c32_118], %394 {strides = array<i32>} : memref<64x64xf32, #tpu.memory_space<vmem>>, vector<8x32xf32>,
    %c16_119 = arith.constant 16 : index
    %c0_120 = arith.constant 0 : index
    %396 = vector.load %arg17[%c16_119, %c0_120] : memref<64x128xf32, #tpu.memory_space<vmem>>, vector<8x128xf32>
    %cst_121 = arith.constant dense<0.000000e+00> : vector<8x128xf32>
    %397 = tpu.matmul %394, %248, %cst_121 {dimension_numbers = #tpu.dot_dimension_numbers<[1], [0], [0], [1], [0, 0, 1, 1], [], []>} : vector<8x32xf32>, vector<32x128xf32>, vector<8x128xf32> -> vector<8x128xf32>
    %398 = arith.addf %396, %397 : vector<8x128xf32>
    %399 = vector.extract_strided_slice %398 {offsets = [0, 0], sizes = [8, 32], strides = [1, 1]} : vector<8x128xf32> to vector<8x32xf32>
    %400 = arith.negf %399 : vector<8x32xf32>
    %401 = math.exp %400 : vector<8x32xf32>
    %cst_122 = arith.constant 1.000000e+00 : f32
    %402 = vector.broadcast %cst_122 : f32 to vector<8x32xf32>
    %403 = arith.addf %402, %401 : vector<8x32xf32>
    %404 = arith.divf %402, %403 : vector<8x32xf32>
    %405 = vector.extract_strided_slice %398 {offsets = [0, 32], sizes = [8, 32], strides = [1, 1]} : vector<8x128xf32> to vector<8x32xf32>
    %406 = arith.negf %405 : vector<8x32xf32>
    %407 = math.exp %406 : vector<8x32xf32>
    %cst_123 = arith.constant 1.000000e+00 : f32
    %408 = vector.broadcast %cst_123 : f32 to vector<8x32xf32>
    %409 = arith.addf %408, %407 : vector<8x32xf32>
    %410 = arith.divf %408, %409 : vector<8x32xf32>
    %411 = vector.extract_strided_slice %398 {offsets = [0, 64], sizes = [8, 32], strides = [1, 1]} : vector<8x128xf32> to vector<8x32xf32>
    %412 = math.tanh %411 : vector<8x32xf32>
    %413 = vector.extract_strided_slice %398 {offsets = [0, 96], sizes = [8, 32], strides = [1, 1]} : vector<8x128xf32> to vector<8x32xf32>
    %414 = arith.negf %413 : vector<8x32xf32>
    %415 = math.exp %414 : vector<8x32xf32>
    %cst_124 = arith.constant 1.000000e+00 : f32
    %416 = vector.broadcast %cst_124 : f32 to vector<8x32xf32>
    %417 = arith.addf %416, %415 : vector<8x32xf32>
    %418 = arith.divf %416, %417 : vector<8x32xf32>
    %419 = arith.mulf %410, %392 : vector<8x32xf32>
    %420 = arith.mulf %404, %412 : vector<8x32xf32>
    %421 = arith.addf %419, %420 : vector<8x32xf32>
    %422 = math.tanh %421 : vector<8x32xf32>
    %423 = arith.mulf %418, %422 : vector<8x32xf32>
    %c16_125 = arith.constant 16 : index
    %c32_126 = arith.constant 32 : index
    %424 = vector.load %arg18[%c16_125, %c32_126] : memref<64x64xf32, #tpu.memory_space<vmem>>, vector<8x32xf32>
    tpu.vector_store %arg18[%c16_125, %c32_126], %423 {strides = array<i32>} : memref<64x64xf32, #tpu.memory_space<vmem>>, vector<8x32xf32>,
    %c8_127 = arith.constant 8 : index
    %c0_128 = arith.constant 0 : index
    %425 = vector.load %arg17[%c8_127, %c0_128] : memref<64x128xf32, #tpu.memory_space<vmem>>, vector<8x128xf32>
    %cst_129 = arith.constant dense<0.000000e+00> : vector<8x128xf32>
    %426 = tpu.matmul %423, %248, %cst_129 {dimension_numbers = #tpu.dot_dimension_numbers<[1], [0], [0], [1], [0, 0, 1, 1], [], []>} : vector<8x32xf32>, vector<32x128xf32>, vector<8x128xf32> -> vector<8x128xf32>
    %427 = arith.addf %425, %426 : vector<8x128xf32>
    %428 = vector.extract_strided_slice %427 {offsets = [0, 0], sizes = [8, 32], strides = [1, 1]} : vector<8x128xf32> to vector<8x32xf32>
    %429 = arith.negf %428 : vector<8x32xf32>
    %430 = math.exp %429 : vector<8x32xf32>
    %cst_130 = arith.constant 1.000000e+00 : f32
    %431 = vector.broadcast %cst_130 : f32 to vector<8x32xf32>
    %432 = arith.addf %431, %430 : vector<8x32xf32>
    %433 = arith.divf %431, %432 : vector<8x32xf32>
    %434 = vector.extract_strided_slice %427 {offsets = [0, 32], sizes = [8, 32], strides = [1, 1]} : vector<8x128xf32> to vector<8x32xf32>
    %435 = arith.negf %434 : vector<8x32xf32>
    %436 = math.exp %435 : vector<8x32xf32>
    %cst_131 = arith.constant 1.000000e+00 : f32
    %437 = vector.broadcast %cst_131 : f32 to vector<8x32xf32>
    %438 = arith.addf %437, %436 : vector<8x32xf32>
    %439 = arith.divf %437, %438 : vector<8x32xf32>
    %440 = vector.extract_strided_slice %427 {offsets = [0, 64], sizes = [8, 32], strides = [1, 1]} : vector<8x128xf32> to vector<8x32xf32>
    %441 = math.tanh %440 : vector<8x32xf32>
    %442 = vector.extract_strided_slice %427 {offsets = [0, 96], sizes = [8, 32], strides = [1, 1]} : vector<8x128xf32> to vector<8x32xf32>
    %443 = arith.negf %442 : vector<8x32xf32>
    %444 = math.exp %443 : vector<8x32xf32>
    %cst_132 = arith.constant 1.000000e+00 : f32
    %445 = vector.broadcast %cst_132 : f32 to vector<8x32xf32>
    %446 = arith.addf %445, %444 : vector<8x32xf32>
    %447 = arith.divf %445, %446 : vector<8x32xf32>
    %448 = arith.mulf %439, %421 : vector<8x32xf32>
    %449 = arith.mulf %433, %441 : vector<8x32xf32>
    %450 = arith.addf %448, %449 : vector<8x32xf32>
    %451 = math.tanh %450 : vector<8x32xf32>
    %452 = arith.mulf %447, %451 : vector<8x32xf32>
    %c8_133 = arith.constant 8 : index
    %c32_134 = arith.constant 32 : index
    %453 = vector.load %arg18[%c8_133, %c32_134] : memref<64x64xf32, #tpu.memory_space<vmem>>, vector<8x32xf32>
    tpu.vector_store %arg18[%c8_133, %c32_134], %452 {strides = array<i32>} : memref<64x64xf32, #tpu.memory_space<vmem>>, vector<8x32xf32>,
    %c0_135 = arith.constant 0 : index
    %c0_136 = arith.constant 0 : index
    %454 = vector.load %arg17[%c0_135, %c0_136] : memref<64x128xf32, #tpu.memory_space<vmem>>, vector<8x128xf32>
    %cst_137 = arith.constant dense<0.000000e+00> : vector<8x128xf32>
    %455 = tpu.matmul %452, %248, %cst_137 {dimension_numbers = #tpu.dot_dimension_numbers<[1], [0], [0], [1], [0, 0, 1, 1], [], []>} : vector<8x32xf32>, vector<32x128xf32>, vector<8x128xf32> -> vector<8x128xf32>
    %456 = arith.addf %454, %455 : vector<8x128xf32>
    %457 = vector.extract_strided_slice %456 {offsets = [0, 0], sizes = [8, 32], strides = [1, 1]} : vector<8x128xf32> to vector<8x32xf32>
    %458 = arith.negf %457 : vector<8x32xf32>
    %459 = math.exp %458 : vector<8x32xf32>
    %cst_138 = arith.constant 1.000000e+00 : f32
    %460 = vector.broadcast %cst_138 : f32 to vector<8x32xf32>
    %461 = arith.addf %460, %459 : vector<8x32xf32>
    %462 = arith.divf %460, %461 : vector<8x32xf32>
    %463 = vector.extract_strided_slice %456 {offsets = [0, 32], sizes = [8, 32], strides = [1, 1]} : vector<8x128xf32> to vector<8x32xf32>
    %464 = arith.negf %463 : vector<8x32xf32>
    %465 = math.exp %464 : vector<8x32xf32>
    %cst_139 = arith.constant 1.000000e+00 : f32
    %466 = vector.broadcast %cst_139 : f32 to vector<8x32xf32>
    %467 = arith.addf %466, %465 : vector<8x32xf32>
    %468 = arith.divf %466, %467 : vector<8x32xf32>
    %469 = vector.extract_strided_slice %456 {offsets = [0, 64], sizes = [8, 32], strides = [1, 1]} : vector<8x128xf32> to vector<8x32xf32>
    %470 = math.tanh %469 : vector<8x32xf32>
    %471 = vector.extract_strided_slice %456 {offsets = [0, 96], sizes = [8, 32], strides = [1, 1]} : vector<8x128xf32> to vector<8x32xf32>
    %472 = arith.negf %471 : vector<8x32xf32>
    %473 = math.exp %472 : vector<8x32xf32>
    %cst_140 = arith.constant 1.000000e+00 : f32
    %474 = vector.broadcast %cst_140 : f32 to vector<8x32xf32>
    %475 = arith.addf %474, %473 : vector<8x32xf32>
    %476 = arith.divf %474, %475 : vector<8x32xf32>
    %477 = arith.mulf %468, %450 : vector<8x32xf32>
    %478 = arith.mulf %462, %470 : vector<8x32xf32>
    %479 = arith.addf %477, %478 : vector<8x32xf32>
    %480 = math.tanh %479 : vector<8x32xf32>
    %481 = arith.mulf %476, %480 : vector<8x32xf32>
    %c0_141 = arith.constant 0 : index
    %c32_142 = arith.constant 32 : index
    %482 = vector.load %arg18[%c0_141, %c32_142] : memref<64x64xf32, #tpu.memory_space<vmem>>, vector<8x32xf32>
    tpu.vector_store %arg18[%c0_141, %c32_142], %481 {strides = array<i32>} : memref<64x64xf32, #tpu.memory_space<vmem>>, vector<8x32xf32>,
    %c0_143 = arith.constant 0 : index
    %c0_144 = arith.constant 0 : index
    %483 = vector.load %arg18[%c0_143, %c0_144] : memref<64x64xf32, #tpu.memory_space<vmem>>, vector<64x64xf32>
    %c0_145 = arith.constant 0 : index
    %c0_146 = arith.constant 0 : index
    %484 = vector.load %arg8[%c0_145, %c0_146] : memref<64x128xf32, #tpu.memory_space<vmem>>, vector<64x128xf32>
    %cst_147 = arith.constant dense<0.000000e+00> : vector<64x128xf32>
    %485 = tpu.matmul %483, %484, %cst_147 {dimension_numbers = #tpu.dot_dimension_numbers<[1], [0], [0], [1], [0, 0, 1, 1], [], []>} : vector<64x64xf32>, vector<64x128xf32>, vector<64x128xf32> -> vector<64x128xf32>
    %c0_148 = arith.constant 0 : index
    %c0_149 = arith.constant 0 : index
    %486 = vector.load %arg10[%c0_148, %c0_149] : memref<1x128xf32, #tpu.memory_space<vmem>>, vector<1x128xf32>
    %487 = vector.broadcast %486 : vector<1x128xf32> to vector<64x128xf32>
    %488 = arith.addf %485, %487 : vector<64x128xf32>
    %c0_150 = arith.constant 0 : index
    %c0_151 = arith.constant 0 : index
    %489 = vector.load %arg17[%c0_150, %c0_151] : memref<64x128xf32, #tpu.memory_space<vmem>>, vector<64x128xf32>
    tpu.vector_store %arg17[%c0_150, %c0_151], %488 {strides = array<i32>} : memref<64x128xf32, #tpu.memory_space<vmem>>, vector<64x128xf32>,
    %c0_152 = arith.constant 0 : index
    %c0_153 = arith.constant 0 : index
    %490 = vector.load %arg9[%c0_152, %c0_153] : memref<32x128xf32, #tpu.memory_space<vmem>>, vector<32x128xf32>
    %cst_154 = arith.constant 0.000000e+00 : f32
    %491 = vector.broadcast %cst_154 : f32 to vector<8x32xf32>
    %cst_155 = arith.constant 0.000000e+00 : f32
    %492 = vector.broadcast %cst_155 : f32 to vector<8x32xf32>
    %c0_156 = arith.constant 0 : index
    %c0_157 = arith.constant 0 : index
    %493 = vector.load %arg17[%c0_156, %c0_157] : memref<64x128xf32, #tpu.memory_space<vmem>>, vector<8x128xf32>
    %cst_158 = arith.constant dense<0.000000e+00> : vector<8x128xf32>
    %494 = tpu.matmul %491, %490, %cst_158 {dimension_numbers = #tpu.dot_dimension_numbers<[1], [0], [0], [1], [0, 0, 1, 1], [], []>} : vector<8x32xf32>, vector<32x128xf32>, vector<8x128xf32> -> vector<8x128xf32>
    %495 = arith.addf %493, %494 : vector<8x128xf32>
    %496 = vector.extract_strided_slice %495 {offsets = [0, 0], sizes = [8, 32], strides = [1, 1]} : vector<8x128xf32> to vector<8x32xf32>
    %497 = arith.negf %496 : vector<8x32xf32>
    %498 = math.exp %497 : vector<8x32xf32>
    %cst_159 = arith.constant 1.000000e+00 : f32
    %499 = vector.broadcast %cst_159 : f32 to vector<8x32xf32>
    %500 = arith.addf %499, %498 : vector<8x32xf32>
    %501 = arith.divf %499, %500 : vector<8x32xf32>
    %502 = vector.extract_strided_slice %495 {offsets = [0, 32], sizes = [8, 32], strides = [1, 1]} : vector<8x128xf32> to vector<8x32xf32>
    %503 = arith.negf %502 : vector<8x32xf32>
    %504 = math.exp %503 : vector<8x32xf32>
    %cst_160 = arith.constant 1.000000e+00 : f32
    %505 = vector.broadcast %cst_160 : f32 to vector<8x32xf32>
    %506 = arith.addf %505, %504 : vector<8x32xf32>
    %507 = arith.divf %505, %506 : vector<8x32xf32>
    %508 = vector.extract_strided_slice %495 {offsets = [0, 64], sizes = [8, 32], strides = [1, 1]} : vector<8x128xf32> to vector<8x32xf32>
    %509 = math.tanh %508 : vector<8x32xf32>
    %510 = vector.extract_strided_slice %495 {offsets = [0, 96], sizes = [8, 32], strides = [1, 1]} : vector<8x128xf32> to vector<8x32xf32>
    %511 = arith.negf %510 : vector<8x32xf32>
    %512 = math.exp %511 : vector<8x32xf32>
    %cst_161 = arith.constant 1.000000e+00 : f32
    %513 = vector.broadcast %cst_161 : f32 to vector<8x32xf32>
    %514 = arith.addf %513, %512 : vector<8x32xf32>
    %515 = arith.divf %513, %514 : vector<8x32xf32>
    %516 = arith.mulf %507, %492 : vector<8x32xf32>
    %517 = arith.mulf %501, %509 : vector<8x32xf32>
    %518 = arith.addf %516, %517 : vector<8x32xf32>
    %519 = math.tanh %518 : vector<8x32xf32>
    %520 = arith.mulf %515, %519 : vector<8x32xf32>
    %c0_162 = arith.constant 0 : index
    %c0_163 = arith.constant 0 : index
    %521 = vector.load %arg19[%c0_162, %c0_163] : memref<64x64xf32, #tpu.memory_space<vmem>>, vector<8x32xf32>
    tpu.vector_store %arg19[%c0_162, %c0_163], %520 {strides = array<i32>} : memref<64x64xf32, #tpu.memory_space<vmem>>, vector<8x32xf32>,
    %c8_164 = arith.constant 8 : index
    %c0_165 = arith.constant 0 : index
    %522 = vector.load %arg17[%c8_164, %c0_165] : memref<64x128xf32, #tpu.memory_space<vmem>>, vector<8x128xf32>
    %cst_166 = arith.constant dense<0.000000e+00> : vector<8x128xf32>
    %523 = tpu.matmul %520, %490, %cst_166 {dimension_numbers = #tpu.dot_dimension_numbers<[1], [0], [0], [1], [0, 0, 1, 1], [], []>} : vector<8x32xf32>, vector<32x128xf32>, vector<8x128xf32> -> vector<8x128xf32>
    %524 = arith.addf %522, %523 : vector<8x128xf32>
    %525 = vector.extract_strided_slice %524 {offsets = [0, 0], sizes = [8, 32], strides = [1, 1]} : vector<8x128xf32> to vector<8x32xf32>
    %526 = arith.negf %525 : vector<8x32xf32>
    %527 = math.exp %526 : vector<8x32xf32>
    %cst_167 = arith.constant 1.000000e+00 : f32
    %528 = vector.broadcast %cst_167 : f32 to vector<8x32xf32>
    %529 = arith.addf %528, %527 : vector<8x32xf32>
    %530 = arith.divf %528, %529 : vector<8x32xf32>
    %531 = vector.extract_strided_slice %524 {offsets = [0, 32], sizes = [8, 32], strides = [1, 1]} : vector<8x128xf32> to vector<8x32xf32>
    %532 = arith.negf %531 : vector<8x32xf32>
    %533 = math.exp %532 : vector<8x32xf32>
    %cst_168 = arith.constant 1.000000e+00 : f32
    %534 = vector.broadcast %cst_168 : f32 to vector<8x32xf32>
    %535 = arith.addf %534, %533 : vector<8x32xf32>
    %536 = arith.divf %534, %535 : vector<8x32xf32>
    %537 = vector.extract_strided_slice %524 {offsets = [0, 64], sizes = [8, 32], strides = [1, 1]} : vector<8x128xf32> to vector<8x32xf32>
    %538 = math.tanh %537 : vector<8x32xf32>
    %539 = vector.extract_strided_slice %524 {offsets = [0, 96], sizes = [8, 32], strides = [1, 1]} : vector<8x128xf32> to vector<8x32xf32>
    %540 = arith.negf %539 : vector<8x32xf32>
    %541 = math.exp %540 : vector<8x32xf32>
    %cst_169 = arith.constant 1.000000e+00 : f32
    %542 = vector.broadcast %cst_169 : f32 to vector<8x32xf32>
    %543 = arith.addf %542, %541 : vector<8x32xf32>
    %544 = arith.divf %542, %543 : vector<8x32xf32>
    %545 = arith.mulf %536, %518 : vector<8x32xf32>
    %546 = arith.mulf %530, %538 : vector<8x32xf32>
    %547 = arith.addf %545, %546 : vector<8x32xf32>
    %548 = math.tanh %547 : vector<8x32xf32>
    %549 = arith.mulf %544, %548 : vector<8x32xf32>
    %c8_170 = arith.constant 8 : index
    %c0_171 = arith.constant 0 : index
    %550 = vector.load %arg19[%c8_170, %c0_171] : memref<64x64xf32, #tpu.memory_space<vmem>>, vector<8x32xf32>
    tpu.vector_store %arg19[%c8_170, %c0_171], %549 {strides = array<i32>} : memref<64x64xf32, #tpu.memory_space<vmem>>, vector<8x32xf32>,
    %c16_172 = arith.constant 16 : index
    %c0_173 = arith.constant 0 : index
    %551 = vector.load %arg17[%c16_172, %c0_173] : memref<64x128xf32, #tpu.memory_space<vmem>>, vector<8x128xf32>
    %cst_174 = arith.constant dense<0.000000e+00> : vector<8x128xf32>
    %552 = tpu.matmul %549, %490, %cst_174 {dimension_numbers = #tpu.dot_dimension_numbers<[1], [0], [0], [1], [0, 0, 1, 1], [], []>} : vector<8x32xf32>, vector<32x128xf32>, vector<8x128xf32> -> vector<8x128xf32>
    %553 = arith.addf %551, %552 : vector<8x128xf32>
    %554 = vector.extract_strided_slice %553 {offsets = [0, 0], sizes = [8, 32], strides = [1, 1]} : vector<8x128xf32> to vector<8x32xf32>
    %555 = arith.negf %554 : vector<8x32xf32>
    %556 = math.exp %555 : vector<8x32xf32>
    %cst_175 = arith.constant 1.000000e+00 : f32
    %557 = vector.broadcast %cst_175 : f32 to vector<8x32xf32>
    %558 = arith.addf %557, %556 : vector<8x32xf32>
    %559 = arith.divf %557, %558 : vector<8x32xf32>
    %560 = vector.extract_strided_slice %553 {offsets = [0, 32], sizes = [8, 32], strides = [1, 1]} : vector<8x128xf32> to vector<8x32xf32>
    %561 = arith.negf %560 : vector<8x32xf32>
    %562 = math.exp %561 : vector<8x32xf32>
    %cst_176 = arith.constant 1.000000e+00 : f32
    %563 = vector.broadcast %cst_176 : f32 to vector<8x32xf32>
    %564 = arith.addf %563, %562 : vector<8x32xf32>
    %565 = arith.divf %563, %564 : vector<8x32xf32>
    %566 = vector.extract_strided_slice %553 {offsets = [0, 64], sizes = [8, 32], strides = [1, 1]} : vector<8x128xf32> to vector<8x32xf32>
    %567 = math.tanh %566 : vector<8x32xf32>
    %568 = vector.extract_strided_slice %553 {offsets = [0, 96], sizes = [8, 32], strides = [1, 1]} : vector<8x128xf32> to vector<8x32xf32>
    %569 = arith.negf %568 : vector<8x32xf32>
    %570 = math.exp %569 : vector<8x32xf32>
    %cst_177 = arith.constant 1.000000e+00 : f32
    %571 = vector.broadcast %cst_177 : f32 to vector<8x32xf32>
    %572 = arith.addf %571, %570 : vector<8x32xf32>
    %573 = arith.divf %571, %572 : vector<8x32xf32>
    %574 = arith.mulf %565, %547 : vector<8x32xf32>
    %575 = arith.mulf %559, %567 : vector<8x32xf32>
    %576 = arith.addf %574, %575 : vector<8x32xf32>
    %577 = math.tanh %576 : vector<8x32xf32>
    %578 = arith.mulf %573, %577 : vector<8x32xf32>
    %c16_178 = arith.constant 16 : index
    %c0_179 = arith.constant 0 : index
    %579 = vector.load %arg19[%c16_178, %c0_179] : memref<64x64xf32, #tpu.memory_space<vmem>>, vector<8x32xf32>
    tpu.vector_store %arg19[%c16_178, %c0_179], %578 {strides = array<i32>} : memref<64x64xf32, #tpu.memory_space<vmem>>, vector<8x32xf32>,
    %c24_180 = arith.constant 24 : index
    %c0_181 = arith.constant 0 : index
    %580 = vector.load %arg17[%c24_180, %c0_181] : memref<64x128xf32, #tpu.memory_space<vmem>>, vector<8x128xf32>
    %cst_182 = arith.constant dense<0.000000e+00> : vector<8x128xf32>
    %581 = tpu.matmul %578, %490, %cst_182 {dimension_numbers = #tpu.dot_dimension_numbers<[1], [0], [0], [1], [0, 0, 1, 1], [], []>} : vector<8x32xf32>, vector<32x128xf32>, vector<8x128xf32> -> vector<8x128xf32>
    %582 = arith.addf %580, %581 : vector<8x128xf32>
    %583 = vector.extract_strided_slice %582 {offsets = [0, 0], sizes = [8, 32], strides = [1, 1]} : vector<8x128xf32> to vector<8x32xf32>
    %584 = arith.negf %583 : vector<8x32xf32>
    %585 = math.exp %584 : vector<8x32xf32>
    %cst_183 = arith.constant 1.000000e+00 : f32
    %586 = vector.broadcast %cst_183 : f32 to vector<8x32xf32>
    %587 = arith.addf %586, %585 : vector<8x32xf32>
    %588 = arith.divf %586, %587 : vector<8x32xf32>
    %589 = vector.extract_strided_slice %582 {offsets = [0, 32], sizes = [8, 32], strides = [1, 1]} : vector<8x128xf32> to vector<8x32xf32>
    %590 = arith.negf %589 : vector<8x32xf32>
    %591 = math.exp %590 : vector<8x32xf32>
    %cst_184 = arith.constant 1.000000e+00 : f32
    %592 = vector.broadcast %cst_184 : f32 to vector<8x32xf32>
    %593 = arith.addf %592, %591 : vector<8x32xf32>
    %594 = arith.divf %592, %593 : vector<8x32xf32>
    %595 = vector.extract_strided_slice %582 {offsets = [0, 64], sizes = [8, 32], strides = [1, 1]} : vector<8x128xf32> to vector<8x32xf32>
    %596 = math.tanh %595 : vector<8x32xf32>
    %597 = vector.extract_strided_slice %582 {offsets = [0, 96], sizes = [8, 32], strides = [1, 1]} : vector<8x128xf32> to vector<8x32xf32>
    %598 = arith.negf %597 : vector<8x32xf32>
    %599 = math.exp %598 : vector<8x32xf32>
    %cst_185 = arith.constant 1.000000e+00 : f32
    %600 = vector.broadcast %cst_185 : f32 to vector<8x32xf32>
    %601 = arith.addf %600, %599 : vector<8x32xf32>
    %602 = arith.divf %600, %601 : vector<8x32xf32>
    %603 = arith.mulf %594, %576 : vector<8x32xf32>
    %604 = arith.mulf %588, %596 : vector<8x32xf32>
    %605 = arith.addf %603, %604 : vector<8x32xf32>
    %606 = math.tanh %605 : vector<8x32xf32>
    %607 = arith.mulf %602, %606 : vector<8x32xf32>
    %c24_186 = arith.constant 24 : index
    %c0_187 = arith.constant 0 : index
    %608 = vector.load %arg19[%c24_186, %c0_187] : memref<64x64xf32, #tpu.memory_space<vmem>>, vector<8x32xf32>
    tpu.vector_store %arg19[%c24_186, %c0_187], %607 {strides = array<i32>} : memref<64x64xf32, #tpu.memory_space<vmem>>, vector<8x32xf32>,
    %c32_188 = arith.constant 32 : index
    %c0_189 = arith.constant 0 : index
    %609 = vector.load %arg17[%c32_188, %c0_189] : memref<64x128xf32, #tpu.memory_space<vmem>>, vector<8x128xf32>
    %cst_190 = arith.constant dense<0.000000e+00> : vector<8x128xf32>
    %610 = tpu.matmul %607, %490, %cst_190 {dimension_numbers = #tpu.dot_dimension_numbers<[1], [0], [0], [1], [0, 0, 1, 1], [], []>} : vector<8x32xf32>, vector<32x128xf32>, vector<8x128xf32> -> vector<8x128xf32>
    %611 = arith.addf %609, %610 : vector<8x128xf32>
    %612 = vector.extract_strided_slice %611 {offsets = [0, 0], sizes = [8, 32], strides = [1, 1]} : vector<8x128xf32> to vector<8x32xf32>
    %613 = arith.negf %612 : vector<8x32xf32>
    %614 = math.exp %613 : vector<8x32xf32>
    %cst_191 = arith.constant 1.000000e+00 : f32
    %615 = vector.broadcast %cst_191 : f32 to vector<8x32xf32>
    %616 = arith.addf %615, %614 : vector<8x32xf32>
    %617 = arith.divf %615, %616 : vector<8x32xf32>
    %618 = vector.extract_strided_slice %611 {offsets = [0, 32], sizes = [8, 32], strides = [1, 1]} : vector<8x128xf32> to vector<8x32xf32>
    %619 = arith.negf %618 : vector<8x32xf32>
    %620 = math.exp %619 : vector<8x32xf32>
    %cst_192 = arith.constant 1.000000e+00 : f32
    %621 = vector.broadcast %cst_192 : f32 to vector<8x32xf32>
    %622 = arith.addf %621, %620 : vector<8x32xf32>
    %623 = arith.divf %621, %622 : vector<8x32xf32>
    %624 = vector.extract_strided_slice %611 {offsets = [0, 64], sizes = [8, 32], strides = [1, 1]} : vector<8x128xf32> to vector<8x32xf32>
    %625 = math.tanh %624 : vector<8x32xf32>
    %626 = vector.extract_strided_slice %611 {offsets = [0, 96], sizes = [8, 32], strides = [1, 1]} : vector<8x128xf32> to vector<8x32xf32>
    %627 = arith.negf %626 : vector<8x32xf32>
    %628 = math.exp %627 : vector<8x32xf32>
    %cst_193 = arith.constant 1.000000e+00 : f32
    %629 = vector.broadcast %cst_193 : f32 to vector<8x32xf32>
    %630 = arith.addf %629, %628 : vector<8x32xf32>
    %631 = arith.divf %629, %630 : vector<8x32xf32>
    %632 = arith.mulf %623, %605 : vector<8x32xf32>
    %633 = arith.mulf %617, %625 : vector<8x32xf32>
    %634 = arith.addf %632, %633 : vector<8x32xf32>
    %635 = math.tanh %634 : vector<8x32xf32>
    %636 = arith.mulf %631, %635 : vector<8x32xf32>
    %c32_194 = arith.constant 32 : index
    %c0_195 = arith.constant 0 : index
    %637 = vector.load %arg19[%c32_194, %c0_195] : memref<64x64xf32, #tpu.memory_space<vmem>>, vector<8x32xf32>
    tpu.vector_store %arg19[%c32_194, %c0_195], %636 {strides = array<i32>} : memref<64x64xf32, #tpu.memory_space<vmem>>, vector<8x32xf32>,
    %c40_196 = arith.constant 40 : index
    %c0_197 = arith.constant 0 : index
    %638 = vector.load %arg17[%c40_196, %c0_197] : memref<64x128xf32, #tpu.memory_space<vmem>>, vector<8x128xf32>
    %cst_198 = arith.constant dense<0.000000e+00> : vector<8x128xf32>
    %639 = tpu.matmul %636, %490, %cst_198 {dimension_numbers = #tpu.dot_dimension_numbers<[1], [0], [0], [1], [0, 0, 1, 1], [], []>} : vector<8x32xf32>, vector<32x128xf32>, vector<8x128xf32> -> vector<8x128xf32>
    %640 = arith.addf %638, %639 : vector<8x128xf32>
    %641 = vector.extract_strided_slice %640 {offsets = [0, 0], sizes = [8, 32], strides = [1, 1]} : vector<8x128xf32> to vector<8x32xf32>
    %642 = arith.negf %641 : vector<8x32xf32>
    %643 = math.exp %642 : vector<8x32xf32>
    %cst_199 = arith.constant 1.000000e+00 : f32
    %644 = vector.broadcast %cst_199 : f32 to vector<8x32xf32>
    %645 = arith.addf %644, %643 : vector<8x32xf32>
    %646 = arith.divf %644, %645 : vector<8x32xf32>
    %647 = vector.extract_strided_slice %640 {offsets = [0, 32], sizes = [8, 32], strides = [1, 1]} : vector<8x128xf32> to vector<8x32xf32>
    %648 = arith.negf %647 : vector<8x32xf32>
    %649 = math.exp %648 : vector<8x32xf32>
    %cst_200 = arith.constant 1.000000e+00 : f32
    %650 = vector.broadcast %cst_200 : f32 to vector<8x32xf32>
    %651 = arith.addf %650, %649 : vector<8x32xf32>
    %652 = arith.divf %650, %651 : vector<8x32xf32>
    %653 = vector.extract_strided_slice %640 {offsets = [0, 64], sizes = [8, 32], strides = [1, 1]} : vector<8x128xf32> to vector<8x32xf32>
    %654 = math.tanh %653 : vector<8x32xf32>
    %655 = vector.extract_strided_slice %640 {offsets = [0, 96], sizes = [8, 32], strides = [1, 1]} : vector<8x128xf32> to vector<8x32xf32>
    %656 = arith.negf %655 : vector<8x32xf32>
    %657 = math.exp %656 : vector<8x32xf32>
    %cst_201 = arith.constant 1.000000e+00 : f32
    %658 = vector.broadcast %cst_201 : f32 to vector<8x32xf32>
    %659 = arith.addf %658, %657 : vector<8x32xf32>
    %660 = arith.divf %658, %659 : vector<8x32xf32>
    %661 = arith.mulf %652, %634 : vector<8x32xf32>
    %662 = arith.mulf %646, %654 : vector<8x32xf32>
    %663 = arith.addf %661, %662 : vector<8x32xf32>
    %664 = math.tanh %663 : vector<8x32xf32>
    %665 = arith.mulf %660, %664 : vector<8x32xf32>
    %c40_202 = arith.constant 40 : index
    %c0_203 = arith.constant 0 : index
    %666 = vector.load %arg19[%c40_202, %c0_203] : memref<64x64xf32, #tpu.memory_space<vmem>>, vector<8x32xf32>
    tpu.vector_store %arg19[%c40_202, %c0_203], %665 {strides = array<i32>} : memref<64x64xf32, #tpu.memory_space<vmem>>, vector<8x32xf32>,
    %c48_204 = arith.constant 48 : index
    %c0_205 = arith.constant 0 : index
    %667 = vector.load %arg17[%c48_204, %c0_205] : memref<64x128xf32, #tpu.memory_space<vmem>>, vector<8x128xf32>
    %cst_206 = arith.constant dense<0.000000e+00> : vector<8x128xf32>
    %668 = tpu.matmul %665, %490, %cst_206 {dimension_numbers = #tpu.dot_dimension_numbers<[1], [0], [0], [1], [0, 0, 1, 1], [], []>} : vector<8x32xf32>, vector<32x128xf32>, vector<8x128xf32> -> vector<8x128xf32>
    %669 = arith.addf %667, %668 : vector<8x128xf32>
    %670 = vector.extract_strided_slice %669 {offsets = [0, 0], sizes = [8, 32], strides = [1, 1]} : vector<8x128xf32> to vector<8x32xf32>
    %671 = arith.negf %670 : vector<8x32xf32>
    %672 = math.exp %671 : vector<8x32xf32>
    %cst_207 = arith.constant 1.000000e+00 : f32
    %673 = vector.broadcast %cst_207 : f32 to vector<8x32xf32>
    %674 = arith.addf %673, %672 : vector<8x32xf32>
    %675 = arith.divf %673, %674 : vector<8x32xf32>
    %676 = vector.extract_strided_slice %669 {offsets = [0, 32], sizes = [8, 32], strides = [1, 1]} : vector<8x128xf32> to vector<8x32xf32>
    %677 = arith.negf %676 : vector<8x32xf32>
    %678 = math.exp %677 : vector<8x32xf32>
    %cst_208 = arith.constant 1.000000e+00 : f32
    %679 = vector.broadcast %cst_208 : f32 to vector<8x32xf32>
    %680 = arith.addf %679, %678 : vector<8x32xf32>
    %681 = arith.divf %679, %680 : vector<8x32xf32>
    %682 = vector.extract_strided_slice %669 {offsets = [0, 64], sizes = [8, 32], strides = [1, 1]} : vector<8x128xf32> to vector<8x32xf32>
    %683 = math.tanh %682 : vector<8x32xf32>
    %684 = vector.extract_strided_slice %669 {offsets = [0, 96], sizes = [8, 32], strides = [1, 1]} : vector<8x128xf32> to vector<8x32xf32>
    %685 = arith.negf %684 : vector<8x32xf32>
    %686 = math.exp %685 : vector<8x32xf32>
    %cst_209 = arith.constant 1.000000e+00 : f32
    %687 = vector.broadcast %cst_209 : f32 to vector<8x32xf32>
    %688 = arith.addf %687, %686 : vector<8x32xf32>
    %689 = arith.divf %687, %688 : vector<8x32xf32>
    %690 = arith.mulf %681, %663 : vector<8x32xf32>
    %691 = arith.mulf %675, %683 : vector<8x32xf32>
    %692 = arith.addf %690, %691 : vector<8x32xf32>
    %693 = math.tanh %692 : vector<8x32xf32>
    %694 = arith.mulf %689, %693 : vector<8x32xf32>
    %c48_210 = arith.constant 48 : index
    %c0_211 = arith.constant 0 : index
    %695 = vector.load %arg19[%c48_210, %c0_211] : memref<64x64xf32, #tpu.memory_space<vmem>>, vector<8x32xf32>
    tpu.vector_store %arg19[%c48_210, %c0_211], %694 {strides = array<i32>} : memref<64x64xf32, #tpu.memory_space<vmem>>, vector<8x32xf32>,
    %c56_212 = arith.constant 56 : index
    %c0_213 = arith.constant 0 : index
    %696 = vector.load %arg17[%c56_212, %c0_213] : memref<64x128xf32, #tpu.memory_space<vmem>>, vector<8x128xf32>
    %cst_214 = arith.constant dense<0.000000e+00> : vector<8x128xf32>
    %697 = tpu.matmul %694, %490, %cst_214 {dimension_numbers = #tpu.dot_dimension_numbers<[1], [0], [0], [1], [0, 0, 1, 1], [], []>} : vector<8x32xf32>, vector<32x128xf32>, vector<8x128xf32> -> vector<8x128xf32>
    %698 = arith.addf %696, %697 : vector<8x128xf32>
    %699 = vector.extract_strided_slice %698 {offsets = [0, 0], sizes = [8, 32], strides = [1, 1]} : vector<8x128xf32> to vector<8x32xf32>
    %700 = arith.negf %699 : vector<8x32xf32>
    %701 = math.exp %700 : vector<8x32xf32>
    %cst_215 = arith.constant 1.000000e+00 : f32
    %702 = vector.broadcast %cst_215 : f32 to vector<8x32xf32>
    %703 = arith.addf %702, %701 : vector<8x32xf32>
    %704 = arith.divf %702, %703 : vector<8x32xf32>
    %705 = vector.extract_strided_slice %698 {offsets = [0, 32], sizes = [8, 32], strides = [1, 1]} : vector<8x128xf32> to vector<8x32xf32>
    %706 = arith.negf %705 : vector<8x32xf32>
    %707 = math.exp %706 : vector<8x32xf32>
    %cst_216 = arith.constant 1.000000e+00 : f32
    %708 = vector.broadcast %cst_216 : f32 to vector<8x32xf32>
    %709 = arith.addf %708, %707 : vector<8x32xf32>
    %710 = arith.divf %708, %709 : vector<8x32xf32>
    %711 = vector.extract_strided_slice %698 {offsets = [0, 64], sizes = [8, 32], strides = [1, 1]} : vector<8x128xf32> to vector<8x32xf32>
    %712 = math.tanh %711 : vector<8x32xf32>
    %713 = vector.extract_strided_slice %698 {offsets = [0, 96], sizes = [8, 32], strides = [1, 1]} : vector<8x128xf32> to vector<8x32xf32>
    %714 = arith.negf %713 : vector<8x32xf32>
    %715 = math.exp %714 : vector<8x32xf32>
    %cst_217 = arith.constant 1.000000e+00 : f32
    %716 = vector.broadcast %cst_217 : f32 to vector<8x32xf32>
    %717 = arith.addf %716, %715 : vector<8x32xf32>
    %718 = arith.divf %716, %717 : vector<8x32xf32>
    %719 = arith.mulf %710, %692 : vector<8x32xf32>
    %720 = arith.mulf %704, %712 : vector<8x32xf32>
    %721 = arith.addf %719, %720 : vector<8x32xf32>
    %722 = math.tanh %721 : vector<8x32xf32>
    %723 = arith.mulf %718, %722 : vector<8x32xf32>
    %c56_218 = arith.constant 56 : index
    %c0_219 = arith.constant 0 : index
    %724 = vector.load %arg19[%c56_218, %c0_219] : memref<64x64xf32, #tpu.memory_space<vmem>>, vector<8x32xf32>
    tpu.vector_store %arg19[%c56_218, %c0_219], %723 {strides = array<i32>} : memref<64x64xf32, #tpu.memory_space<vmem>>, vector<8x32xf32>,
    %c0_220 = arith.constant 0 : index
    %c0_221 = arith.constant 0 : index
    %725 = vector.load %arg11[%c0_220, %c0_221] : memref<64x128xf32, #tpu.memory_space<vmem>>, vector<64x128xf32>
    %cst_222 = arith.constant dense<0.000000e+00> : vector<64x128xf32>
    %726 = tpu.matmul %483, %725, %cst_222 {dimension_numbers = #tpu.dot_dimension_numbers<[1], [0], [0], [1], [0, 0, 1, 1], [], []>} : vector<64x64xf32>, vector<64x128xf32>, vector<64x128xf32> -> vector<64x128xf32>
    %c0_223 = arith.constant 0 : index
    %c0_224 = arith.constant 0 : index
    %727 = vector.load %arg13[%c0_223, %c0_224] : memref<1x128xf32, #tpu.memory_space<vmem>>, vector<1x128xf32>
    %728 = vector.broadcast %727 : vector<1x128xf32> to vector<64x128xf32>
    %729 = arith.addf %726, %728 : vector<64x128xf32>
    %c0_225 = arith.constant 0 : index
    %c0_226 = arith.constant 0 : index
    %730 = vector.load %arg17[%c0_225, %c0_226] : memref<64x128xf32, #tpu.memory_space<vmem>>, vector<64x128xf32>
    tpu.vector_store %arg17[%c0_225, %c0_226], %729 {strides = array<i32>} : memref<64x128xf32, #tpu.memory_space<vmem>>, vector<64x128xf32>,
    %c0_227 = arith.constant 0 : index
    %c0_228 = arith.constant 0 : index
    %731 = vector.load %arg12[%c0_227, %c0_228] : memref<32x128xf32, #tpu.memory_space<vmem>>, vector<32x128xf32>
    %cst_229 = arith.constant 0.000000e+00 : f32
    %732 = vector.broadcast %cst_229 : f32 to vector<8x32xf32>
    %cst_230 = arith.constant 0.000000e+00 : f32
    %733 = vector.broadcast %cst_230 : f32 to vector<8x32xf32>
    %c56_231 = arith.constant 56 : index
    %c0_232 = arith.constant 0 : index
    %734 = vector.load %arg17[%c56_231, %c0_232] : memref<64x128xf32, #tpu.memory_space<vmem>>, vector<8x128xf32>
    %cst_233 = arith.constant dense<0.000000e+00> : vector<8x128xf32>
    %735 = tpu.matmul %732, %731, %cst_233 {dimension_numbers = #tpu.dot_dimension_numbers<[1], [0], [0], [1], [0, 0, 1, 1], [], []>} : vector<8x32xf32>, vector<32x128xf32>, vector<8x128xf32> -> vector<8x128xf32>
    %736 = arith.addf %734, %735 : vector<8x128xf32>
    %737 = vector.extract_strided_slice %736 {offsets = [0, 0], sizes = [8, 32], strides = [1, 1]} : vector<8x128xf32> to vector<8x32xf32>
    %738 = arith.negf %737 : vector<8x32xf32>
    %739 = math.exp %738 : vector<8x32xf32>
    %cst_234 = arith.constant 1.000000e+00 : f32
    %740 = vector.broadcast %cst_234 : f32 to vector<8x32xf32>
    %741 = arith.addf %740, %739 : vector<8x32xf32>
    %742 = arith.divf %740, %741 : vector<8x32xf32>
    %743 = vector.extract_strided_slice %736 {offsets = [0, 32], sizes = [8, 32], strides = [1, 1]} : vector<8x128xf32> to vector<8x32xf32>
    %744 = arith.negf %743 : vector<8x32xf32>
    %745 = math.exp %744 : vector<8x32xf32>
    %cst_235 = arith.constant 1.000000e+00 : f32
    %746 = vector.broadcast %cst_235 : f32 to vector<8x32xf32>
    %747 = arith.addf %746, %745 : vector<8x32xf32>
    %748 = arith.divf %746, %747 : vector<8x32xf32>
    %749 = vector.extract_strided_slice %736 {offsets = [0, 64], sizes = [8, 32], strides = [1, 1]} : vector<8x128xf32> to vector<8x32xf32>
    %750 = math.tanh %749 : vector<8x32xf32>
    %751 = vector.extract_strided_slice %736 {offsets = [0, 96], sizes = [8, 32], strides = [1, 1]} : vector<8x128xf32> to vector<8x32xf32>
    %752 = arith.negf %751 : vector<8x32xf32>
    %753 = math.exp %752 : vector<8x32xf32>
    %cst_236 = arith.constant 1.000000e+00 : f32
    %754 = vector.broadcast %cst_236 : f32 to vector<8x32xf32>
    %755 = arith.addf %754, %753 : vector<8x32xf32>
    %756 = arith.divf %754, %755 : vector<8x32xf32>
    %757 = arith.mulf %748, %733 : vector<8x32xf32>
    %758 = arith.mulf %742, %750 : vector<8x32xf32>
    %759 = arith.addf %757, %758 : vector<8x32xf32>
    %760 = math.tanh %759 : vector<8x32xf32>
    %761 = arith.mulf %756, %760 : vector<8x32xf32>
    %c56_237 = arith.constant 56 : index
    %c32_238 = arith.constant 32 : index
    %762 = vector.load %arg19[%c56_237, %c32_238] : memref<64x64xf32, #tpu.memory_space<vmem>>, vector<8x32xf32>
    tpu.vector_store %arg19[%c56_237, %c32_238], %761 {strides = array<i32>} : memref<64x64xf32, #tpu.memory_space<vmem>>, vector<8x32xf32>,
    %c48_239 = arith.constant 48 : index
    %c0_240 = arith.constant 0 : index
    %763 = vector.load %arg17[%c48_239, %c0_240] : memref<64x128xf32, #tpu.memory_space<vmem>>, vector<8x128xf32>
    %cst_241 = arith.constant dense<0.000000e+00> : vector<8x128xf32>
    %764 = tpu.matmul %761, %731, %cst_241 {dimension_numbers = #tpu.dot_dimension_numbers<[1], [0], [0], [1], [0, 0, 1, 1], [], []>} : vector<8x32xf32>, vector<32x128xf32>, vector<8x128xf32> -> vector<8x128xf32>
    %765 = arith.addf %763, %764 : vector<8x128xf32>
    %766 = vector.extract_strided_slice %765 {offsets = [0, 0], sizes = [8, 32], strides = [1, 1]} : vector<8x128xf32> to vector<8x32xf32>
    %767 = arith.negf %766 : vector<8x32xf32>
    %768 = math.exp %767 : vector<8x32xf32>
    %cst_242 = arith.constant 1.000000e+00 : f32
    %769 = vector.broadcast %cst_242 : f32 to vector<8x32xf32>
    %770 = arith.addf %769, %768 : vector<8x32xf32>
    %771 = arith.divf %769, %770 : vector<8x32xf32>
    %772 = vector.extract_strided_slice %765 {offsets = [0, 32], sizes = [8, 32], strides = [1, 1]} : vector<8x128xf32> to vector<8x32xf32>
    %773 = arith.negf %772 : vector<8x32xf32>
    %774 = math.exp %773 : vector<8x32xf32>
    %cst_243 = arith.constant 1.000000e+00 : f32
    %775 = vector.broadcast %cst_243 : f32 to vector<8x32xf32>
    %776 = arith.addf %775, %774 : vector<8x32xf32>
    %777 = arith.divf %775, %776 : vector<8x32xf32>
    %778 = vector.extract_strided_slice %765 {offsets = [0, 64], sizes = [8, 32], strides = [1, 1]} : vector<8x128xf32> to vector<8x32xf32>
    %779 = math.tanh %778 : vector<8x32xf32>
    %780 = vector.extract_strided_slice %765 {offsets = [0, 96], sizes = [8, 32], strides = [1, 1]} : vector<8x128xf32> to vector<8x32xf32>
    %781 = arith.negf %780 : vector<8x32xf32>
    %782 = math.exp %781 : vector<8x32xf32>
    %cst_244 = arith.constant 1.000000e+00 : f32
    %783 = vector.broadcast %cst_244 : f32 to vector<8x32xf32>
    %784 = arith.addf %783, %782 : vector<8x32xf32>
    %785 = arith.divf %783, %784 : vector<8x32xf32>
    %786 = arith.mulf %777, %759 : vector<8x32xf32>
    %787 = arith.mulf %771, %779 : vector<8x32xf32>
    %788 = arith.addf %786, %787 : vector<8x32xf32>
    %789 = math.tanh %788 : vector<8x32xf32>
    %790 = arith.mulf %785, %789 : vector<8x32xf32>
    %c48_245 = arith.constant 48 : index
    %c32_246 = arith.constant 32 : index
    %791 = vector.load %arg19[%c48_245, %c32_246] : memref<64x64xf32, #tpu.memory_space<vmem>>, vector<8x32xf32>
    tpu.vector_store %arg19[%c48_245, %c32_246], %790 {strides = array<i32>} : memref<64x64xf32, #tpu.memory_space<vmem>>, vector<8x32xf32>,
    %c40_247 = arith.constant 40 : index
    %c0_248 = arith.constant 0 : index
    %792 = vector.load %arg17[%c40_247, %c0_248] : memref<64x128xf32, #tpu.memory_space<vmem>>, vector<8x128xf32>
    %cst_249 = arith.constant dense<0.000000e+00> : vector<8x128xf32>
    %793 = tpu.matmul %790, %731, %cst_249 {dimension_numbers = #tpu.dot_dimension_numbers<[1], [0], [0], [1], [0, 0, 1, 1], [], []>} : vector<8x32xf32>, vector<32x128xf32>, vector<8x128xf32> -> vector<8x128xf32>
    %794 = arith.addf %792, %793 : vector<8x128xf32>
    %795 = vector.extract_strided_slice %794 {offsets = [0, 0], sizes = [8, 32], strides = [1, 1]} : vector<8x128xf32> to vector<8x32xf32>
    %796 = arith.negf %795 : vector<8x32xf32>
    %797 = math.exp %796 : vector<8x32xf32>
    %cst_250 = arith.constant 1.000000e+00 : f32
    %798 = vector.broadcast %cst_250 : f32 to vector<8x32xf32>
    %799 = arith.addf %798, %797 : vector<8x32xf32>
    %800 = arith.divf %798, %799 : vector<8x32xf32>
    %801 = vector.extract_strided_slice %794 {offsets = [0, 32], sizes = [8, 32], strides = [1, 1]} : vector<8x128xf32> to vector<8x32xf32>
    %802 = arith.negf %801 : vector<8x32xf32>
    %803 = math.exp %802 : vector<8x32xf32>
    %cst_251 = arith.constant 1.000000e+00 : f32
    %804 = vector.broadcast %cst_251 : f32 to vector<8x32xf32>
    %805 = arith.addf %804, %803 : vector<8x32xf32>
    %806 = arith.divf %804, %805 : vector<8x32xf32>
    %807 = vector.extract_strided_slice %794 {offsets = [0, 64], sizes = [8, 32], strides = [1, 1]} : vector<8x128xf32> to vector<8x32xf32>
    %808 = math.tanh %807 : vector<8x32xf32>
    %809 = vector.extract_strided_slice %794 {offsets = [0, 96], sizes = [8, 32], strides = [1, 1]} : vector<8x128xf32> to vector<8x32xf32>
    %810 = arith.negf %809 : vector<8x32xf32>
    %811 = math.exp %810 : vector<8x32xf32>
    %cst_252 = arith.constant 1.000000e+00 : f32
    %812 = vector.broadcast %cst_252 : f32 to vector<8x32xf32>
    %813 = arith.addf %812, %811 : vector<8x32xf32>
    %814 = arith.divf %812, %813 : vector<8x32xf32>
    %815 = arith.mulf %806, %788 : vector<8x32xf32>
    %816 = arith.mulf %800, %808 : vector<8x32xf32>
    %817 = arith.addf %815, %816 : vector<8x32xf32>
    %818 = math.tanh %817 : vector<8x32xf32>
    %819 = arith.mulf %814, %818 : vector<8x32xf32>
    %c40_253 = arith.constant 40 : index
    %c32_254 = arith.constant 32 : index
    %820 = vector.load %arg19[%c40_253, %c32_254] : memref<64x64xf32, #tpu.memory_space<vmem>>, vector<8x32xf32>
    tpu.vector_store %arg19[%c40_253, %c32_254], %819 {strides = array<i32>} : memref<64x64xf32, #tpu.memory_space<vmem>>, vector<8x32xf32>,
    %c32_255 = arith.constant 32 : index
    %c0_256 = arith.constant 0 : index
    %821 = vector.load %arg17[%c32_255, %c0_256] : memref<64x128xf32, #tpu.memory_space<vmem>>, vector<8x128xf32>
    %cst_257 = arith.constant dense<0.000000e+00> : vector<8x128xf32>
    %822 = tpu.matmul %819, %731, %cst_257 {dimension_numbers = #tpu.dot_dimension_numbers<[1], [0], [0], [1], [0, 0, 1, 1], [], []>} : vector<8x32xf32>, vector<32x128xf32>, vector<8x128xf32> -> vector<8x128xf32>
    %823 = arith.addf %821, %822 : vector<8x128xf32>
    %824 = vector.extract_strided_slice %823 {offsets = [0, 0], sizes = [8, 32], strides = [1, 1]} : vector<8x128xf32> to vector<8x32xf32>
    %825 = arith.negf %824 : vector<8x32xf32>
    %826 = math.exp %825 : vector<8x32xf32>
    %cst_258 = arith.constant 1.000000e+00 : f32
    %827 = vector.broadcast %cst_258 : f32 to vector<8x32xf32>
    %828 = arith.addf %827, %826 : vector<8x32xf32>
    %829 = arith.divf %827, %828 : vector<8x32xf32>
    %830 = vector.extract_strided_slice %823 {offsets = [0, 32], sizes = [8, 32], strides = [1, 1]} : vector<8x128xf32> to vector<8x32xf32>
    %831 = arith.negf %830 : vector<8x32xf32>
    %832 = math.exp %831 : vector<8x32xf32>
    %cst_259 = arith.constant 1.000000e+00 : f32
    %833 = vector.broadcast %cst_259 : f32 to vector<8x32xf32>
    %834 = arith.addf %833, %832 : vector<8x32xf32>
    %835 = arith.divf %833, %834 : vector<8x32xf32>
    %836 = vector.extract_strided_slice %823 {offsets = [0, 64], sizes = [8, 32], strides = [1, 1]} : vector<8x128xf32> to vector<8x32xf32>
    %837 = math.tanh %836 : vector<8x32xf32>
    %838 = vector.extract_strided_slice %823 {offsets = [0, 96], sizes = [8, 32], strides = [1, 1]} : vector<8x128xf32> to vector<8x32xf32>
    %839 = arith.negf %838 : vector<8x32xf32>
    %840 = math.exp %839 : vector<8x32xf32>
    %cst_260 = arith.constant 1.000000e+00 : f32
    %841 = vector.broadcast %cst_260 : f32 to vector<8x32xf32>
    %842 = arith.addf %841, %840 : vector<8x32xf32>
    %843 = arith.divf %841, %842 : vector<8x32xf32>
    %844 = arith.mulf %835, %817 : vector<8x32xf32>
    %845 = arith.mulf %829, %837 : vector<8x32xf32>
    %846 = arith.addf %844, %845 : vector<8x32xf32>
    %847 = math.tanh %846 : vector<8x32xf32>
    %848 = arith.mulf %843, %847 : vector<8x32xf32>
    %c32_261 = arith.constant 32 : index
    %c32_262 = arith.constant 32 : index
    %849 = vector.load %arg19[%c32_261, %c32_262] : memref<64x64xf32, #tpu.memory_space<vmem>>, vector<8x32xf32>
    tpu.vector_store %arg19[%c32_261, %c32_262], %848 {strides = array<i32>} : memref<64x64xf32, #tpu.memory_space<vmem>>, vector<8x32xf32>,
    %c24_263 = arith.constant 24 : index
    %c0_264 = arith.constant 0 : index
    %850 = vector.load %arg17[%c24_263, %c0_264] : memref<64x128xf32, #tpu.memory_space<vmem>>, vector<8x128xf32>
    %cst_265 = arith.constant dense<0.000000e+00> : vector<8x128xf32>
    %851 = tpu.matmul %848, %731, %cst_265 {dimension_numbers = #tpu.dot_dimension_numbers<[1], [0], [0], [1], [0, 0, 1, 1], [], []>} : vector<8x32xf32>, vector<32x128xf32>, vector<8x128xf32> -> vector<8x128xf32>
    %852 = arith.addf %850, %851 : vector<8x128xf32>
    %853 = vector.extract_strided_slice %852 {offsets = [0, 0], sizes = [8, 32], strides = [1, 1]} : vector<8x128xf32> to vector<8x32xf32>
    %854 = arith.negf %853 : vector<8x32xf32>
    %855 = math.exp %854 : vector<8x32xf32>
    %cst_266 = arith.constant 1.000000e+00 : f32
    %856 = vector.broadcast %cst_266 : f32 to vector<8x32xf32>
    %857 = arith.addf %856, %855 : vector<8x32xf32>
    %858 = arith.divf %856, %857 : vector<8x32xf32>
    %859 = vector.extract_strided_slice %852 {offsets = [0, 32], sizes = [8, 32], strides = [1, 1]} : vector<8x128xf32> to vector<8x32xf32>
    %860 = arith.negf %859 : vector<8x32xf32>
    %861 = math.exp %860 : vector<8x32xf32>
    %cst_267 = arith.constant 1.000000e+00 : f32
    %862 = vector.broadcast %cst_267 : f32 to vector<8x32xf32>
    %863 = arith.addf %862, %861 : vector<8x32xf32>
    %864 = arith.divf %862, %863 : vector<8x32xf32>
    %865 = vector.extract_strided_slice %852 {offsets = [0, 64], sizes = [8, 32], strides = [1, 1]} : vector<8x128xf32> to vector<8x32xf32>
    %866 = math.tanh %865 : vector<8x32xf32>
    %867 = vector.extract_strided_slice %852 {offsets = [0, 96], sizes = [8, 32], strides = [1, 1]} : vector<8x128xf32> to vector<8x32xf32>
    %868 = arith.negf %867 : vector<8x32xf32>
    %869 = math.exp %868 : vector<8x32xf32>
    %cst_268 = arith.constant 1.000000e+00 : f32
    %870 = vector.broadcast %cst_268 : f32 to vector<8x32xf32>
    %871 = arith.addf %870, %869 : vector<8x32xf32>
    %872 = arith.divf %870, %871 : vector<8x32xf32>
    %873 = arith.mulf %864, %846 : vector<8x32xf32>
    %874 = arith.mulf %858, %866 : vector<8x32xf32>
    %875 = arith.addf %873, %874 : vector<8x32xf32>
    %876 = math.tanh %875 : vector<8x32xf32>
    %877 = arith.mulf %872, %876 : vector<8x32xf32>
    %c24_269 = arith.constant 24 : index
    %c32_270 = arith.constant 32 : index
    %878 = vector.load %arg19[%c24_269, %c32_270] : memref<64x64xf32, #tpu.memory_space<vmem>>, vector<8x32xf32>
    tpu.vector_store %arg19[%c24_269, %c32_270], %877 {strides = array<i32>} : memref<64x64xf32, #tpu.memory_space<vmem>>, vector<8x32xf32>,
    %c16_271 = arith.constant 16 : index
    %c0_272 = arith.constant 0 : index
    %879 = vector.load %arg17[%c16_271, %c0_272] : memref<64x128xf32, #tpu.memory_space<vmem>>, vector<8x128xf32>
    %cst_273 = arith.constant dense<0.000000e+00> : vector<8x128xf32>
    %880 = tpu.matmul %877, %731, %cst_273 {dimension_numbers = #tpu.dot_dimension_numbers<[1], [0], [0], [1], [0, 0, 1, 1], [], []>} : vector<8x32xf32>, vector<32x128xf32>, vector<8x128xf32> -> vector<8x128xf32>
    %881 = arith.addf %879, %880 : vector<8x128xf32>
    %882 = vector.extract_strided_slice %881 {offsets = [0, 0], sizes = [8, 32], strides = [1, 1]} : vector<8x128xf32> to vector<8x32xf32>
    %883 = arith.negf %882 : vector<8x32xf32>
    %884 = math.exp %883 : vector<8x32xf32>
    %cst_274 = arith.constant 1.000000e+00 : f32
    %885 = vector.broadcast %cst_274 : f32 to vector<8x32xf32>
    %886 = arith.addf %885, %884 : vector<8x32xf32>
    %887 = arith.divf %885, %886 : vector<8x32xf32>
    %888 = vector.extract_strided_slice %881 {offsets = [0, 32], sizes = [8, 32], strides = [1, 1]} : vector<8x128xf32> to vector<8x32xf32>
    %889 = arith.negf %888 : vector<8x32xf32>
    %890 = math.exp %889 : vector<8x32xf32>
    %cst_275 = arith.constant 1.000000e+00 : f32
    %891 = vector.broadcast %cst_275 : f32 to vector<8x32xf32>
    %892 = arith.addf %891, %890 : vector<8x32xf32>
    %893 = arith.divf %891, %892 : vector<8x32xf32>
    %894 = vector.extract_strided_slice %881 {offsets = [0, 64], sizes = [8, 32], strides = [1, 1]} : vector<8x128xf32> to vector<8x32xf32>
    %895 = math.tanh %894 : vector<8x32xf32>
    %896 = vector.extract_strided_slice %881 {offsets = [0, 96], sizes = [8, 32], strides = [1, 1]} : vector<8x128xf32> to vector<8x32xf32>
    %897 = arith.negf %896 : vector<8x32xf32>
    %898 = math.exp %897 : vector<8x32xf32>
    %cst_276 = arith.constant 1.000000e+00 : f32
    %899 = vector.broadcast %cst_276 : f32 to vector<8x32xf32>
    %900 = arith.addf %899, %898 : vector<8x32xf32>
    %901 = arith.divf %899, %900 : vector<8x32xf32>
    %902 = arith.mulf %893, %875 : vector<8x32xf32>
    %903 = arith.mulf %887, %895 : vector<8x32xf32>
    %904 = arith.addf %902, %903 : vector<8x32xf32>
    %905 = math.tanh %904 : vector<8x32xf32>
    %906 = arith.mulf %901, %905 : vector<8x32xf32>
    %c16_277 = arith.constant 16 : index
    %c32_278 = arith.constant 32 : index
    %907 = vector.load %arg19[%c16_277, %c32_278] : memref<64x64xf32, #tpu.memory_space<vmem>>, vector<8x32xf32>
    tpu.vector_store %arg19[%c16_277, %c32_278], %906 {strides = array<i32>} : memref<64x64xf32, #tpu.memory_space<vmem>>, vector<8x32xf32>,
    %c8_279 = arith.constant 8 : index
    %c0_280 = arith.constant 0 : index
    %908 = vector.load %arg17[%c8_279, %c0_280] : memref<64x128xf32, #tpu.memory_space<vmem>>, vector<8x128xf32>
    %cst_281 = arith.constant dense<0.000000e+00> : vector<8x128xf32>
    %909 = tpu.matmul %906, %731, %cst_281 {dimension_numbers = #tpu.dot_dimension_numbers<[1], [0], [0], [1], [0, 0, 1, 1], [], []>} : vector<8x32xf32>, vector<32x128xf32>, vector<8x128xf32> -> vector<8x128xf32>
    %910 = arith.addf %908, %909 : vector<8x128xf32>
    %911 = vector.extract_strided_slice %910 {offsets = [0, 0], sizes = [8, 32], strides = [1, 1]} : vector<8x128xf32> to vector<8x32xf32>
    %912 = arith.negf %911 : vector<8x32xf32>
    %913 = math.exp %912 : vector<8x32xf32>
    %cst_282 = arith.constant 1.000000e+00 : f32
    %914 = vector.broadcast %cst_282 : f32 to vector<8x32xf32>
    %915 = arith.addf %914, %913 : vector<8x32xf32>
    %916 = arith.divf %914, %915 : vector<8x32xf32>
    %917 = vector.extract_strided_slice %910 {offsets = [0, 32], sizes = [8, 32], strides = [1, 1]} : vector<8x128xf32> to vector<8x32xf32>
    %918 = arith.negf %917 : vector<8x32xf32>
    %919 = math.exp %918 : vector<8x32xf32>
    %cst_283 = arith.constant 1.000000e+00 : f32
    %920 = vector.broadcast %cst_283 : f32 to vector<8x32xf32>
    %921 = arith.addf %920, %919 : vector<8x32xf32>
    %922 = arith.divf %920, %921 : vector<8x32xf32>
    %923 = vector.extract_strided_slice %910 {offsets = [0, 64], sizes = [8, 32], strides = [1, 1]} : vector<8x128xf32> to vector<8x32xf32>
    %924 = math.tanh %923 : vector<8x32xf32>
    %925 = vector.extract_strided_slice %910 {offsets = [0, 96], sizes = [8, 32], strides = [1, 1]} : vector<8x128xf32> to vector<8x32xf32>
    %926 = arith.negf %925 : vector<8x32xf32>
    %927 = math.exp %926 : vector<8x32xf32>
    %cst_284 = arith.constant 1.000000e+00 : f32
    %928 = vector.broadcast %cst_284 : f32 to vector<8x32xf32>
    %929 = arith.addf %928, %927 : vector<8x32xf32>
    %930 = arith.divf %928, %929 : vector<8x32xf32>
    %931 = arith.mulf %922, %904 : vector<8x32xf32>
    %932 = arith.mulf %916, %924 : vector<8x32xf32>
    %933 = arith.addf %931, %932 : vector<8x32xf32>
    %934 = math.tanh %933 : vector<8x32xf32>
    %935 = arith.mulf %930, %934 : vector<8x32xf32>
    %c8_285 = arith.constant 8 : index
    %c32_286 = arith.constant 32 : index
    %936 = vector.load %arg19[%c8_285, %c32_286] : memref<64x64xf32, #tpu.memory_space<vmem>>, vector<8x32xf32>
    tpu.vector_store %arg19[%c8_285, %c32_286], %935 {strides = array<i32>} : memref<64x64xf32, #tpu.memory_space<vmem>>, vector<8x32xf32>,
    %c0_287 = arith.constant 0 : index
    %c0_288 = arith.constant 0 : index
    %937 = vector.load %arg17[%c0_287, %c0_288] : memref<64x128xf32, #tpu.memory_space<vmem>>, vector<8x128xf32>
    %cst_289 = arith.constant dense<0.000000e+00> : vector<8x128xf32>
    %938 = tpu.matmul %935, %731, %cst_289 {dimension_numbers = #tpu.dot_dimension_numbers<[1], [0], [0], [1], [0, 0, 1, 1], [], []>} : vector<8x32xf32>, vector<32x128xf32>, vector<8x128xf32> -> vector<8x128xf32>
    %939 = arith.addf %937, %938 : vector<8x128xf32>
    %940 = vector.extract_strided_slice %939 {offsets = [0, 0], sizes = [8, 32], strides = [1, 1]} : vector<8x128xf32> to vector<8x32xf32>
    %941 = arith.negf %940 : vector<8x32xf32>
    %942 = math.exp %941 : vector<8x32xf32>
    %cst_290 = arith.constant 1.000000e+00 : f32
    %943 = vector.broadcast %cst_290 : f32 to vector<8x32xf32>
    %944 = arith.addf %943, %942 : vector<8x32xf32>
    %945 = arith.divf %943, %944 : vector<8x32xf32>
    %946 = vector.extract_strided_slice %939 {offsets = [0, 32], sizes = [8, 32], strides = [1, 1]} : vector<8x128xf32> to vector<8x32xf32>
    %947 = arith.negf %946 : vector<8x32xf32>
    %948 = math.exp %947 : vector<8x32xf32>
    %cst_291 = arith.constant 1.000000e+00 : f32
    %949 = vector.broadcast %cst_291 : f32 to vector<8x32xf32>
    %950 = arith.addf %949, %948 : vector<8x32xf32>
    %951 = arith.divf %949, %950 : vector<8x32xf32>
    %952 = vector.extract_strided_slice %939 {offsets = [0, 64], sizes = [8, 32], strides = [1, 1]} : vector<8x128xf32> to vector<8x32xf32>
    %953 = math.tanh %952 : vector<8x32xf32>
    %954 = vector.extract_strided_slice %939 {offsets = [0, 96], sizes = [8, 32], strides = [1, 1]} : vector<8x128xf32> to vector<8x32xf32>
    %955 = arith.negf %954 : vector<8x32xf32>
    %956 = math.exp %955 : vector<8x32xf32>
    %cst_292 = arith.constant 1.000000e+00 : f32
    %957 = vector.broadcast %cst_292 : f32 to vector<8x32xf32>
    %958 = arith.addf %957, %956 : vector<8x32xf32>
    %959 = arith.divf %957, %958 : vector<8x32xf32>
    %960 = arith.mulf %951, %933 : vector<8x32xf32>
    %961 = arith.mulf %945, %953 : vector<8x32xf32>
    %962 = arith.addf %960, %961 : vector<8x32xf32>
    %963 = math.tanh %962 : vector<8x32xf32>
    %964 = arith.mulf %959, %963 : vector<8x32xf32>
    %c0_293 = arith.constant 0 : index
    %c32_294 = arith.constant 32 : index
    %965 = vector.load %arg19[%c0_293, %c32_294] : memref<64x64xf32, #tpu.memory_space<vmem>>, vector<8x32xf32>
    tpu.vector_store %arg19[%c0_293, %c32_294], %964 {strides = array<i32>} : memref<64x64xf32, #tpu.memory_space<vmem>>, vector<8x32xf32>,
    %c56_295 = arith.constant 56 : index
    %c0_296 = arith.constant 0 : index
    %966 = vector.load %arg19[%c56_295, %c0_296] : memref<64x64xf32, #tpu.memory_space<vmem>>, vector<8x64xf32>
    %c0_297 = arith.constant 0 : index
    %c0_298 = arith.constant 0 : index
    %967 = vector.load %arg19[%c0_297, %c0_298] : memref<64x64xf32, #tpu.memory_space<vmem>>, vector<8x64xf32>
    %c8_299 = arith.constant 8 : index
    %c0_300 = arith.constant 0 : index
    %968 = vector.load %arg19[%c8_299, %c0_300] : memref<64x64xf32, #tpu.memory_space<vmem>>, vector<8x64xf32>
    %969 = arith.maximumf %967, %968 : vector<8x64xf32>
    %970 = arith.addf %967, %968 : vector<8x64xf32>
    %c16_301 = arith.constant 16 : index
    %c0_302 = arith.constant 0 : index
    %971 = vector.load %arg19[%c16_301, %c0_302] : memref<64x64xf32, #tpu.memory_space<vmem>>, vector<8x64xf32>
    %972 = arith.maximumf %969, %971 : vector<8x64xf32>
    %973 = arith.addf %970, %971 : vector<8x64xf32>
    %c24_303 = arith.constant 24 : index
    %c0_304 = arith.constant 0 : index
    %974 = vector.load %arg19[%c24_303, %c0_304] : memref<64x64xf32, #tpu.memory_space<vmem>>, vector<8x64xf32>
    %975 = arith.maximumf %972, %974 : vector<8x64xf32>
    %976 = arith.addf %973, %974 : vector<8x64xf32>
    %c32_305 = arith.constant 32 : index
    %c0_306 = arith.constant 0 : index
    %977 = vector.load %arg19[%c32_305, %c0_306] : memref<64x64xf32, #tpu.memory_space<vmem>>, vector<8x64xf32>
    %978 = arith.maximumf %975, %977 : vector<8x64xf32>
    %979 = arith.addf %976, %977 : vector<8x64xf32>
    %c40_307 = arith.constant 40 : index
    %c0_308 = arith.constant 0 : index
    %980 = vector.load %arg19[%c40_307, %c0_308] : memref<64x64xf32, #tpu.memory_space<vmem>>, vector<8x64xf32>
    %981 = arith.maximumf %978, %980 : vector<8x64xf32>
    %982 = arith.addf %979, %980 : vector<8x64xf32>
    %c48_309 = arith.constant 48 : index
    %c0_310 = arith.constant 0 : index
    %983 = vector.load %arg19[%c48_309, %c0_310] : memref<64x64xf32, #tpu.memory_space<vmem>>, vector<8x64xf32>
    %984 = arith.maximumf %981, %983 : vector<8x64xf32>
    %985 = arith.addf %982, %983 : vector<8x64xf32>
    %c56_311 = arith.constant 56 : index
    %c0_312 = arith.constant 0 : index
    %986 = vector.load %arg19[%c56_311, %c0_312] : memref<64x64xf32, #tpu.memory_space<vmem>>, vector<8x64xf32>
    %987 = arith.maximumf %984, %986 : vector<8x64xf32>
    %988 = arith.addf %985, %986 : vector<8x64xf32>
    %cst_313 = arith.constant 1.250000e-01 : f32
    %989 = vector.broadcast %cst_313 : f32 to vector<8x64xf32>
    %990 = arith.mulf %988, %989 : vector<8x64xf32>
    %c0_314 = arith.constant 0 : index
    %c0_315 = arith.constant 0 : index
    %991 = vector.load %arg14[%c0_314, %c0_315] : memref<3x64xf32, #tpu.memory_space<vmem>>, vector<3x64xf32>
    %992 = vector.extract_strided_slice %991 {offsets = [0, 0], sizes = [1, 64], strides = [1, 1]} : vector<3x64xf32> to vector<1x64xf32>
    %993 = vector.broadcast %992 : vector<1x64xf32> to vector<8x64xf32>
    %994 = arith.mulf %987, %993 : vector<8x64xf32>
    %cst_316 = arith.constant dense<0.000000e+00> : vector<8xf32>
    %995 = vector.multi_reduction <add>, %994, %cst_316 [1] : vector<8x64xf32> to vector<8xf32>
    %996 = vector.shape_cast %995 : vector<8xf32> to vector<8x1xf32>
    %997 = vector.extract_strided_slice %991 {offsets = [1, 0], sizes = [1, 64], strides = [1, 1]} : vector<3x64xf32> to vector<1x64xf32>
    %998 = vector.broadcast %997 : vector<1x64xf32> to vector<8x64xf32>
    %999 = arith.mulf %990, %998 : vector<8x64xf32>
    %cst_317 = arith.constant dense<0.000000e+00> : vector<8xf32>
    %1000 = vector.multi_reduction <add>, %999, %cst_317 [1] : vector<8x64xf32> to vector<8xf32>
    %1001 = vector.shape_cast %1000 : vector<8xf32> to vector<8x1xf32>
    %1002 = arith.addf %996, %1001 : vector<8x1xf32>
    %1003 = vector.extract_strided_slice %991 {offsets = [2, 0], sizes = [1, 64], strides = [1, 1]} : vector<3x64xf32> to vector<1x64xf32>
    %1004 = vector.broadcast %1003 : vector<1x64xf32> to vector<8x64xf32>
    %1005 = arith.mulf %966, %1004 : vector<8x64xf32>
    %cst_318 = arith.constant dense<0.000000e+00> : vector<8xf32>
    %1006 = vector.multi_reduction <add>, %1005, %cst_318 [1] : vector<8x64xf32> to vector<8xf32>
    %1007 = vector.shape_cast %1006 : vector<8xf32> to vector<8x1xf32>
    %1008 = arith.addf %1002, %1007 : vector<8x1xf32>
    %c0_319 = arith.constant 0 : index
    %c0_320 = arith.constant 0 : index
    %1009 = vector.load %arg15[%c0_319, %c0_320] : memref<1x1xf32, #tpu.memory_space<vmem>>, vector<1x1xf32>
    %1010 = vector.broadcast %1009 : vector<1x1xf32> to vector<8x1xf32>
    %1011 = arith.addf %1008, %1010 : vector<8x1xf32>
    %c0_321 = arith.constant 0 : index
    %c0_322 = arith.constant 0 : index
    %1012 = vector.load %arg16[%c0_321, %c0_322] : memref<8x1xf32, #tpu.memory_space<vmem>>, vector<8x1xf32>
    tpu.vector_store %arg16[%c0_321, %c0_322], %1011 {strides = array<i32>} : memref<8x1xf32, #tpu.memory_space<vmem>>, vector<8x1xf32>,
    return
  }
  func.func @transform_0(%arg0: i32) -> (i32, i32) {
    %c0_i32 = arith.constant 0 : i32
    %c0_i32_0 = arith.constant 0 : i32
    %c0_i32_1 = arith.constant 0 : i32
    return %c0_i32, %c0_i32_0 : i32, i32
  }
  func.func @transform_1(%arg0: i32) -> (i32, i32) {
    %c0_i32 = arith.constant 0 : i32
    %c0_i32_0 = arith.constant 0 : i32
    %c0_i32_1 = arith.constant 0 : i32
    return %c0_i32, %c0_i32_0 : i32, i32
  }
  func.func @transform_2(%arg0: i32) -> (i32, i32) {
    %c0_i32 = arith.constant 0 : i32
    %c0_i32_0 = arith.constant 0 : i32
    %c0_i32_1 = arith.constant 0 : i32
    return %c0_i32, %c0_i32_0 : i32, i32
  }
  func.func @transform_3(%arg0: i32) -> (i32, i32) {
    %c0_i32 = arith.constant 0 : i32
    %c0_i32_0 = arith.constant 0 : i32
    %c0_i32_1 = arith.constant 0 : i32
    return %c0_i32, %c0_i32_0 : i32, i32
  }
  func.func @transform_4(%arg0: i32) -> (i32, i32) {
    %c0_i32 = arith.constant 0 : i32
    %c0_i32_0 = arith.constant 0 : i32
    %c0_i32_1 = arith.constant 0 : i32
    return %c0_i32, %c0_i32_0 : i32, i32
  }
  func.func @transform_5(%arg0: i32) -> (i32, i32) {
    %c0_i32 = arith.constant 0 : i32
    %c0_i32_0 = arith.constant 0 : i32
    %c0_i32_1 = arith.constant 0 : i32
    return %c0_i32, %c0_i32_0 : i32, i32
  }
  func.func @transform_6(%arg0: i32) -> (i32, i32) {
    %c0_i32 = arith.constant 0 : i32
    %c0_i32_0 = arith.constant 0 : i32
    %c0_i32_1 = arith.constant 0 : i32
    return %c0_i32, %c0_i32_0 : i32, i32
  }
  func.func @transform_7(%arg0: i32) -> (i32, i32) {
    %c0_i32 = arith.constant 0 : i32
    %c0_i32_0 = arith.constant 0 : i32
    %c0_i32_1 = arith.constant 0 : i32
    return %c0_i32, %c0_i32_0 : i32, i32
  }
  func.func @transform_8(%arg0: i32) -> (i32, i32) {
    %c0_i32 = arith.constant 0 : i32
    %c0_i32_0 = arith.constant 0 : i32
    %c0_i32_1 = arith.constant 0 : i32
    return %c0_i32, %c0_i32_0 : i32, i32
  }
  func.func @transform_9(%arg0: i32) -> (i32, i32) {
    %c0_i32 = arith.constant 0 : i32
    %c0_i32_0 = arith.constant 0 : i32
    %c0_i32_1 = arith.constant 0 : i32
    return %c0_i32, %c0_i32_0 : i32, i32
  }
  func.func @transform_10(%arg0: i32) -> (i32, i32) {
    %c0_i32 = arith.constant 0 : i32
    %c0_i32_0 = arith.constant 0 : i32
    %c0_i32_1 = arith.constant 0 : i32
    return %c0_i32, %c0_i32_0 : i32, i32
  }
  func.func @transform_11(%arg0: i32) -> (i32, i32) {
    %c0_i32 = arith.constant 0 : i32
    %c0_i32_0 = arith.constant 0 : i32
    %c0_i32_1 = arith.constant 0 : i32
    return %c0_i32, %c0_i32_0 : i32, i32
  }
  func.func @transform_12(%arg0: i32) -> (i32, i32) {
    %c0_i32 = arith.constant 0 : i32
    %c0_i32_0 = arith.constant 0 : i32
    %c0_i32_1 = arith.constant 0 : i32
    return %c0_i32, %c0_i32_0 : i32, i32
  }
  func.func @transform_13(%arg0: i32) -> (i32, i32) {
    %c0_i32 = arith.constant 0 : i32
    %c0_i32_0 = arith.constant 0 : i32
    %c0_i32_1 = arith.constant 0 : i32
    return %c0_i32, %c0_i32_0 : i32, i32
  }
  func.func @transform_14(%arg0: i32) -> (i32, i32) {
    %c0_i32 = arith.constant 0 : i32
    %c0_i32_0 = arith.constant 0 : i32
    %c0_i32_1 = arith.constant 0 : i32
    return %c0_i32, %c0_i32_0 : i32, i32
  }
  func.func @transform_15(%arg0: i32) -> (i32, i32) {
    %c0_i32 = arith.constant 0 : i32
    %c0_i32_0 = arith.constant 0 : i32
    %c0_i32_1 = arith.constant 0 : i32
    return %c0_i32, %c0_i32_0 : i32, i32
  }
}

</mosaic_0001>

<bundles_post_ra>
// kernel: tpu_custom_call.1
= control target key start
LH: loop header
LB: loop body
LE: loop exit
PB: predicated region body
PF: predicated region fallthrough
CT: control target
= control target key end

     0   :  { %s6585_s0 = inlined_call_operand.vmem [shape: f32[64,32], index: 0, kind: input, shape index: {}]   ;;  %s6586_s1 = inlined_call_operand.hbm [shape: f32[32,128], index: 1, kind: input, shape index: {}]   ;;  %s6587_s2 = inlined_call_operand.hbm [shape: f32[32,128], index: 2, kind: input, shape index: {}]   ;;  %s6588_s3 = inlined_call_operand.vmem [shape: f32[1,128], index: 3, kind: input, shape index: {}]   ;;  %s6589_s4 = inlined_call_operand.hbm [shape: f32[32,128], index: 4, kind: input, shape index: {}]   ;;  %s6590_s5 = inlined_call_operand.hbm [shape: f32[32,128], index: 5, kind: input, shape index: {}]   ;;  %s6591_s6 = inlined_call_operand.hbm [shape: f32[1,128], index: 6, kind: input, shape index: {}]   ;;  %s6592_s7 = inlined_call_operand.vmem [shape: f32[64,128], index: 7, kind: input, shape index: {}]   ;;  %s6593_s8 = inlined_call_operand.hbm [shape: f32[32,128], index: 8, kind: input, shape index: {}]   ;;  %s6594_s9 = inlined_call_operand.hbm [shape: f32[1,128], index: 9, kind: input, shape index: {}]   ;;  %s6595_s10 = inlined_call_operand.vmem [shape: f32[64,128], index: 10, kind: input, shape index: {}]   ;;  %s6596_s11 = inlined_call_operand.hbm [shape: f32[32,128], index: 11, kind: input, shape index: {}]   ;;  %s6597_s12 = inlined_call_operand.vmem [shape: f32[1,128], index: 12, kind: input, shape index: {}]   ;;  %s6598_s13 = inlined_call_operand.vmem [shape: f32[3,64], index: 13, kind: input, shape index: {}]   ;;  %s6599_s14 = inlined_call_operand.<no memory space> [shape: f32[1,1], index: 14, kind: input, shape index: {}]   ;;  %s6600_s15 = inlined_call_operand.vmem [shape: f32[8,1], index: 15, kind: output, shape index: {}]  }
   0x1   :  { %v20_v0 = vstv %s6599_s14 }
   0x2   :  { %21 = vst [vmem:[#allocation5] sm:$0x1] %v20_v0 }
   0x3   :  { %22 = vsyncpa [#allocation7], 0 }
   0x4   :  { %23 = vsyncpa [#allocation9], 0 }
   0x5   :  { %24 = vsyncpa [#allocation12], 0 }
   0x6   :  { %25 = vsyncpa [#allocation15], 0 }
   0x7   :  { %26 = vsyncpa [#allocation18], 0  ;;  %s5590_s20 = smov [#allocation8]   ;;  %s5591_s22 = smov [#allocation11]  }
   0x8   :  { %s46_s21 = sshll.u32 %s5590_s20, 4  ;;  %s72_s23 = sshll.u32 %s5591_s22, 4  ;;  %s47_s21 = int_to_ptr.vmem [resolvable:$true] %s46_s21  ;;  %s5688_s23 = int_to_ptr.vmem [resolvable:$true] %s72_s23 }
   0x9   :  { %s5404_s26 = scalar_lea.hbm %s6587_s2, 512 }
   0xa   :  { %p5405_p0 = scmp.ne.s32.totalorder %s6587_s2, %s5404_s26  ;;  %p5408_p1 = scmp.lt.u32.totalorder %s5404_s26, %s6587_s2 }
   0xc   :  { %p5410_p2 = pnand %p5408_p1, %p5405_p0 }
   0xe   :  { %5413 = shalt.err (!%p5410_p2)
}
   0xf   :  { %s5414_s30 = scalar_lea.vmem %s47_s21, 512  ;;  %p5419_p4 = scmp.lt.s32.totalorder %s47_s21, %s47_s21 }
  0x10   :  { %p5415_p3 = scmp.ne.s32.totalorder %s47_s21, %s5414_s30  ;;  %p5420_p5 = scmp.lt.s32.totalorder %s5414_s30, %s5414_s30 }
  0x12   :  { %p5421_p6 = por %p5420_p5, %p5419_p4 }
  0x14   :  { %p5422_p7 = pnand %p5421_p6, %p5415_p3 }
  0x16   :  { %5425 = shalt.err (!%p5422_p7)
}
  0x17   :  { %s5592_s16 = smov 128   ;;  %s5593_s17 = smov 8  }
  0x18   :  { %52 = dma.hbm_to_vmem [thread:$0]  %s6587_s2, 512, %s47_s21, [#allocation9], %s5592_s16, %s5592_s16, %s5593_s17  }
  0x19   :  { %s5426_s24 = scalar_lea.hbm %s6590_s5, 512 }
  0x1a   :  { %p5427_p8 = scmp.ne.s32.totalorder %s6590_s5, %s5426_s24  ;;  %p5430_p9 = scmp.lt.u32.totalorder %s5426_s24, %s6590_s5 }
  0x1c   :  { %p5432_p10 = pnand %p5430_p9, %p5427_p8 }
  0x1e   :  { %5435 = shalt.err (!%p5432_p10)
}
  0x1f   :  { %s5436_s14 = scalar_lea.vmem %s5688_s23, 512  ;;  %p5441_p12 = scmp.lt.s32.totalorder %s5688_s23, %s5688_s23 }
  0x20   :  { %p5437_p11 = scmp.ne.s32.totalorder %s5688_s23, %s5436_s14  ;;  %p5442_p13 = scmp.lt.s32.totalorder %s5436_s14, %s5436_s14 }
  0x22   :  { %p5443_p0 = por %p5442_p13, %p5441_p12 }
  0x24   :  { %p5444_p1 = pnand %p5443_p0, %p5437_p11 }
  0x26   :  { %5447 = shalt.err (!%p5444_p1)
}
  0x27   :  { %78 = dma.hbm_to_vmem [thread:$0]  %s6590_s5, 512, %s5688_s23, [#allocation12], %s5592_s16, %s5592_s16, %s5593_s17  }
  0x28   :  { %s5594_s29 = smov [#allocation14]   ;;  %s5595_s18 = smov [#allocation6]  }
  0x29   :  { %s96_s30 = sshll.u32 %s5594_s29, 4  ;;  %s34_s19 = sshll.u32 %s5595_s18, 4  ;;  %s97_s30 = int_to_ptr.vmem [resolvable:$true] %s96_s30  ;;  %s5725_s19 = int_to_ptr.vmem [resolvable:$true] %s34_s19 }
  0x2a   :  { %s5448_s24 = scalar_lea.hbm %s6593_s8, 512 }
  0x2b   :  { %p5449_p2 = scmp.ne.s32.totalorder %s6593_s8, %s5448_s24  ;;  %p5452_p3 = scmp.lt.u32.totalorder %s5448_s24, %s6593_s8 }
  0x2d   :  { %p5454_p4 = pnand %p5452_p3, %p5449_p2 }
  0x2f   :  { %5457 = shalt.err (!%p5454_p4)
}
  0x30   :  { %s5458_s5 = scalar_lea.vmem %s97_s30, 512  ;;  %p5463_p6 = scmp.lt.s32.totalorder %s97_s30, %s97_s30 }
  0x31   :  { %p5459_p5 = scmp.ne.s32.totalorder %s97_s30, %s5458_s5  ;;  %p5464_p7 = scmp.lt.s32.totalorder %s5458_s5, %s5458_s5 }
  0x33   :  { %p5465_p8 = por %p5464_p7, %p5463_p6 }
  0x35   :  { %p5466_p9 = pnand %p5465_p8, %p5459_p5 }
  0x37   :  { %5469 = shalt.err (!%p5466_p9)
}
  0x38   :  { %102 = dma.hbm_to_vmem [thread:$0]  %s6593_s8, 512, %s97_s30, [#allocation15], %s5592_s16, %s5592_s16, %s5593_s17  }
  0x39   :  { %s5470_s29 = scalar_lea.hbm %s6586_s1, 512 }
  0x3a   :  { %p5471_p10 = scmp.ne.s32.totalorder %s6586_s1, %s5470_s29  ;;  %p5474_p11 = scmp.lt.u32.totalorder %s5470_s29, %s6586_s1 }
  0x3c   :  { %p5476_p12 = pnand %p5474_p11, %p5471_p10 }
  0x3e   :  { %5479 = shalt.err (!%p5476_p12)
}
  0x3f   :  { %s5480_s25 = scalar_lea.vmem %s5725_s19, 512  ;;  %p5485_p0 = scmp.lt.s32.totalorder %s5725_s19, %s5725_s19 }
  0x40   :  { %p5481_p13 = scmp.ne.s32.totalorder %s5725_s19, %s5480_s25  ;;  %p5486_p1 = scmp.lt.s32.totalorder %s5480_s25, %s5480_s25 }
  0x42   :  { %p5487_p2 = por %p5486_p1, %p5485_p0 }
  0x44   :  { %p5488_p3 = pnand %p5487_p2, %p5481_p13 }
  0x46   :  { %5491 = shalt.err (!%p5488_p3)
}
  0x47   :  { %40 = dma.hbm_to_vmem [thread:$0]  %s6586_s1, 512, %s5725_s19, [#allocation7], %s5592_s16, %s5592_s16, %s5593_s17  }
  0x48   :  { %s5596_s26 = smov [#allocation10]   ;;  %s5597_s28 = smov [#allocation13]  }
  0x49   :  { %s60_s27 = sshll.u32 %s5596_s26, 4  ;;  %s85_s5 = sshll.u32 %s5597_s28, 4  ;;  %s61_s27 = int_to_ptr.vmem [resolvable:$true] %s60_s27  ;;  %s86_s5 = int_to_ptr.vmem [resolvable:$true] %s85_s5 }
  0x4a   :  { %s5492_s2 = scalar_lea.hbm %s6589_s4, 512 }
  0x4b   :  { %p5493_p4 = scmp.ne.s32.totalorder %s6589_s4, %s5492_s2  ;;  %p5496_p5 = scmp.lt.u32.totalorder %s5492_s2, %s6589_s4 }
  0x4d   :  { %p5498_p6 = pnand %p5496_p5, %p5493_p4 }
  0x4f   :  { %5501 = shalt.err (!%p5498_p6)
}
  0x50   :  { %s5502_s1 = scalar_lea.vmem %s61_s27, 512  ;;  %p5507_p8 = scmp.lt.s32.totalorder %s61_s27, %s61_s27 }
  0x51   :  { %p5503_p7 = scmp.ne.s32.totalorder %s61_s27, %s5502_s1  ;;  %p5508_p9 = scmp.lt.s32.totalorder %s5502_s1, %s5502_s1 }
  0x53   :  { %p5509_p10 = por %p5508_p9, %p5507_p8 }
  0x55   :  { %p5510_p11 = pnand %p5509_p10, %p5503_p7 }
  0x57   :  { %5513 = shalt.err (!%p5510_p11)
}
  0x58   :  { %66 = dma.hbm_to_vmem [thread:$0]  %s6589_s4, 512, %s61_s27, [#allocation9], %s5592_s16, %s5592_s16, %s5593_s17  }
  0x59   :  { %s5514_s8 = scalar_lea.hbm %s6591_s6, 16 }
  0x5a   :  { %p5515_p12 = scmp.ne.s32.totalorder %s6591_s6, %s5514_s8  ;;  %p5518_p13 = scmp.lt.u32.totalorder %s5514_s8, %s6591_s6 }
  0x5c   :  { %p5520_p0 = pnand %p5518_p13, %p5515_p12 }
  0x5e   :  { %5523 = shalt.err (!%p5520_p0)
}
  0x5f   :  { %s5524_s14 = scalar_lea.vmem %s86_s5, 16  ;;  %s5528_s2 = scalar_lea.vmem %s86_s5, 32 }
  0x60   :  { %p5525_p1 = scmp.ne.s32.totalorder %s86_s5, %s5524_s14  ;;  %p5529_p2 = scmp.lt.s32.totalorder %s86_s5, %s86_s5 }
  0x61   :  { %p5530_p3 = scmp.lt.s32.totalorder %s5528_s2, %s5524_s14 }
  0x63   :  { %p5531_p4 = por %p5530_p3, %p5529_p2 }
  0x65   :  { %p5532_p5 = pnand %p5531_p4, %p5525_p1 }
  0x67   :  { %5535 = shalt.err (!%p5532_p5)
}
  0x68   :  { %88 = dma.hbm_to_vmem [thread:$0]  %s6591_s6, 16, %s86_s5, [#allocation12]  }
  0x69   :  { %s5598_s21 = smov [#allocation16]   ;;  %s5599_s18 = smov [#allocation17]  }
  0x6a   :  { %s109_s29 = sshll.u32 %s5598_s21, 4  ;;  %s120_s20 = sshll.u32 %s5599_s18, 4  ;;  %s110_s29 = int_to_ptr.vmem [resolvable:$true] %s109_s29  ;;  %s5789_s20 = int_to_ptr.vmem [resolvable:$true] %s120_s20 }
  0x6b   :  { %s5536_s22 = scalar_lea.hbm %s6594_s9, 16 }
  0x6c   :  { %p5537_p6 = scmp.ne.s32.totalorder %s6594_s9, %s5536_s22  ;;  %p5540_p7 = scmp.lt.u32.totalorder %s5536_s22, %s6594_s9 }
  0x6e   :  { %p5542_p8 = pnand %p5540_p7, %p5537_p6 }
  0x70   :  { %5545 = shalt.err (!%p5542_p8)
}
  0x71   :  { %s5546_s6 = scalar_lea.vmem %s110_s29, 16  ;;  %s5550_s5 = scalar_lea.vmem %s110_s29, 32 }
  0x72   :  { %p5547_p9 = scmp.ne.s32.totalorder %s110_s29, %s5546_s6  ;;  %p5551_p10 = scmp.lt.s32.totalorder %s110_s29, %s110_s29 }
  0x73   :  { %p5552_p11 = scmp.lt.s32.totalorder %s5550_s5, %s5546_s6 }
  0x75   :  { %p5553_p12 = por %p5552_p11, %p5551_p10 }
  0x77   :  { %p5554_p13 = pnand %p5553_p12, %p5547_p9 }
  0x79   :  { %5557 = shalt.err (!%p5554_p13)
}
  0x7a   :  { %112 = dma.hbm_to_vmem [thread:$0]  %s6594_s9, 16, %s110_s29, [#allocation15]  }
  0x7b   :  { %s5558_s2 = scalar_lea.hbm %s6596_s11, 512 }
  0x7c   :  { %p5559_p0 = scmp.ne.s32.totalorder %s6596_s11, %s5558_s2  ;;  %p5562_p1 = scmp.lt.u32.totalorder %s5558_s2, %s6596_s11 }
  0x7e   :  { %p5564_p2 = pnand %p5562_p1, %p5559_p0 }
  0x80   :  { %5567 = shalt.err (!%p5564_p2)
}
  0x81   :  { %s5568_s1 = scalar_lea.vmem %s5789_s20, 512  ;;  %p5573_p4 = scmp.lt.s32.totalorder %s5789_s20, %s5789_s20 }
  0x82   :  { %p5569_p3 = scmp.ne.s32.totalorder %s5789_s20, %s5568_s1  ;;  %p5574_p5 = scmp.lt.s32.totalorder %s5568_s1, %s5568_s1 }
  0x84   :  { %p5575_p6 = por %p5574_p5, %p5573_p4 }
  0x86   :  { %p5576_p7 = pnand %p5575_p6, %p5569_p3 }
  0x88   :  { %5579 = shalt.err (!%p5576_p7)
}
  0x89   :  { %126 = dma.hbm_to_vmem [thread:$0]  %s6596_s11, 512, %s5789_s20, [#allocation18], %s5592_s16, %s5592_s16, %s5593_s17  }
  0x8a   :  { %5580 = dma.done.wait [#allocation7], 512  }
  0x8b   :  { %5581 = vsyncadd [#allocation7], 4294966784 }
  0x8c   :  { %5582 = dma.done.wait [#allocation9], 1024  }
  0x8d   :  { %5583 = vsyncadd [#allocation9], 4294966272 }
  0x8e   :  { %5584 = dma.done.wait [#allocation12], 528  }
  0x8f   :  { %5585 = vsyncadd [#allocation12], 4294966768 }
  0x90   :  { %5586 = dma.done.wait [#allocation15], 528  }
  0x91   :  { %5587 = vsyncadd [#allocation15], 4294966768 }
  0x92   :  { %5588 = dma.done.wait [#allocation18], 512  }
  0x93   :  { %5589 = vsyncadd [#allocation18], 4294966784  ;;  %v5600_v1 = vmov 0.0|0.0   ;;  %vm5601_vm0 = vmmov 0   ;;  %v5602_v2 = vmov 0.0   ;;  %v165_v3 = vld [vmem:[#allocation6] sm:$0xff] }
  0x94   :  { %4901 = vmatprep.subr.bf16.mxu1 %v5600_v1  ;;  %4473 = vmatprep.mubr.msk.f32.mxu1 %vm5601_vm0, %v5602_v2  ;;  %v166_v4 = vld [vmem:[#allocation6 + $0x8] sm:$0xff]  ;;  %v314_v5 = vld [vmem:[#allocation8] sm:$0xff]  ;;  %vm176_vm1 = vcmask 261120   ;;  %v167_v8 = vld [vmem:[#allocation6 + $0x10] sm:$0xff]  ;;  %s5603_s24 = smov 64   ;;  %vm1371_vm2 = vcmask 523520  }
  0x95   :  { %v4893_v6 = vpack.c.bf16 %v166_v4, %v165_v3  ;;  %v315_v7 = vld [vmem:[#allocation8 + $0x8] sm:$0xff]  ;;  %v168_v9 = vld [vmem:[#allocation6 + $0x18] sm:$0xff]  ;;  %v316_v13 = vld [vmem:[#allocation8 + $0x10] sm:$0xff]  ;;  %vm2131_vm3 = vcmask 523264   ;;  %vm4121_vm4 = vcmask 7168  }
  0x96   :  { %v5826_v10 = vpack.c.bf16 %v315_v7, %v314_v5  ;;  %v4897_v11 = vpack.c.bf16 %v168_v9, %v167_v8  ;;  %v5831_v12 = vld [vmem:[%s6585_s0] sm:$0xff]  ;;  %v5843_v16 = vld [vmem:[%s6585_s0 + $0x8] sm:$0xff]  ;;  %v5884_v52 = vld [vmem:[%s6585_s0 + $0x10] sm:$0xff] }
  0x97   :  { %v317_v14 = vld [vmem:[#allocation8 + $0x18] sm:$0xff]  ;;  %4894 = vmatprep.subr.bf16.mxu0 %v4893_v6  ;;  %4453 = vmatprep.mubr.msk.f32.mxu0 %vm176_vm1, %v5831_v12  ;;  %v5905_v55 = vld [vmem:[%s6585_s0 + $0x28] sm:$0xff]  ;;  %v5910_v56 = vld [vmem:[%s6585_s0 + $0x30] sm:$0xff] }
  0x98   :  { %4896 = vmatpush3.bf16.msra.mxu0 %v4893_v6  ;;  %4903 = vmatpush3.bf16.msra.mxu1 %v5826_v10  ;;  %v5836_v15 = vpack.c.bf16 %v317_v14, %v316_v13  ;;  %v5863_v17 = vld [vmem:[%s6588_s3] ss:$0 sm:$0xff]  ;;  %s5604_s3 = smov 32   ;;  %v5889_v53 = vld [vmem:[%s6585_s0 + $0x18] sm:$0xff] }
  0x99   :  { %4898 = vmatprep.subr.bf16.mxu0 %v4897_v11  ;;  %4904 = vmatprep.subr.bf16.mxu1 %v5600_v1  ;;  %v5894_v54 = vld [vmem:[%s6585_s0 + $0x20] sm:$0xff]  ;;  %v5919_v57 = vld [vmem:[%s6585_s0 + $0x38] sm:$0xff] }
  0x9c   :  { %4900 = vmatpush3.bf16.msra.mxu0 %v4897_v11  ;;  %4906 = vmatpush3.bf16.msra.mxu1 %v5836_v15 }
  0x9d   :  { %4907 = vmatprep.subr.bf16.mxu1 %v5600_v1  ;;  %4913 = vmatprep.subr.bf16.mxu0 %v5600_v1 }
  0x9f   :  { %4454 = vmatmul.mubr.msk.f32.vlgmr.msra.gmra.mrb[0].mxu0 %vm176_vm1, %v5843_v16  ;;  %4474 = vmatmul.mubr.f32.vlgmr.msra.gmra.mrb[0].mxu1 %v5602_v2 }
  0xa0   :  { %4909 = vmatpush3.bf16.msra.mxu1 %v5826_v10  ;;  %4484 = vmatprep.mubr.msk.f32.mxu1 %vm5601_vm0, %v5602_v2 }
  0xa1   :  { %4910 = vmatprep.subr.bf16.mxu1 %v5600_v1  ;;  %4915 = vmatpush3.bf16.msra.mxu0 %v5826_v10 }
  0xa2   :  { %4916 = vmatprep.subr.bf16.mxu0 %v5600_v1  ;;  %4456 = vmatprep.mubr.msk.f32.mxu0 %vm176_vm1, %v5884_v52 }
  0xa3   :  { %4457 = vmatmul.mubr.msk.f32.gmra.mrb[2].mxu0 %vm176_vm1, %v5889_v53 }
  0xa4   :  { %4912 = vmatpush3.bf16.msra.mxu1 %v5836_v15  ;;  %4459 = vmatprep.mubr.msk.f32.mxu0 %vm176_vm1, %v5894_v54 }
  0xa5   :  { %4918 = vmatpush3.bf16.msra.mxu0 %v5836_v15  ;;  %4919 = vmatprep.subr.bf16.mxu1 %v5600_v1 }
  0xa6   :  { %4925 = vmatprep.subr.bf16.mxu0 %v5600_v1 }
  0xa7   :  { %4460 = vmatmul.mubr.msk.f32.gmra.mrb[4].mxu0 %vm176_vm1, %v5905_v55 }
  0xa8   :  { %4462 = vmatprep.mubr.msk.f32.mxu0 %vm176_vm1, %v5910_v56 }
  0xab   :  { %4463 = vmatmul.mubr.msk.f32.gmra.mrb[6].mxu0 %vm176_vm1, %v5919_v57 }
  0xac   :  { %4495 = vmatprep.mubr.msk.f32.mxu0 %vm5601_vm0, %v5602_v2 }
 0x172   :  { %v4455_v18 = vpop.f32.mrb[0].mxu0  ;;  %v388_v19 = vpop.f32.mrb[0].mxu1 }
 0x173   :  { %v267_v20 = vpop.f32.mrb[1].mxu0  ;;  %v4475_v21 = vpop.f32.mrb[1].mxu1  ;;  %v273_v38 = vadd.f32 %v4455_v18, %v5863_v17 }
 0x174   :  { %v268_v22 = vadd.f32 %v5863_v17, %v267_v20 }
 0x176   :  { %v392_v23 = vadd.f32 %v388_v19, %v268_v22  ;;  %v4458_v61 = vpop.f32.mrb[2].mxu0 }
 0x177   :  { %v277_v62 = vpop.f32.mrb[3].mxu0 }
 0x178   :  { %5148 = vtanh.f32 %v392_v23  ;;  %v4141_v25 = vmul.f32 -1.442695, %v392_v23  ;;  %v278_v6 = vadd.f32 %v5863_v17, %v277_v62 }
 0x17a   :  { %5150 = vpow2.f32 %v4141_v25  ;;  %v5927_v63 = vpop.f32.mrb[4].mxu0 }
 0x17b   :  { %v5929_v0 = vpop.f32.mrb[5].mxu0 }
 0x17e   :  { %v5931_v3 = vpop.f32.mrb[6].mxu0 }
 0x17f   :  { %v5933_v4 = vpop.f32.mrb[7].mxu0 }
 0x182   :  { %v5149_v24 = vpop.eup %5148 }
 0x183   :  { %402 = vrot.lane.b32.xlu0 %v5149_v24, %s5603_s24 }
 0x184   :  { %v5151_v26 = vpop.eup %5150 }
 0x185   :  { %v396_v27 = vadd.f32 1.0, %v5151_v26 }
 0x187   :  { %5152 = vrcp.f32 %v396_v27 }
 0x191   :  { %v5153_v28 = vpop.eup %5152 }
 0x192   :  { %v400_v31 = vmul.f32 0.0, %v5153_v28 }
 0x1f5   :  { %v403_v29 = vpop.permute.xlu0 %402 }
 0x1f6   :  { %v405_v30 = vmul.f32 %v5153_v28, %v403_v29  ;;  %v283_v29 = vadd.f32 %v4458_v61, %v5863_v17 }
 0x1f8   :  { %407 = vrot.lane.b32.xlu0 %v405_v30, %s5604_s3 }
 0x26a   :  { %v408_v32 = vpop.permute.xlu0 %407 }
 0x26b   :  { %v410_v33 = vadd.f32 %v408_v32, %v400_v31 }
 0x26d   :  { %5154 = vtanh.f32 %v410_v33 }
 0x277   :  { %v5155_v34 = vpop.eup %5154 }
 0x278   :  { %413 = vrot.lane.b32.xlu1 %v5155_v34, %s5603_s24 }
 0x2ea   :  { %v414_v35 = vpop.permute.xlu1 %413 }
 0x2eb   :  { %v416_v36 = vmul.f32 %v5153_v28, %v414_v35 }
 0x2ed   :  { %418 = vrot.lane.b32.xlu1 %v416_v36, %s5604_s3 }
 0x35f   :  { %v419_v37 = vpop.permute.xlu1 %418 }
 0x360   :  { %421 = vst.msk [vmem:[#allocation3] sm:$0xff] %vm176_vm1, %v419_v37  ;;  %4485 = vmatmul.mubr.msk.f32.vlgmr.msra.gmra.mrb[2].mxu1 %vm176_vm1, %v419_v37 }
 0x361   :  { %4921 = vmatpush3.bf16.msra.mxu1 %v5826_v10  ;;  %4506 = vmatprep.mubr.msk.f32.mxu1 %vm5601_vm0, %v5602_v2 }
 0x362   :  { %4922 = vmatprep.subr.bf16.mxu1 %v5600_v1 }
 0x365   :  { %4924 = vmatpush3.bf16.msra.mxu1 %v5836_v15 }
 0x366   :  { %4931 = vmatprep.subr.bf16.mxu1 %v5600_v1 }
 0x433   :  { %v491_v39 = vpop.f32.mrb[2].mxu1 }
 0x434   :  { %v495_v40 = vadd.f32 %v491_v39, %v273_v38  ;;  %v4486_v41 = vpop.f32.mrb[3].mxu1 }
 0x436   :  { %5156 = vtanh.f32 %v495_v40  ;;  %v4143_v43 = vmul.f32 -1.442695, %v495_v40 }
 0x438   :  { %5158 = vpow2.f32 %v4143_v43 }
 0x440   :  { %v5157_v42 = vpop.eup %5156 }
 0x441   :  { %505 = vrot.lane.b32.xlu0 %v5157_v42, %s5603_s24 }
 0x442   :  { %v5159_v44 = vpop.eup %5158 }
 0x443   :  { %v499_v45 = vadd.f32 1.0, %v5159_v44 }
 0x445   :  { %5160 = vrcp.f32 %v499_v45 }
 0x44f   :  { %v5161_v46 = vpop.eup %5160 }
 0x450   :  { %v503_v49 = vmul.f32 %v5161_v46, %v410_v33 }
 0x4b3   :  { %v506_v47 = vpop.permute.xlu0 %505 }
 0x4b4   :  { %v508_v48 = vmul.f32 %v5161_v46, %v506_v47  ;;  %v288_v47 = vadd.f32 %v5863_v17, %v5929_v0 }
 0x4b6   :  { %510 = vrot.lane.b32.xlu1 %v508_v48, %s5604_s3 }
 0x528   :  { %v511_v50 = vpop.permute.xlu1 %510 }
 0x529   :  { %v513_v51 = vadd.f32 %v511_v50, %v503_v49 }
 0x52b   :  { %5162 = vtanh.f32 %v513_v51 }
 0x535   :  { %v5163_v58 = vpop.eup %5162 }
 0x536   :  { %516 = vrot.lane.b32.xlu0 %v5163_v58, %s5603_s24 }
 0x5a8   :  { %v517_v59 = vpop.permute.xlu0 %516 }
 0x5a9   :  { %v519_v60 = vmul.f32 %v5161_v46, %v517_v59 }
 0x5ab   :  { %521 = vrot.lane.b32.xlu1 %v519_v60, %s5604_s3 }
 0x61d   :  { %v522_v5 = vpop.permute.xlu1 %521 }
 0x61e   :  { %524 = vst.msk [vmem:[#allocation3 + $0x8] sm:$0xff] %vm176_vm1, %v522_v5  ;;  %4496 = vmatmul.mubr.msk.f32.vlgmr.msra.gmra.mrb[8].mxu0 %vm176_vm1, %v522_v5 }
 0x61f   :  { %4927 = vmatpush3.bf16.msra.mxu0 %v5826_v10  ;;  %4517 = vmatprep.mubr.msk.f32.mxu0 %vm5601_vm0, %v5602_v2 }
 0x620   :  { %4928 = vmatprep.subr.bf16.mxu0 %v5600_v1 }
 0x623   :  { %4930 = vmatpush3.bf16.msra.mxu0 %v5836_v15 }
 0x624   :  { %4937 = vmatprep.subr.bf16.mxu0 %v5600_v1 }
 0x6f1   :  { %v594_v7 = vpop.f32.mrb[8].mxu0 }
 0x6f2   :  { %v598_v8 = vadd.f32 %v594_v7, %v278_v6  ;;  %v4497_v9 = vpop.f32.mrb[9].mxu0 }
 0x6f4   :  { %5164 = vtanh.f32 %v598_v8  ;;  %v4145_v13 = vmul.f32 -1.442695, %v598_v8 }
 0x6f6   :  { %5166 = vpow2.f32 %v4145_v13 }
 0x6fe   :  { %v5165_v11 = vpop.eup %5164 }
 0x6ff   :  { %608 = vrot.lane.b32.xlu0 %v5165_v11, %s5603_s24 }
 0x700   :  { %v5167_v14 = vpop.eup %5166 }
 0x701   :  { %v602_v18 = vadd.f32 1.0, %v5167_v14  ;;  %v293_v14 = vadd.f32 %v5927_v63, %v5863_v17 }
 0x703   :  { %5168 = vrcp.f32 %v602_v18 }
 0x70d   :  { %v5169_v19 = vpop.eup %5168 }
 0x70e   :  { %v606_v22 = vmul.f32 %v5169_v19, %v513_v51 }
 0x771   :  { %v609_v20 = vpop.permute.xlu0 %608 }
 0x772   :  { %v611_v21 = vmul.f32 %v5169_v19, %v609_v20 }
 0x774   :  { %613 = vrot.lane.b32.xlu1 %v611_v21, %s5604_s3 }
 0x7e6   :  { %v614_v23 = vpop.permute.xlu1 %613 }
 0x7e7   :  { %v616_v24 = vadd.f32 %v614_v23, %v606_v22 }
 0x7e9   :  { %5170 = vtanh.f32 %v616_v24 }
 0x7f3   :  { %v5171_v25 = vpop.eup %5170 }
 0x7f4   :  { %619 = vrot.lane.b32.xlu0 %v5171_v25, %s5603_s24 }
 0x866   :  { %v620_v26 = vpop.permute.xlu0 %619 }
 0x867   :  { %v622_v27 = vmul.f32 %v5169_v19, %v620_v26 }
 0x869   :  { %624 = vrot.lane.b32.xlu1 %v622_v27, %s5604_s3 }
 0x8db   :  { %v625_v28 = vpop.permute.xlu1 %624 }
 0x8dc   :  { %627 = vst.msk [vmem:[#allocation3 + $0x10] sm:$0xff] %vm176_vm1, %v625_v28  ;;  %4507 = vmatmul.mubr.msk.f32.vlgmr.msra.gmra.mrb[4].mxu1 %vm176_vm1, %v625_v28 }
 0x8dd   :  { %4933 = vmatpush3.bf16.msra.mxu1 %v5826_v10  ;;  %4528 = vmatprep.mubr.msk.f32.mxu1 %vm5601_vm0, %v5602_v2 }
 0x8de   :  { %4934 = vmatprep.subr.bf16.mxu1 %v5600_v1 }
 0x8e1   :  { %4936 = vmatpush3.bf16.msra.mxu1 %v5836_v15 }
 0x8e2   :  { %4943 = vmatprep.subr.bf16.mxu1 %v5600_v1 }
 0x9af   :  { %v697_v30 = vpop.f32.mrb[4].mxu1 }
 0x9b0   :  { %v701_v31 = vadd.f32 %v697_v30, %v283_v29  ;;  %v4508_v32 = vpop.f32.mrb[5].mxu1 }
 0x9b1   :  { %v298_v32 = vadd.f32 %v5863_v17, %v5933_v4 }
 0x9b2   :  { %5172 = vtanh.f32 %v701_v31  ;;  %v4147_v34 = vmul.f32 -1.442695, %v701_v31 }
 0x9b4   :  { %5174 = vpow2.f32 %v4147_v34 }
 0x9bc   :  { %v5173_v33 = vpop.eup %5172 }
 0x9bd   :  { %711 = vrot.lane.b32.xlu0 %v5173_v33, %s5603_s24 }
 0x9be   :  { %v5175_v35 = vpop.eup %5174 }
 0x9bf   :  { %v705_v36 = vadd.f32 1.0, %v5175_v35 }
 0x9c1   :  { %5176 = vrcp.f32 %v705_v36 }
 0x9cb   :  { %v5177_v37 = vpop.eup %5176 }
 0x9cc   :  { %v709_v40 = vmul.f32 %v5177_v37, %v616_v24 }
 0xa2f   :  { %v712_v38 = vpop.permute.xlu0 %711 }
 0xa30   :  { %v714_v39 = vmul.f32 %v5177_v37, %v712_v38 }
 0xa32   :  { %716 = vrot.lane.b32.xlu1 %v714_v39, %s5604_s3 }
 0xaa4   :  { %v717_v41 = vpop.permute.xlu1 %716 }
 0xaa5   :  { %v719_v42 = vadd.f32 %v717_v41, %v709_v40 }
 0xaa7   :  { %5178 = vtanh.f32 %v719_v42 }
 0xab1   :  { %v5179_v43 = vpop.eup %5178 }
 0xab2   :  { %722 = vrot.lane.b32.xlu0 %v5179_v43, %s5603_s24 }
 0xb24   :  { %v723_v44 = vpop.permute.xlu0 %722 }
 0xb25   :  { %v725_v45 = vmul.f32 %v5177_v37, %v723_v44  ;;  %v1143_v44 = vld [vmem:[#allocation10] sm:$0xff] }
 0xb27   :  { %727 = vrot.lane.b32.xlu1 %v725_v45, %s5604_s3  ;;  %v1144_v45 = vld [vmem:[#allocation10 + $0x8] sm:$0xff] }
 0xb99   :  { %v728_v46 = vpop.permute.xlu1 %727 }
 0xb9a   :  { %730 = vst.msk [vmem:[#allocation3 + $0x18] sm:$0xff] %vm176_vm1, %v728_v46  ;;  %4518 = vmatmul.mubr.msk.f32.vlgmr.msra.gmra.mrb[10].mxu0 %vm176_vm1, %v728_v46  ;;  %v1145_v46 = vld [vmem:[#allocation10 + $0x10] sm:$0xff] }
 0xb9b   :  { %4939 = vmatpush3.bf16.msra.mxu0 %v5826_v10  ;;  %4539 = vmatprep.mubr.msk.f32.mxu0 %vm5601_vm0, %v5602_v2 }
 0xb9c   :  { %4940 = vmatprep.subr.bf16.mxu0 %v5600_v1 }
 0xb9f   :  { %4942 = vmatpush3.bf16.msra.mxu0 %v5836_v15 }
 0xc6d   :  { %v800_v48 = vpop.f32.mrb[10].mxu0 }
 0xc6e   :  { %v804_v49 = vadd.f32 %v800_v48, %v288_v47  ;;  %v4519_v50 = vpop.f32.mrb[11].mxu0  ;;  %v4949_v47 = vpack.c.bf16 %v1144_v45, %v1143_v44  ;;  %v1146_v48 = vld [vmem:[#allocation10 + $0x18] sm:$0xff] }
 0xc70   :  { %5180 = vtanh.f32 %v804_v49  ;;  %v4149_v58 = vmul.f32 -1.442695, %v804_v49  ;;  %v4953_v49 = vpack.c.bf16 %v1146_v48, %v1145_v46  ;;  %4950 = vmatprep.subr.bf16.mxu0 %v4949_v47 }
 0xc72   :  { %5182 = vpow2.f32 %v4149_v58 }
 0xc7a   :  { %v5181_v51 = vpop.eup %5180 }
 0xc7b   :  { %814 = vrot.lane.b32.xlu0 %v5181_v51, %s5603_s24 }
 0xc7c   :  { %v5183_v59 = vpop.eup %5182 }
 0xc7d   :  { %v808_v60 = vadd.f32 1.0, %v5183_v59 }
 0xc7f   :  { %5184 = vrcp.f32 %v808_v60 }
 0xc89   :  { %v5185_v61 = vpop.eup %5184 }
 0xc8a   :  { %v812_v6 = vmul.f32 %v5185_v61, %v719_v42 }
 0xced   :  { %v815_v62 = vpop.permute.xlu0 %814 }
 0xcee   :  { %v817_v5 = vmul.f32 %v5185_v61, %v815_v62 }
 0xcf0   :  { %819 = vrot.lane.b32.xlu1 %v817_v5, %s5604_s3 }
 0xd62   :  { %v820_v7 = vpop.permute.xlu1 %819 }
 0xd63   :  { %v822_v0 = vadd.f32 %v820_v7, %v812_v6 }
 0xd65   :  { %5186 = vtanh.f32 %v822_v0 }
 0xd6f   :  { %v5187_v8 = vpop.eup %5186 }
 0xd70   :  { %825 = vrot.lane.b32.xlu0 %v5187_v8, %s5603_s24  ;;  %v303_v8 = vadd.f32 %v5931_v3, %v5863_v17 }
 0xde2   :  { %v826_v9 = vpop.permute.xlu0 %825 }
 0xde3   :  { %v828_v11 = vmul.f32 %v5185_v61, %v826_v9 }
 0xde5   :  { %830 = vrot.lane.b32.xlu1 %v828_v11, %s5604_s3 }
 0xe57   :  { %v831_v13 = vpop.permute.xlu1 %830 }
 0xe58   :  { %833 = vst.msk [vmem:[#allocation3 + $0x20] sm:$0xff] %vm176_vm1, %v831_v13  ;;  %4529 = vmatmul.mubr.msk.f32.vlgmr.msra.gmra.mrb[6].mxu1 %vm176_vm1, %v831_v13 }
 0xe59   :  { %4945 = vmatpush3.bf16.msra.mxu1 %v5826_v10  ;;  %4550 = vmatprep.mubr.msk.f32.mxu1 %vm5601_vm0, %v5602_v2 }
 0xe5a   :  { %4946 = vmatprep.subr.bf16.mxu1 %v5600_v1 }
 0xe5d   :  { %4948 = vmatpush3.bf16.msra.mxu1 %v5836_v15 }
 0xe5e   :  { %4957 = vmatprep.subr.bf16.mxu1 %v5600_v1 }
 0xf2b   :  { %v903_v18 = vpop.f32.mrb[6].mxu1 }
 0xf2c   :  { %v907_v19 = vadd.f32 %v903_v18, %v293_v14  ;;  %v4530_v20 = vpop.f32.mrb[7].mxu1  ;;  %v6057_v14 = vld [vmem:[#allocation13] ss:$0 sm:$0xff] }
 0xf2e   :  { %5188 = vtanh.f32 %v907_v19  ;;  %v4151_v10 = vmul.f32 -1.442695, %v907_v19 }
 0xf30   :  { %5190 = vpow2.f32 %v4151_v10 }
 0xf38   :  { %v5189_v21 = vpop.eup %5188 }
 0xf39   :  { %917 = vrot.lane.b32.xlu0 %v5189_v21, %s5603_s24 }
 0xf3a   :  { %v5191_v22 = vpop.eup %5190 }
 0xf3b   :  { %v911_v23 = vadd.f32 1.0, %v5191_v22 }
 0xf3d   :  { %5192 = vrcp.f32 %v911_v23 }
 0xf47   :  { %v5193_v24 = vpop.eup %5192 }
 0xf48   :  { %v915_v26 = vmul.f32 %v5193_v24, %v822_v0 }
 0xfab   :  { %v918_v25 = vpop.permute.xlu0 %917 }
 0xfac   :  { %v920_v15 = vmul.f32 %v5193_v24, %v918_v25 }
 0xfae   :  { %922 = vrot.lane.b32.xlu1 %v920_v15, %s5604_s3 }
0x1020   :  { %v923_v27 = vpop.permute.xlu1 %922 }
0x1021   :  { %v925_v63 = vadd.f32 %v923_v27, %v915_v26 }
0x1023   :  { %5194 = vtanh.f32 %v925_v63 }
0x102d   :  { %v5195_v28 = vpop.eup %5194 }
0x102e   :  { %928 = vrot.lane.b32.xlu0 %v5195_v28, %s5603_s24 }
0x10a0   :  { %v929_v29 = vpop.permute.xlu0 %928 }
0x10a1   :  { %v931_v30 = vmul.f32 %v5193_v24, %v929_v29 }
0x10a3   :  { %933 = vrot.lane.b32.xlu1 %v931_v30, %s5604_s3 }
0x1115   :  { %v934_v31 = vpop.permute.xlu1 %933 }
0x1116   :  { %936 = vst.msk [vmem:[#allocation3 + $0x28] sm:$0xff] %vm176_vm1, %v934_v31  ;;  %4540 = vmatmul.mubr.msk.f32.vlgmr.msra.gmra.mrb[12].mxu0 %vm176_vm1, %v934_v31 }
0x1117   :  { %4561 = vmatprep.mubr.msk.f32.mxu0 %vm176_vm1, %v5831_v12  ;;  %4952 = vmatpush3.bf16.msra.mxu0 %v4949_v47 }
0x1118   :  { %4954 = vmatprep.subr.bf16.mxu0 %v4953_v49 }
0x111b   :  { %4956 = vmatpush3.bf16.msra.mxu0 %v4953_v49 }
0x111c   :  { %4969 = vmatprep.subr.bf16.mxu0 %v5600_v1 }
0x111e   :  { %4562 = vmatmul.mubr.msk.f32.vlgmr.msra.gmra.mrb[14].mxu0 %vm176_vm1, %v5843_v16  ;;  %v1267_v16 = vld [vmem:[#allocation11] sm:$0xff] }
0x111f   :  { %4564 = vmatprep.mubr.msk.f32.mxu0 %vm176_vm1, %v5884_v52  ;;  %v1268_v52 = vld [vmem:[#allocation11 + $0x8] sm:$0xff] }
0x1120   :  { %v6017_v51 = vpack.c.bf16 %v1268_v52, %v1267_v16 }
0x1122   :  { %4565 = vmatmul.mubr.msk.f32.gmra.mrb[16].mxu0 %vm176_vm1, %v5889_v53  ;;  %v1269_v53 = vld [vmem:[#allocation11 + $0x10] sm:$0xff] }
0x1123   :  { %4567 = vmatprep.mubr.msk.f32.mxu0 %vm176_vm1, %v5894_v54  ;;  %4971 = vmatpush3.bf16.msra.mxu0 %v6017_v51  ;;  %v1270_v54 = vld [vmem:[#allocation11 + $0x18] sm:$0xff] }
0x1124   :  { %4972 = vmatprep.subr.bf16.mxu0 %v5600_v1 }
0x1126   :  { %4568 = vmatmul.mubr.msk.f32.gmra.mrb[18].mxu0 %vm176_vm1, %v5905_v55  ;;  %v6021_v55 = vpack.c.bf16 %v1270_v54, %v1269_v53 }
0x1127   :  { %4570 = vmatprep.mubr.msk.f32.mxu0 %vm176_vm1, %v5910_v56 }
0x1128   :  { %4974 = vmatpush3.bf16.msra.mxu0 %v6021_v55 }
0x1129   :  { %4981 = vmatprep.subr.bf16.mxu0 %v5600_v1 }
0x112a   :  { %4571 = vmatmul.mubr.msk.f32.gmra.mrb[20].mxu0 %vm176_vm1, %v5919_v57 }
0x112b   :  { %4603 = vmatprep.mubr.msk.f32.mxu0 %vm5601_vm0, %v5602_v2 }
0x11e9   :  { %v1006_v33 = vpop.f32.mrb[12].mxu0 }
0x11ea   :  { %v1010_v34 = vadd.f32 %v1006_v33, %v298_v32  ;;  %v4541_v35 = vpop.f32.mrb[13].mxu0 }
0x11ec   :  { %5196 = vtanh.f32 %v1010_v34  ;;  %v4153_v37 = vmul.f32 -1.442695, %v1010_v34 }
0x11ee   :  { %5198 = vpow2.f32 %v4153_v37 }
0x11f1   :  { %v6026_v58 = vpop.f32.mrb[14].mxu0 }
0x11f2   :  { %v6028_v59 = vpop.f32.mrb[15].mxu0 }
0x11f5   :  { %v6030_v60 = vpop.f32.mrb[16].mxu0 }
0x11f6   :  { %v5197_v36 = vpop.eup %5196  ;;  %v6032_v61 = vpop.f32.mrb[17].mxu0 }
0x11f7   :  { %1020 = vrot.lane.b32.xlu0 %v5197_v36, %s5603_s24 }
0x11f8   :  { %v5199_v38 = vpop.eup %5198 }
0x11f9   :  { %v1014_v39 = vadd.f32 1.0, %v5199_v38  ;;  %v6049_v5 = vpop.f32.mrb[18].mxu0 }
0x11fa   :  { %v6051_v6 = vpop.f32.mrb[19].mxu0  ;;  %v1246_v48 = vadd.f32 %v6049_v5, %v6057_v14 }
0x11fb   :  { %5200 = vrcp.f32 %v1014_v39 }
0x11fd   :  { %v4572_v7 = vpop.f32.mrb[20].mxu0 }
0x11fe   :  { %v1250_v0 = vpop.f32.mrb[21].mxu0  ;;  %v1256_v18 = vadd.f32 %v4572_v7, %v6057_v14 }
0x11ff   :  { %v1251_v31 = vadd.f32 %v6057_v14, %v1250_v0 }
0x1205   :  { %v5201_v40 = vpop.eup %5200 }
0x1206   :  { %v1018_v12 = vmul.f32 %v5201_v40, %v925_v63 }
0x1269   :  { %v1021_v41 = vpop.permute.xlu0 %1020 }
0x126a   :  { %v1023_v42 = vmul.f32 %v5201_v40, %v1021_v41 }
0x126c   :  { %1025 = vrot.lane.b32.xlu1 %v1023_v42, %s5604_s3 }
0x12de   :  { %v1026_v43 = vpop.permute.xlu1 %1025 }
0x12df   :  { %v5996_v4 = vadd.f32 %v1026_v43, %v1018_v12 }
0x12e1   :  { %5202 = vtanh.f32 %v5996_v4 }
0x12eb   :  { %v5203_v50 = vpop.eup %5202 }
0x12ec   :  { %1031 = vrot.lane.b32.xlu0 %v5203_v50, %s5603_s24 }
0x135e   :  { %v1032_v56 = vpop.permute.xlu0 %1031 }
0x135f   :  { %v1034_v57 = vmul.f32 %v5201_v40, %v1032_v56 }
0x1361   :  { %1036 = vrot.lane.b32.xlu1 %v1034_v57, %s5604_s3 }
0x13d3   :  { %v1037_v62 = vpop.permute.xlu1 %1036 }
0x13d4   :  { %1039 = vst.msk [vmem:[#allocation3 + $0x30] sm:$0xff] %vm176_vm1, %v1037_v62  ;;  %4551 = vmatmul.mubr.msk.f32.vlgmr.msra.gmra.mrb[8].mxu1 %vm176_vm1, %v1037_v62 }
0x13d5   :  { %4959 = vmatpush3.bf16.msra.mxu1 %v6017_v51  ;;  %4581 = vmatprep.mubr.msk.f32.mxu1 %vm5601_vm0, %v5602_v2 }
0x13d6   :  { %4960 = vmatprep.subr.bf16.mxu1 %v5600_v1 }
0x13d9   :  { %4962 = vmatpush3.bf16.msra.mxu1 %v6021_v55 }
0x13da   :  { %4963 = vmatprep.subr.bf16.mxu1 %v5600_v1 }
0x13dc   :  { %4582 = vmatmul.mubr.f32.vlgmr.msra.gmra.mrb[10].mxu1 %v5602_v2 }
0x13dd   :  { %4965 = vmatpush3.bf16.msra.mxu1 %v6017_v51  ;;  %4592 = vmatprep.mubr.msk.f32.mxu1 %vm5601_vm0, %v5602_v2 }
0x13de   :  { %4966 = vmatprep.subr.bf16.mxu1 %v5600_v1 }
0x13e1   :  { %4968 = vmatpush3.bf16.msra.mxu1 %v6021_v55 }
0x13e2   :  { %4975 = vmatprep.subr.bf16.mxu1 %v5600_v1 }
0x14a7   :  { %v1109_v9 = vpop.f32.mrb[8].mxu1 }
0x14a8   :  { %v6055_v11 = vadd.f32 %v1109_v9, %v303_v8  ;;  %v4552_v13 = vpop.f32.mrb[9].mxu1 }
0x14af   :  { %v1338_v19 = vpop.f32.mrb[10].mxu1 }
0x14b0   :  { %v1342_v20 = vadd.f32 %v1338_v19, %v1256_v18  ;;  %v4583_v21 = vpop.f32.mrb[11].mxu1 }
0x14b2   :  { %5204 = vtanh.f32 %v1342_v20  ;;  %v4165_v22 = vmul.f32 -1.442695, %v1342_v20  ;;  %v1241_v20 = vadd.f32 %v6057_v14, %v6051_v6 }
0x14b4   :  { %5206 = vpow2.f32 %v4165_v22 }
0x14bc   :  { %v5205_v10 = vpop.eup %5204 }
0x14bd   :  { %1352 = vrot.lane.b32.xlu0 %v5205_v10, %s5603_s24 }
0x14be   :  { %v5207_v23 = vpop.eup %5206 }
0x14bf   :  { %v1346_v24 = vadd.f32 1.0, %v5207_v23 }
0x14c1   :  { %5208 = vrcp.f32 %v1346_v24 }
0x14cb   :  { %v5209_v17 = vpop.eup %5208 }
0x14cc   :  { %v1350_v15 = vmul.f32 0.0, %v5209_v17 }
0x152f   :  { %v1353_v3 = vpop.permute.xlu0 %1352 }
0x1530   :  { %v1355_v25 = vmul.f32 %v5209_v17, %v1353_v3 }
0x1532   :  { %1357 = vrot.lane.b32.xlu1 %v1355_v25, %s5604_s3 }
0x15a4   :  { %v1358_v26 = vpop.permute.xlu1 %1357 }
0x15a5   :  { %v1360_v27 = vadd.f32 %v1358_v26, %v1350_v15 }
0x15a7   :  { %5210 = vtanh.f32 %v1360_v27 }
0x15b1   :  { %v5211_v63 = vpop.eup %5210 }
0x15b2   :  { %1363 = vrot.lane.b32.xlu0 %v5211_v63, %s5603_s24 }
0x1624   :  { %v1364_v28 = vpop.permute.xlu0 %1363 }
0x1625   :  { %v6063_v29 = vmul.f32 %v5209_v17, %v1364_v28 }
0x1627   :  { %1374 = vrot.lane.b32.xlu1 %v6063_v29, %s5604_s3 }
0x1699   :  { %v1375_v30 = vpop.permute.xlu1 %1374 }
0x169a   :  { %4593 = vmatmul.mubr.msk.f32.vlgmr.msra.gmra.mrb[12].mxu1 %vm176_vm1, %v1375_v30 }
0x169b   :  { %4977 = vmatpush3.bf16.msra.mxu1 %v6017_v51  ;;  %4614 = vmatprep.mubr.msk.f32.mxu1 %vm5601_vm0, %v5602_v2 }
0x169c   :  { %4978 = vmatprep.subr.bf16.mxu1 %v5600_v1 }
0x169f   :  { %4980 = vmatpush3.bf16.msra.mxu1 %v6021_v55 }
0x16a0   :  { %4987 = vmatprep.subr.bf16.mxu1 %v5600_v1 }
0x176d   :  { %v1444_v32 = vpop.f32.mrb[12].mxu1 }
0x176e   :  { %v1448_v33 = vadd.f32 %v1444_v32, %v1251_v31  ;;  %v4594_v34 = vpop.f32.mrb[13].mxu1 }
0x1770   :  { %5212 = vtanh.f32 %v1448_v33  ;;  %v4167_v36 = vmul.f32 -1.442695, %v1448_v33  ;;  %v1236_v33 = vadd.f32 %v6030_v60, %v6057_v14 }
0x1772   :  { %5214 = vpow2.f32 %v4167_v36 }
0x177a   :  { %v5213_v35 = vpop.eup %5212 }
0x177b   :  { %1458 = vrot.lane.b32.xlu0 %v5213_v35, %s5603_s24 }
0x177c   :  { %v5215_v37 = vpop.eup %5214 }
0x177d   :  { %v1452_v38 = vadd.f32 1.0, %v5215_v37 }
0x177f   :  { %5216 = vrcp.f32 %v1452_v38 }
0x1789   :  { %v5217_v39 = vpop.eup %5216 }
0x178a   :  { %v1456_v42 = vmul.f32 %v5217_v39, %v1360_v27 }
0x17ed   :  { %v1459_v40 = vpop.permute.xlu0 %1458 }
0x17ee   :  { %v1461_v41 = vmul.f32 %v5217_v39, %v1459_v40 }
0x17f0   :  { %1463 = vrot.lane.b32.xlu1 %v1461_v41, %s5604_s3 }
0x1862   :  { %v1464_v12 = vpop.permute.xlu1 %1463 }
0x1863   :  { %v1466_v43 = vadd.f32 %v1464_v12, %v1456_v42 }
0x1865   :  { %5218 = vtanh.f32 %v1466_v43 }
0x186f   :  { %v5219_v44 = vpop.eup %5218 }
0x1870   :  { %1469 = vrot.lane.b32.xlu0 %v5219_v44, %s5603_s24 }
0x18e2   :  { %v1470_v45 = vpop.permute.xlu0 %1469 }
0x18e3   :  { %v6078_v46 = vmul.f32 %v5217_v39, %v1470_v45 }
0x18e5   :  { %1479 = vrot.lane.b32.xlu1 %v6078_v46, %s5604_s3 }
0x1957   :  { %v1480_v47 = vpop.permute.xlu1 %1479 }
0x1958   :  { %4604 = vmatmul.mubr.msk.f32.vlgmr.msra.gmra.mrb[22].mxu0 %vm176_vm1, %v1480_v47 }
0x1959   :  { %4983 = vmatpush3.bf16.msra.mxu0 %v6017_v51  ;;  %4625 = vmatprep.mubr.msk.f32.mxu0 %vm5601_vm0, %v5602_v2 }
0x195a   :  { %4984 = vmatprep.subr.bf16.mxu0 %v5600_v1 }
0x195d   :  { %4986 = vmatpush3.bf16.msra.mxu0 %v6021_v55 }
0x195e   :  { %4993 = vmatprep.subr.bf16.mxu0 %v5600_v1 }
0x1a2b   :  { %v1549_v49 = vpop.f32.mrb[22].mxu0 }
0x1a2c   :  { %v1553_v50 = vadd.f32 %v1549_v49, %v1246_v48  ;;  %v4605_v16 = vpop.f32.mrb[23].mxu0 }
0x1a2e   :  { %5220 = vtanh.f32 %v1553_v50  ;;  %v4169_v53 = vmul.f32 -1.442695, %v1553_v50  ;;  %v1231_v50 = vadd.f32 %v6057_v14, %v6032_v61 }
0x1a30   :  { %5222 = vpow2.f32 %v4169_v53 }
0x1a38   :  { %v5221_v52 = vpop.eup %5220 }
0x1a39   :  { %1563 = vrot.lane.b32.xlu0 %v5221_v52, %s5603_s24 }
0x1a3a   :  { %v5223_v54 = vpop.eup %5222 }
0x1a3b   :  { %v1557_v56 = vadd.f32 1.0, %v5223_v54 }
0x1a3d   :  { %5224 = vrcp.f32 %v1557_v56 }
0x1a47   :  { %v5225_v57 = vpop.eup %5224 }
0x1a48   :  { %v1561_v0 = vmul.f32 %v5225_v57, %v1466_v43 }
0x1aab   :  { %v1564_v62 = vpop.permute.xlu0 %1563 }
0x1aac   :  { %v1566_v7 = vmul.f32 %v5225_v57, %v1564_v62 }
0x1aae   :  { %1568 = vrot.lane.b32.xlu1 %v1566_v7, %s5604_s3 }
0x1b20   :  { %v1569_v8 = vpop.permute.xlu1 %1568 }
0x1b21   :  { %v1571_v5 = vadd.f32 %v1569_v8, %v1561_v0 }
0x1b23   :  { %5226 = vtanh.f32 %v1571_v5 }
0x1b2d   :  { %v5227_v9 = vpop.eup %5226 }
0x1b2e   :  { %1574 = vrot.lane.b32.xlu0 %v5227_v9, %s5603_s24 }
0x1ba0   :  { %v1575_v13 = vpop.permute.xlu0 %1574 }
0x1ba1   :  { %v6094_v18 = vmul.f32 %v5225_v57, %v1575_v13 }
0x1ba3   :  { %1584 = vrot.lane.b32.xlu1 %v6094_v18, %s5604_s3 }
0x1c15   :  { %v1585_v19 = vpop.permute.xlu1 %1584 }
0x1c16   :  { %4615 = vmatmul.mubr.msk.f32.vlgmr.msra.gmra.mrb[14].mxu1 %vm176_vm1, %v1585_v19 }
0x1c17   :  { %4989 = vmatpush3.bf16.msra.mxu1 %v6017_v51  ;;  %4636 = vmatprep.mubr.msk.f32.mxu1 %vm5601_vm0, %v5602_v2 }
0x1c18   :  { %4990 = vmatprep.subr.bf16.mxu1 %v5600_v1 }
0x1c1b   :  { %4992 = vmatpush3.bf16.msra.mxu1 %v6021_v55 }
0x1c1c   :  { %4999 = vmatprep.subr.bf16.mxu1 %v5600_v1 }
0x1ce9   :  { %v1654_v21 = vpop.f32.mrb[14].mxu1 }
0x1cea   :  { %v1658_v10 = vadd.f32 %v1654_v21, %v1241_v20  ;;  %v4616_v22 = vpop.f32.mrb[15].mxu1  ;;  %v1226_v20 = vadd.f32 %v6026_v58, %v6057_v14 }
0x1cec   :  { %5228 = vtanh.f32 %v1658_v10  ;;  %v4171_v24 = vmul.f32 -1.442695, %v1658_v10 }
0x1cee   :  { %5230 = vpow2.f32 %v4171_v24 }
0x1cf6   :  { %v5229_v23 = vpop.eup %5228 }
0x1cf7   :  { %1668 = vrot.lane.b32.xlu0 %v5229_v23, %s5603_s24 }
0x1cf8   :  { %v5231_v17 = vpop.eup %5230 }
0x1cf9   :  { %v1662_v3 = vadd.f32 1.0, %v5231_v17 }
0x1cfb   :  { %5232 = vrcp.f32 %v1662_v3 }
0x1d05   :  { %v5233_v25 = vpop.eup %5232 }
0x1d06   :  { %v1666_v27 = vmul.f32 %v5233_v25, %v1571_v5 }
0x1d69   :  { %v1669_v15 = vpop.permute.xlu0 %1668 }
0x1d6a   :  { %v1671_v26 = vmul.f32 %v5233_v25, %v1669_v15 }
0x1d6c   :  { %1673 = vrot.lane.b32.xlu1 %v1671_v26, %s5604_s3 }
0x1dde   :  { %v1674_v63 = vpop.permute.xlu1 %1673 }
0x1ddf   :  { %v1676_v6 = vadd.f32 %v1674_v63, %v1666_v27 }
0x1de1   :  { %5234 = vtanh.f32 %v1676_v6 }
0x1deb   :  { %v5235_v28 = vpop.eup %5234 }
0x1dec   :  { %1679 = vrot.lane.b32.xlu0 %v5235_v28, %s5603_s24 }
0x1e5e   :  { %v1680_v30 = vpop.permute.xlu0 %1679 }
0x1e5f   :  { %v6110_v31 = vmul.f32 %v5233_v25, %v1680_v30 }
0x1e61   :  { %1689 = vrot.lane.b32.xlu1 %v6110_v31, %s5604_s3 }
0x1ed3   :  { %v1690_v32 = vpop.permute.xlu1 %1689 }
0x1ed4   :  { %4626 = vmatmul.mubr.msk.f32.vlgmr.msra.gmra.mrb[24].mxu0 %vm176_vm1, %v1690_v32 }
0x1ed5   :  { %4995 = vmatpush3.bf16.msra.mxu0 %v6017_v51  ;;  %4647 = vmatprep.mubr.msk.f32.mxu0 %vm5601_vm0, %v5602_v2 }
0x1ed6   :  { %4996 = vmatprep.subr.bf16.mxu0 %v5600_v1 }
0x1ed9   :  { %4998 = vmatpush3.bf16.msra.mxu0 %v6021_v55 }
0x1fa7   :  { %v1759_v34 = vpop.f32.mrb[24].mxu0 }
0x1fa8   :  { %v1763_v35 = vadd.f32 %v1759_v34, %v1236_v33  ;;  %v4627_v36 = vpop.f32.mrb[25].mxu0  ;;  %v1221_v33 = vadd.f32 %v6057_v14, %v6028_v59  ;;  %v2116_v14 = vld [vmem:[%s6592_s7] sm:$0xff] }
0x1faa   :  { %5236 = vtanh.f32 %v1763_v35  ;;  %v4173_v38 = vmul.f32 -1.442695, %v1763_v35 }
0x1fac   :  { %5238 = vpow2.f32 %v4173_v38 }
0x1fb4   :  { %v5237_v37 = vpop.eup %5236 }
0x1fb5   :  { %1773 = vrot.lane.b32.xlu0 %v5237_v37, %s5603_s24 }
0x1fb6   :  { %v5239_v39 = vpop.eup %5238 }
0x1fb7   :  { %v1767_v40 = vadd.f32 1.0, %v5239_v39 }
0x1fb9   :  { %5240 = vrcp.f32 %v1767_v40 }
0x1fc3   :  { %v5241_v41 = vpop.eup %5240 }
0x1fc4   :  { %v1771_v43 = vmul.f32 %v5241_v41, %v1676_v6 }
0x2027   :  { %v1774_v42 = vpop.permute.xlu0 %1773 }
0x2028   :  { %v1776_v12 = vmul.f32 %v5241_v41, %v1774_v42 }
0x202a   :  { %1778 = vrot.lane.b32.xlu1 %v1776_v12, %s5604_s3 }
0x209c   :  { %v1779_v44 = vpop.permute.xlu1 %1778 }
0x209d   :  { %v1781_v60 = vadd.f32 %v1779_v44, %v1771_v43 }
0x209f   :  { %5242 = vtanh.f32 %v1781_v60 }
0x20a9   :  { %v5243_v45 = vpop.eup %5242 }
0x20aa   :  { %1784 = vrot.lane.b32.xlu0 %v5243_v45, %s5603_s24  ;;  %v2118_v45 = vld [vmem:[%s6592_s7 + $0x10] sm:$0xff] }
0x211c   :  { %v1785_v47 = vpop.permute.xlu0 %1784 }
0x211d   :  { %v6125_v48 = vmul.f32 %v5241_v41, %v1785_v47 }
0x211f   :  { %1794 = vrot.lane.b32.xlu1 %v6125_v48, %s5604_s3 }
0x2191   :  { %v1795_v49 = vpop.permute.xlu1 %1794 }
0x2192   :  { %4637 = vmatmul.mubr.msk.f32.vlgmr.msra.gmra.mrb[16].mxu1 %vm176_vm1, %v1795_v49  ;;  %v2119_v49 = vld [vmem:[%s6592_s7 + $0x18] sm:$0xff] }
0x2193   :  { %5001 = vmatpush3.bf16.msra.mxu1 %v6017_v51  ;;  %4658 = vmatprep.mubr.msk.f32.mxu1 %vm5601_vm0, %v5602_v2 }
0x2194   :  { %5002 = vmatprep.subr.bf16.mxu1 %v5600_v1 }
0x2197   :  { %5004 = vmatpush3.bf16.msra.mxu1 %v6021_v55 }
0x2198   :  { %5021 = vmatprep.subr.bf16.mxu1 %v5600_v1 }
0x2265   :  { %v1864_v16 = vpop.f32.mrb[16].mxu1 }
0x2266   :  { %v1868_v52 = vadd.f32 %v1864_v16, %v1231_v50  ;;  %v4638_v53 = vpop.f32.mrb[17].mxu1  ;;  %v5009_v50 = vpack.c.bf16 %v2119_v49, %v2118_v45 }
0x2267   :  { %v2121_v53 = vld [vmem:[%s6592_s7 + $0x28] sm:$0xff] }
0x2268   :  { %5244 = vtanh.f32 %v1868_v52  ;;  %v4175_v51 = vmul.f32 -1.442695, %v1868_v52  ;;  %v2120_v52 = vld [vmem:[%s6592_s7 + $0x20] sm:$0xff] }
0x226a   :  { %5246 = vpow2.f32 %v4175_v51  ;;  %v2269_v51 = vld [vmem:[#allocation14] sm:$0xff] }
0x2272   :  { %v5245_v54 = vpop.eup %5244 }
0x2273   :  { %1878 = vrot.lane.b32.xlu0 %v5245_v54, %s5603_s24  ;;  %v5013_v54 = vpack.c.bf16 %v2121_v53, %v2120_v52 }
0x2274   :  { %v5247_v56 = vpop.eup %5246 }
0x2275   :  { %v1872_v57 = vadd.f32 1.0, %v5247_v56  ;;  %v2270_v56 = vld [vmem:[#allocation14 + $0x8] sm:$0xff] }
0x2277   :  { %5248 = vrcp.f32 %v1872_v57  ;;  %v2122_v57 = vld [vmem:[%s6592_s7 + $0x30] sm:$0xff] }
0x2281   :  { %v5249_v62 = vpop.eup %5248 }
0x2282   :  { %v1876_v0 = vmul.f32 %v5249_v62, %v1781_v60  ;;  %v2117_v60 = vld [vmem:[%s6592_s7 + $0x8] sm:$0xff] }
0x2283   :  { %v5005_v47 = vpack.c.bf16 %v2117_v60, %v2116_v14 }
0x2285   :  { %5006 = vmatprep.subr.bf16.mxu0 %v5005_v47 }
0x22e5   :  { %v1879_v7 = vpop.permute.xlu0 %1878 }
0x22e6   :  { %v1881_v55 = vmul.f32 %v5249_v62, %v1879_v7  ;;  %v2123_v7 = vld [vmem:[%s6592_s7 + $0x38] sm:$0xff] }
0x22e8   :  { %1883 = vrot.lane.b32.xlu1 %v1881_v55, %s5604_s3  ;;  %v5017_v55 = vpack.c.bf16 %v2123_v7, %v2122_v57 }
0x235a   :  { %v1884_v8 = vpop.permute.xlu1 %1883 }
0x235b   :  { %v1886_v61 = vadd.f32 %v1884_v8, %v1876_v0  ;;  %v2271_v0 = vld [vmem:[#allocation14 + $0x10] sm:$0xff]  ;;  %v2272_v8 = vld [vmem:[#allocation14 + $0x18] sm:$0xff] }
0x235d   :  { %5250 = vtanh.f32 %v1886_v61 }
0x2367   :  { %v5251_v5 = vpop.eup %5250 }
0x2368   :  { %1889 = vrot.lane.b32.xlu0 %v5251_v5, %s5603_s24 }
0x23da   :  { %v1890_v9 = vpop.permute.xlu0 %1889 }
0x23db   :  { %v6141_v13 = vmul.f32 %v5249_v62, %v1890_v9  ;;  %v6182_v62 = vpack.c.bf16 %v2270_v56, %v2269_v51 }
0x23dd   :  { %1899 = vrot.lane.b32.xlu1 %v6141_v13, %s5604_s3 }
0x244f   :  { %v1900_v19 = vpop.permute.xlu1 %1899 }
0x2450   :  { %4648 = vmatmul.mubr.msk.f32.vlgmr.msra.gmra.mrb[26].mxu0 %vm176_vm1, %v1900_v19 }
0x2451   :  { %5008 = vmatpush3.bf16.msra.mxu0 %v5005_v47 }
0x2452   :  { %5010 = vmatprep.subr.bf16.mxu0 %v5009_v50 }
0x2455   :  { %5012 = vmatpush3.bf16.msra.mxu0 %v5009_v50 }
0x2456   :  { %5014 = vmatprep.subr.bf16.mxu0 %v5013_v54 }
0x2459   :  { %5016 = vmatpush3.bf16.msra.mxu0 %v5013_v54  ;;  %v4155_v54 = vmul.f32 -1.442695, %v6055_v11 }
0x245a   :  { %5018 = vmatprep.subr.bf16.mxu0 %v5017_v55 }
0x245d   :  { %5020 = vmatpush3.bf16.msra.mxu0 %v5017_v55 }
0x245e   :  { %5039 = vmatprep.subr.bf16.mxu0 %v5600_v1 }
0x2523   :  { %v1969_v21 = vpop.f32.mrb[26].mxu0 }
0x2524   :  { %v1973_v10 = vadd.f32 %v1969_v21, %v1226_v20  ;;  %v4649_v22 = vpop.f32.mrb[27].mxu0 }
0x2526   :  { %5252 = vtanh.f32 %v1973_v10  ;;  %v4177_v24 = vmul.f32 -1.442695, %v1973_v10 }
0x2528   :  { %5254 = vpow2.f32 %v4177_v24  ;;  %v6216_v24 = vld [vmem:[#allocation16] ss:$0 sm:$0xff] }
0x2530   :  { %v5253_v23 = vpop.eup %5252 }
0x2531   :  { %1983 = vrot.lane.b32.xlu0 %v5253_v23, %s5603_s24 }
0x2532   :  { %v5255_v17 = vpop.eup %5254 }
0x2533   :  { %v1977_v3 = vadd.f32 1.0, %v5255_v17 }
0x2535   :  { %5256 = vrcp.f32 %v1977_v3 }
0x253f   :  { %v5257_v25 = vpop.eup %5256 }
0x2540   :  { %v1981_v27 = vmul.f32 %v5257_v25, %v1886_v61  ;;  %v6189_v61 = vpack.c.bf16 %v2272_v8, %v2271_v0 }
0x25a3   :  { %v1984_v15 = vpop.permute.xlu0 %1983 }
0x25a4   :  { %v1986_v26 = vmul.f32 %v5257_v25, %v1984_v15 }
0x25a6   :  { %1988 = vrot.lane.b32.xlu1 %v1986_v26, %s5604_s3 }
0x2618   :  { %v1989_v63 = vpop.permute.xlu1 %1988 }
0x2619   :  { %v1991_v58 = vadd.f32 %v1989_v63, %v1981_v27 }
0x261b   :  { %5258 = vtanh.f32 %v1991_v58 }
0x2625   :  { %v5259_v6 = vpop.eup %5258 }
0x2626   :  { %1994 = vrot.lane.b32.xlu0 %v5259_v6, %s5603_s24 }
0x2698   :  { %v1995_v28 = vpop.permute.xlu0 %1994 }
0x2699   :  { %v1997_v30 = vmul.f32 %v5257_v25, %v1995_v28 }
0x269b   :  { %2004 = vrot.lane.b32.xlu1 %v1997_v30, %s5604_s3 }
0x270d   :  { %v2005_v32 = vpop.permute.xlu1 %2004 }
0x270e   :  { %4659 = vmatmul.mubr.msk.f32.vlgmr.msra.gmra.mrb[18].mxu1 %vm176_vm1, %v2005_v32 }
0x270f   :  { %4697 = vmatprep.mubr.msk.f32.mxu1 %vm5601_vm0, %v5602_v2  ;;  %5023 = vmatpush3.bf16.msra.mxu1 %v6182_v62 }
0x2710   :  { %5024 = vmatprep.subr.bf16.mxu1 %v5600_v1 }
0x2713   :  { %5026 = vmatpush3.bf16.msra.mxu1 %v6189_v61 }
0x2714   :  { %5027 = vmatprep.subr.bf16.mxu1 %v5600_v1 }
0x2716   :  { %4698 = vmatmul.mubr.f32.vlgmr.msra.gmra.mrb[20].mxu1 %v5602_v2 }
0x2717   :  { %5029 = vmatpush3.bf16.msra.mxu1 %v6182_v62  ;;  %4708 = vmatprep.mubr.msk.f32.mxu1 %vm5601_vm0, %v5602_v2 }
0x2718   :  { %5030 = vmatprep.subr.bf16.mxu1 %v5600_v1 }
0x271b   :  { %5032 = vmatpush3.bf16.msra.mxu1 %v6189_v61 }
0x271c   :  { %5033 = vmatprep.subr.bf16.mxu1 %v5600_v1 }
0x27e1   :  { %v2074_v34 = vpop.f32.mrb[18].mxu1 }
0x27e2   :  { %v2078_v35 = vadd.f32 %v2074_v34, %v1221_v33  ;;  %v4660_v36 = vpop.f32.mrb[19].mxu1 }
0x27e4   :  { %5260 = vtanh.f32 %v2078_v35  ;;  %v4179_v38 = vmul.f32 -1.442695, %v2078_v35 }
0x27e6   :  { %5262 = vpow2.f32 %v4179_v38 }
0x27e9   :  { %v2340_v22 = vpop.f32.mrb[20].mxu1 }
0x27ea   :  { %v4699_v23 = vpop.f32.mrb[21].mxu1 }
0x27ee   :  { %v5261_v37 = vpop.eup %5260 }
0x27ef   :  { %2088 = vrot.lane.b32.xlu0 %v5261_v37, %s5603_s24 }
0x27f0   :  { %v5263_v39 = vpop.eup %5262 }
0x27f1   :  { %v2082_v40 = vadd.f32 1.0, %v5263_v39 }
0x27f3   :  { %5264 = vrcp.f32 %v2082_v40 }
0x27fd   :  { %v5265_v41 = vpop.eup %5264 }
0x27fe   :  { %v2086_v43 = vmul.f32 %v5265_v41, %v1991_v58 }
0x2861   :  { %v2089_v42 = vpop.permute.xlu0 %2088 }
0x2862   :  { %v2091_v12 = vmul.f32 %v5265_v41, %v2089_v42 }
0x2864   :  { %2093 = vrot.lane.b32.xlu1 %v2091_v12, %s5604_s3 }
0x28d6   :  { %v2094_v44 = vpop.permute.xlu1 %2093 }
0x28d7   :  { %v2096_v59 = vadd.f32 %v2094_v44, %v2086_v43 }
0x28d9   :  { %5266 = vtanh.f32 %v2096_v59 }
0x28e3   :  { %v5267_v16 = vpop.eup %5266 }
0x28e4   :  { %2099 = vrot.lane.b32.xlu0 %v5267_v16, %s5603_s24 }
0x28e8   :  { %1999 = vrot.lane.b32.xlu0 %v1997_v30, %s5603_s24 }
0x2956   :  { %v2100_v5 = vpop.permute.xlu0 %2099 }
0x2957   :  { %v2102_v9 = vmul.f32 %v5265_v41, %v2100_v5 }
0x2959   :  { %2104 = vrot.lane.b32.xlu1 %v2102_v9, %s5603_s24 }
0x295a   :  { %v2000_v19 = vpop.permute.xlu0 %1999 }
0x295b   :  { %2002 = vst.msk [vmem:[#allocation3 + $0x8] sm:$0xff] %vm1371_vm2, %v2000_v19 }
0x2962   :  { %v6208_v10 = vld [vmem:[#allocation3 + $0x8] sm:$0xff] }
0x29cb   :  { %v2105_v20 = vpop.permute.xlu1 %2104 }
0x29cc   :  { %2107 = vst.msk [vmem:[#allocation3] sm:$0xff] %vm1371_vm2, %v2105_v20 }
0x29d3   :  { %v6204_v21 = vld [vmem:[#allocation3] sm:$0xff] }
0x29d4   :  { %4677 = vmatprep.mubr.msk.f32.mxu0 %vm2131_vm3, %v6204_v21 }
0x29d5   :  { %4678 = vmatmul.mubr.msk.f32.vlgmr.msra.gmra.mrb[28].mxu0 %vm2131_vm3, %v6208_v10 }
0x29d6   :  { %5041 = vmatpush3.bf16.msra.mxu0 %v6182_v62 }
0x29d7   :  { %5042 = vmatprep.subr.bf16.mxu0 %v5600_v1 }
0x29da   :  { %5044 = vmatpush3.bf16.msra.mxu0 %v6189_v61 }
0x29db   :  { %5051 = vmatprep.subr.bf16.mxu0 %v5600_v1 }
0x2aa8   :  { %v4679_v17 = vpop.f32.mrb[28].mxu0 }
0x2aa9   :  { %v2222_v3 = vpop.f32.mrb[29].mxu0  ;;  %v2228_v39 = vadd.f32 %v4679_v17, %v6216_v24 }
0x2aaa   :  { %v2223_v25 = vadd.f32 %v6216_v24, %v2222_v3 }
0x2aac   :  { %v2344_v15 = vadd.f32 %v2340_v22, %v2223_v25 }
0x2aae   :  { %5268 = vtanh.f32 %v2344_v15  ;;  %v4189_v27 = vmul.f32 -1.442695, %v2344_v15 }
0x2ab0   :  { %5270 = vpow2.f32 %v4189_v27 }
0x2ab8   :  { %v5269_v26 = vpop.eup %5268 }
0x2ab9   :  { %2354 = vrot.lane.b32.xlu1 %v5269_v26, %s5603_s24 }
0x2aba   :  { %v5271_v63 = vpop.eup %5270 }
0x2abb   :  { %v2348_v58 = vadd.f32 1.0, %v5271_v63 }
0x2abd   :  { %5272 = vrcp.f32 %v2348_v58 }
0x2ac7   :  { %v5273_v6 = vpop.eup %5272 }
0x2ac8   :  { %v2352_v32 = vmul.f32 0.0, %v5273_v6 }
0x2b2b   :  { %v2355_v28 = vpop.permute.xlu1 %2354 }
0x2b2c   :  { %v2357_v30 = vmul.f32 %v5273_v6, %v2355_v28 }
0x2b2e   :  { %2359 = vrot.lane.b32.xlu0 %v2357_v30, %s5604_s3 }
0x2ba0   :  { %v2360_v33 = vpop.permute.xlu0 %2359 }
0x2ba1   :  { %v2362_v34 = vadd.f32 %v2360_v33, %v2352_v32 }
0x2ba3   :  { %5274 = vtanh.f32 %v2362_v34 }
0x2bad   :  { %v5275_v35 = vpop.eup %5274 }
0x2bae   :  { %2365 = vrot.lane.b32.xlu1 %v5275_v35, %s5603_s24 }
0x2c20   :  { %v2366_v36 = vpop.permute.xlu1 %2365 }
0x2c21   :  { %v2368_v37 = vmul.f32 %v5273_v6, %v2366_v36 }
0x2c23   :  { %2370 = vrot.lane.b32.xlu0 %v2368_v37, %s5604_s3 }
0x2c95   :  { %v2371_v38 = vpop.permute.xlu0 %2370 }
0x2c96   :  { %2373 = vst.msk [vmem:[#allocation4] sm:$0xff] %vm176_vm1, %v2371_v38  ;;  %4709 = vmatmul.mubr.msk.f32.vlgmr.msra.gmra.mrb[22].mxu1 %vm176_vm1, %v2371_v38 }
0x2c97   :  { %5035 = vmatpush3.bf16.msra.mxu1 %v6182_v62  ;;  %4719 = vmatprep.mubr.msk.f32.mxu1 %vm5601_vm0, %v5602_v2 }
0x2c98   :  { %5036 = vmatprep.subr.bf16.mxu1 %v5600_v1 }
0x2c9b   :  { %5038 = vmatpush3.bf16.msra.mxu1 %v6189_v61 }
0x2c9c   :  { %5045 = vmatprep.subr.bf16.mxu1 %v5600_v1 }
0x2d69   :  { %v2443_v40 = vpop.f32.mrb[22].mxu1 }
0x2d6a   :  { %v2447_v41 = vadd.f32 %v2443_v40, %v2228_v39  ;;  %v4710_v42 = vpop.f32.mrb[23].mxu1 }
0x2d6c   :  { %5276 = vtanh.f32 %v2447_v41  ;;  %v4191_v43 = vmul.f32 -1.442695, %v2447_v41 }
0x2d6e   :  { %5278 = vpow2.f32 %v4191_v43 }
0x2d76   :  { %v5277_v12 = vpop.eup %5276 }
0x2d77   :  { %2457 = vrot.lane.b32.xlu1 %v5277_v12, %s5603_s24 }
0x2d78   :  { %v5279_v44 = vpop.eup %5278 }
0x2d79   :  { %v2451_v59 = vadd.f32 1.0, %v5279_v44 }
0x2d7b   :  { %5280 = vrcp.f32 %v2451_v59 }
0x2d85   :  { %v5281_v14 = vpop.eup %5280 }
0x2d86   :  { %v2455_v47 = vmul.f32 %v5281_v14, %v2362_v34 }
0x2de9   :  { %v2458_v60 = vpop.permute.xlu1 %2457 }
0x2dea   :  { %v2460_v45 = vmul.f32 %v5281_v14, %v2458_v60 }
0x2dec   :  { %2462 = vrot.lane.b32.xlu0 %v2460_v45, %s5604_s3 }
0x2df0   :  { %1894 = vrot.lane.b32.xlu0 %v6141_v13, %s5603_s24 }
0x2e5e   :  { %v2463_v49 = vpop.permute.xlu0 %2462 }
0x2e5f   :  { %v6236_v50 = vadd.f32 %v2463_v49, %v2455_v47 }
0x2e61   :  { %5282 = vtanh.f32 %v6236_v50 }
0x2e62   :  { %v1895_v16 = vpop.permute.xlu0 %1894  ;;  %5284 = vtanh.f32 %v6055_v11 }
0x2e63   :  { %1897 = vst.msk [vmem:[#allocation3 + $0x10] sm:$0xff] %vm1371_vm2, %v1895_v16  ;;  %5286 = vpow2.f32 %v4155_v54 }
0x2e6a   :  { %v6241_v52 = vld [vmem:[#allocation3 + $0x10] sm:$0xff] }
0x2e6b   :  { %v5283_v53 = vpop.eup %5282  ;;  %4680 = vmatprep.mubr.msk.f32.mxu0 %vm2131_vm3, %v6241_v52 }
0x2e6c   :  { %2468 = vrot.lane.b32.xlu1 %v5283_v53, %s5603_s24  ;;  %v5285_v13 = vpop.eup %5284 }
0x2e6d   :  { %v5287_v51 = vpop.eup %5286 }
0x2e6e   :  { %v1117_v56 = vadd.f32 1.0, %v5287_v51 }
0x2e70   :  { %1789 = vrot.lane.b32.xlu1 %v6125_v48, %s5603_s24  ;;  %5288 = vrcp.f32 %v1117_v56 }
0x2e74   :  { %1123 = vrot.lane.b32.xlu1 %v5285_v13, %s5603_s24 }
0x2e7a   :  { %v5289_v0 = vpop.eup %5288 }
0x2e7b   :  { %v1121_v9 = vmul.f32 %v5289_v0, %v5996_v4 }
0x2ede   :  { %v2469_v57 = vpop.permute.xlu1 %2468 }
0x2edf   :  { %v2471_v7 = vmul.f32 %v5281_v14, %v2469_v57 }
0x2ee1   :  { %2473 = vrot.lane.b32.xlu0 %v2471_v7, %s5604_s3 }
0x2ee2   :  { %v1790_v55 = vpop.permute.xlu1 %1789 }
0x2ee3   :  { %1792 = vst.msk [vmem:[#allocation3 + $0x18] sm:$0xff] %vm1371_vm2, %v1790_v55 }
0x2ee6   :  { %v1124_v8 = vpop.permute.xlu1 %1123 }
0x2ee7   :  { %v1126_v5 = vmul.f32 %v5289_v0, %v1124_v8 }
0x2ee9   :  { %1128 = vrot.lane.b32.xlu1 %v1126_v5, %s5604_s3 }
0x2eea   :  { %v6253_v48 = vld [vmem:[#allocation3 + $0x18] sm:$0xff] }
0x2eeb   :  { %4681 = vmatmul.mubr.msk.f32.gmra.mrb[30].mxu0 %vm2131_vm3, %v6253_v48 }
0x2f53   :  { %v2474_v11 = vpop.permute.xlu0 %2473 }
0x2f54   :  { %2476 = vst.msk [vmem:[#allocation4 + $0x8] sm:$0xff] %vm176_vm1, %v2474_v11  ;;  %4720 = vmatmul.mubr.msk.f32.vlgmr.msra.gmra.mrb[24].mxu1 %vm176_vm1, %v2474_v11 }
0x2f55   :  { %5047 = vmatpush3.bf16.msra.mxu1 %v6182_v62  ;;  %4741 = vmatprep.mubr.msk.f32.mxu1 %vm5601_vm0, %v5602_v2 }
0x2f56   :  { %5048 = vmatprep.subr.bf16.mxu1 %v5600_v1 }
0x2f59   :  { %5050 = vmatpush3.bf16.msra.mxu1 %v6189_v61 }
0x2f5a   :  { %5057 = vmatprep.subr.bf16.mxu1 %v5600_v1 }
0x2f5b   :  { %v1129_v19 = vpop.permute.xlu1 %1128 }
0x2f5c   :  { %v1131_v20 = vadd.f32 %v1129_v19, %v1121_v9 }
0x2f5e   :  { %5290 = vtanh.f32 %v1131_v20 }
0x2f68   :  { %v5291_v22 = vpop.eup %5290 }
0x2f69   :  { %1134 = vrot.lane.b32.xlu1 %v5291_v22, %s5603_s24 }
0x2f6d   :  { %1684 = vrot.lane.b32.xlu1 %v6110_v31, %s5603_s24 }
0x2fbe   :  { %v6269_v23 = vpop.f32.mrb[30].mxu0 }
0x2fbf   :  { %v2232_v17 = vpop.f32.mrb[31].mxu0  ;;  %v2238_v47 = vadd.f32 %v6269_v23, %v6216_v24 }
0x2fc0   :  { %v2233_v31 = vadd.f32 %v6216_v24, %v2232_v17 }
0x2fdb   :  { %v1135_v3 = vpop.permute.xlu1 %1134 }
0x2fdc   :  { %v1137_v25 = vmul.f32 %v5289_v0, %v1135_v3 }
0x2fde   :  { %1139 = vrot.lane.b32.xlu1 %v1137_v25, %s5604_s3 }
0x2fdf   :  { %v1685_v15 = vpop.permute.xlu1 %1684 }
0x2fe0   :  { %1687 = vst.msk [vmem:[#allocation3 + $0x20] sm:$0xff] %vm1371_vm2, %v1685_v15 }
0x2fe2   :  { %1368 = vrot.lane.b32.xlu1 %v6063_v29, %s5603_s24 }
0x2fe7   :  { %v6275_v4 = vld [vmem:[#allocation3 + $0x20] sm:$0xff] }
0x2fe8   :  { %4683 = vmatprep.mubr.msk.f32.mxu0 %vm2131_vm3, %v6275_v4 }
0x3027   :  { %v2546_v26 = vpop.f32.mrb[24].mxu1 }
0x3028   :  { %v2550_v27 = vadd.f32 %v2546_v26, %v2233_v31  ;;  %v4721_v63 = vpop.f32.mrb[25].mxu1 }
0x302a   :  { %5292 = vtanh.f32 %v2550_v27  ;;  %v4193_v29 = vmul.f32 -1.442695, %v2550_v27 }
0x302c   :  { %5294 = vpow2.f32 %v4193_v29 }
0x3034   :  { %v5293_v58 = vpop.eup %5292 }
0x3035   :  { %2560 = vrot.lane.b32.xlu0 %v5293_v58, %s5603_s24 }
0x3036   :  { %v5295_v30 = vpop.eup %5294 }
0x3037   :  { %v2554_v32 = vadd.f32 1.0, %v5295_v30 }
0x3039   :  { %5296 = vrcp.f32 %v2554_v32 }
0x3043   :  { %v5297_v33 = vpop.eup %5296 }
0x3044   :  { %v2558_v36 = vmul.f32 %v5297_v33, %v6236_v50 }
0x3050   :  { %v1140_v6 = vpop.permute.xlu1 %1139 }
0x3051   :  { %1142 = vst.msk [vmem:[#allocation3 + $0x38] sm:$0xff] %vm176_vm1, %v1140_v6 }
0x3054   :  { %v1369_v28 = vpop.permute.xlu1 %1368 }
0x3055   :  { %1372 = vst.msk [vmem:[#allocation3 + $0x38] sm:$0xff] %vm1371_vm2, %v1369_v28 }
0x30a7   :  { %v2561_v34 = vpop.permute.xlu0 %2560 }
0x30a8   :  { %v2563_v35 = vmul.f32 %v5297_v33, %v2561_v34 }
0x30aa   :  { %2565 = vrot.lane.b32.xlu0 %v2563_v35, %s5604_s3 }
0x311c   :  { %v2566_v37 = vpop.permute.xlu0 %2565 }
0x311d   :  { %v2568_v38 = vadd.f32 %v2566_v37, %v2558_v36 }
0x311f   :  { %5298 = vtanh.f32 %v2568_v38 }
0x3129   :  { %v5299_v39 = vpop.eup %5298 }
0x312a   :  { %2571 = vrot.lane.b32.xlu0 %v5299_v39, %s5603_s24 }
0x312e   :  { %1579 = vrot.lane.b32.xlu0 %v6094_v18, %s5603_s24 }
0x3132   :  { %1474 = vrot.lane.b32.xlu0 %v6078_v46, %s5603_s24  ;;  %v6301_v46 = vld [vmem:[#allocation3 + $0x38] sm:$0xff] }
0x319c   :  { %v2572_v40 = vpop.permute.xlu0 %2571 }
0x319d   :  { %v2574_v41 = vmul.f32 %v5297_v33, %v2572_v40 }
0x319f   :  { %2576 = vrot.lane.b32.xlu0 %v2574_v41, %s5604_s3 }
0x31a0   :  { %v1580_v42 = vpop.permute.xlu0 %1579 }
0x31a1   :  { %1582 = vst.msk [vmem:[#allocation3 + $0x28] sm:$0xff] %vm1371_vm2, %v1580_v42 }
0x31a4   :  { %v1475_v12 = vpop.permute.xlu0 %1474 }
0x31a5   :  { %1477 = vst.msk [vmem:[#allocation3 + $0x30] sm:$0xff] %vm1371_vm2, %v1475_v12 }
0x31a8   :  { %v6293_v43 = vld [vmem:[#allocation3 + $0x28] sm:$0xff] }
0x31a9   :  { %4684 = vmatmul.mubr.msk.f32.gmra.mrb[32].mxu0 %vm2131_vm3, %v6293_v43 }
0x31ac   :  { %v6297_v44 = vld [vmem:[#allocation3 + $0x30] sm:$0xff] }
0x31ad   :  { %4686 = vmatprep.mubr.msk.f32.mxu0 %vm2131_vm3, %v6297_v44 }
0x31ae   :  { %4687 = vmatmul.mubr.msk.f32.gmra.mrb[34].mxu0 %vm2131_vm3, %v6301_v46 }
0x31af   :  { %4730 = vmatprep.mubr.msk.f32.mxu0 %vm5601_vm0, %v5602_v2 }
0x3211   :  { %v2577_v18 = vpop.permute.xlu0 %2576 }
0x3212   :  { %2579 = vst.msk [vmem:[#allocation4 + $0x10] sm:$0xff] %vm176_vm1, %v2577_v18  ;;  %4731 = vmatmul.mubr.msk.f32.vlgmr.msra.gmra.mrb[36].mxu0 %vm176_vm1, %v2577_v18 }
0x3213   :  { %5053 = vmatpush3.bf16.msra.mxu0 %v6182_v62  ;;  %4752 = vmatprep.mubr.msk.f32.mxu0 %vm5601_vm0, %v5602_v2 }
0x3214   :  { %5054 = vmatprep.subr.bf16.mxu0 %v5600_v1 }
0x3217   :  { %5056 = vmatpush3.bf16.msra.mxu0 %v6189_v61 }
0x3218   :  { %5063 = vmatprep.subr.bf16.mxu0 %v5600_v1 }
0x327c   :  { %v6315_v59 = vpop.f32.mrb[32].mxu0 }
0x327d   :  { %v2242_v14 = vpop.f32.mrb[33].mxu0  ;;  %v2248_v34 = vadd.f32 %v6315_v59, %v6216_v24 }
0x327e   :  { %v2243_v20 = vadd.f32 %v6216_v24, %v2242_v14  ;;  %v3095_v14 = vld [vmem:[%s6595_s10] sm:$0xff] }
0x3281   :  { %v6317_v60 = vpop.f32.mrb[34].mxu0 }
0x3282   :  { %v6319_v45 = vpop.f32.mrb[35].mxu0 }
0x32e5   :  { %v2649_v49 = vpop.f32.mrb[36].mxu0 }
0x32e6   :  { %v2653_v50 = vadd.f32 %v2649_v49, %v2238_v47  ;;  %v4732_v16 = vpop.f32.mrb[37].mxu0  ;;  %v3096_v47 = vld [vmem:[%s6595_s10 + $0x8] sm:$0xff] }
0x32e7   :  { %v5069_v49 = vpack.c.bf16 %v3096_v47, %v3095_v14 }
0x32e8   :  { %5300 = vtanh.f32 %v2653_v50  ;;  %v4195_v13 = vmul.f32 -1.442695, %v2653_v50 }
0x32ea   :  { %5302 = vpow2.f32 %v4195_v13  ;;  %v3097_v13 = vld [vmem:[%s6595_s10 + $0x10] sm:$0xff] }
0x32f2   :  { %v5301_v53 = vpop.eup %5300 }
0x32f3   :  { %2663 = vrot.lane.b32.xlu1 %v5301_v53, %s5603_s24 }
0x32f4   :  { %v5303_v54 = vpop.eup %5302 }
0x32f5   :  { %v2657_v51 = vadd.f32 1.0, %v5303_v54  ;;  %v3098_v54 = vld [vmem:[%s6595_s10 + $0x18] sm:$0xff] }
0x32f7   :  { %5304 = vrcp.f32 %v2657_v51  ;;  %v5073_v51 = vpack.c.bf16 %v3098_v54, %v3097_v13 }
0x3301   :  { %v5305_v56 = vpop.eup %5304 }
0x3302   :  { %v2661_v55 = vmul.f32 %v5305_v56, %v2568_v38 }
0x3365   :  { %v2664_v57 = vpop.permute.xlu1 %2663 }
0x3366   :  { %v2666_v7 = vmul.f32 %v5305_v56, %v2664_v57  ;;  %v3099_v57 = vld [vmem:[%s6595_s10 + $0x20] sm:$0xff] }
0x3368   :  { %2668 = vrot.lane.b32.xlu0 %v2666_v7, %s5604_s3  ;;  %v3100_v7 = vld [vmem:[%s6595_s10 + $0x28] sm:$0xff] }
0x33da   :  { %v2669_v0 = vpop.permute.xlu0 %2668 }
0x33db   :  { %v2671_v8 = vadd.f32 %v2669_v0, %v2661_v55  ;;  %v5077_v55 = vpack.c.bf16 %v3100_v7, %v3099_v57  ;;  %v3101_v0 = vld [vmem:[%s6595_s10 + $0x30] sm:$0xff] }
0x33dd   :  { %5306 = vtanh.f32 %v2671_v8 }
0x33e7   :  { %v5307_v5 = vpop.eup %5306 }
0x33e8   :  { %2674 = vrot.lane.b32.xlu1 %v5307_v5, %s5603_s24 }
0x345a   :  { %v2675_v11 = vpop.permute.xlu1 %2674 }
0x345b   :  { %v2677_v9 = vmul.f32 %v5305_v56, %v2675_v11 }
0x345d   :  { %2679 = vrot.lane.b32.xlu0 %v2677_v9, %s5604_s3 }
0x34cf   :  { %v2680_v19 = vpop.permute.xlu0 %2679 }
0x34d0   :  { %2682 = vst.msk [vmem:[#allocation4 + $0x18] sm:$0xff] %vm176_vm1, %v2680_v19  ;;  %4742 = vmatmul.mubr.msk.f32.vlgmr.msra.gmra.mrb[26].mxu1 %vm176_vm1, %v2680_v19 }
0x34d1   :  { %5059 = vmatpush3.bf16.msra.mxu1 %v6182_v62  ;;  %4763 = vmatprep.mubr.msk.f32.mxu1 %vm5601_vm0, %v5602_v2 }
0x34d2   :  { %5060 = vmatprep.subr.bf16.mxu1 %v5600_v1 }
0x34d5   :  { %5062 = vmatpush3.bf16.msra.mxu1 %v6189_v61 }
0x34d6   :  { %5070 = vmatprep.subr.bf16.mxu1 %v5069_v49 }
0x35a3   :  { %v2752_v22 = vpop.f32.mrb[26].mxu1 }
0x35a4   :  { %v2756_v23 = vadd.f32 %v2752_v22, %v2243_v20  ;;  %v4743_v17 = vpop.f32.mrb[27].mxu1 }
0x35a6   :  { %5308 = vtanh.f32 %v2756_v23  ;;  %v4197_v25 = vmul.f32 -1.442695, %v2756_v23 }
0x35a8   :  { %5310 = vpow2.f32 %v4197_v25 }
0x35b0   :  { %v5309_v3 = vpop.eup %5308 }
0x35b1   :  { %2766 = vrot.lane.b32.xlu1 %v5309_v3, %s5603_s24 }
0x35b2   :  { %v5311_v15 = vpop.eup %5310 }
0x35b3   :  { %v2760_v31 = vadd.f32 1.0, %v5311_v15 }
0x35b5   :  { %5312 = vrcp.f32 %v2760_v31 }
0x35bf   :  { %v5313_v26 = vpop.eup %5312 }
0x35c0   :  { %v2764_v58 = vmul.f32 %v5313_v26, %v2671_v8  ;;  %v3102_v8 = vld [vmem:[%s6595_s10 + $0x38] sm:$0xff] }
0x35c1   :  { %v5081_v5 = vpack.c.bf16 %v3102_v8, %v3101_v0 }
0x3623   :  { %v2767_v27 = vpop.permute.xlu1 %2766 }
0x3624   :  { %v2769_v63 = vmul.f32 %v5313_v26, %v2767_v27 }
0x3626   :  { %2771 = vrot.lane.b32.xlu0 %v2769_v63, %s5604_s3 }
0x3698   :  { %v2772_v6 = vpop.permute.xlu0 %2771 }
0x3699   :  { %v2774_v28 = vadd.f32 %v2772_v6, %v2764_v58 }
0x369b   :  { %5314 = vtanh.f32 %v2774_v28 }
0x36a5   :  { %v5315_v29 = vpop.eup %5314 }
0x36a6   :  { %2777 = vrot.lane.b32.xlu1 %v5315_v29, %s5603_s24 }
0x3718   :  { %v2778_v30 = vpop.permute.xlu1 %2777 }
0x3719   :  { %v2780_v32 = vmul.f32 %v5313_v26, %v2778_v30 }
0x371b   :  { %2782 = vrot.lane.b32.xlu0 %v2780_v32, %s5604_s3 }
0x378d   :  { %v2783_v33 = vpop.permute.xlu0 %2782 }
0x378e   :  { %2785 = vst.msk [vmem:[#allocation4 + $0x20] sm:$0xff] %vm176_vm1, %v2783_v33  ;;  %4753 = vmatmul.mubr.msk.f32.vlgmr.msra.gmra.mrb[38].mxu0 %vm176_vm1, %v2783_v33 }
0x378f   :  { %5065 = vmatpush3.bf16.msra.mxu0 %v6182_v62  ;;  %4774 = vmatprep.mubr.msk.f32.mxu0 %vm5601_vm0, %v5602_v2 }
0x3790   :  { %5066 = vmatprep.subr.bf16.mxu0 %v5600_v1 }
0x3793   :  { %5068 = vmatpush3.bf16.msra.mxu0 %v6189_v61 }
0x3794   :  { %5085 = vmatprep.subr.bf16.mxu0 %v5600_v1 }
0x3861   :  { %v2855_v35 = vpop.f32.mrb[38].mxu0 }
0x3862   :  { %v2859_v36 = vadd.f32 %v2855_v35, %v2248_v34  ;;  %v4754_v37 = vpop.f32.mrb[39].mxu0  ;;  %v3223_v35 = vld [vmem:[#allocation17] sm:$0xff] }
0x3864   :  { %5316 = vtanh.f32 %v2859_v36  ;;  %v4199_v62 = vmul.f32 -1.442695, %v2859_v36  ;;  %v3224_v36 = vld [vmem:[#allocation17 + $0x8] sm:$0xff] }
0x3865   :  { %v6427_v37 = vpack.c.bf16 %v3224_v36, %v3223_v35 }
0x3866   :  { %5318 = vpow2.f32 %v4199_v62  ;;  %v3226_v62 = vld [vmem:[#allocation17 + $0x18] sm:$0xff] }
0x386e   :  { %v5317_v38 = vpop.eup %5316 }
0x386f   :  { %2869 = vrot.lane.b32.xlu1 %v5317_v38, %s5603_s24  ;;  %v3225_v38 = vld [vmem:[#allocation17 + $0x10] sm:$0xff] }
0x3870   :  { %v5319_v39 = vpop.eup %5318 }
0x3871   :  { %v2863_v40 = vadd.f32 1.0, %v5319_v39  ;;  %v6431_v39 = vpack.c.bf16 %v3226_v62, %v3225_v38 }
0x3873   :  { %5320 = vrcp.f32 %v2863_v40 }
0x387d   :  { %v5321_v41 = vpop.eup %5320 }
0x387e   :  { %v2867_v12 = vmul.f32 %v5321_v41, %v2774_v28 }
0x38e1   :  { %v2870_v42 = vpop.permute.xlu1 %2869 }
0x38e2   :  { %v2872_v61 = vmul.f32 %v5321_v41, %v2870_v42 }
0x38e4   :  { %2874 = vrot.lane.b32.xlu0 %v2872_v61, %s5604_s3  ;;  %v2258_v61 = vadd.f32 %v6317_v60, %v6216_v24 }
0x3956   :  { %v2875_v18 = vpop.permute.xlu0 %2874 }
0x3957   :  { %v6351_v59 = vadd.f32 %v2875_v18, %v2867_v12 }
0x3959   :  { %5322 = vtanh.f32 %v6351_v59 }
0x3963   :  { %v5323_v50 = vpop.eup %5322 }
0x3964   :  { %2880 = vrot.lane.b32.xlu1 %v5323_v50, %s5603_s24 }
0x39d6   :  { %v2881_v16 = vpop.permute.xlu1 %2880 }
0x39d7   :  { %v2883_v53 = vmul.f32 %v5321_v41, %v2881_v16 }
0x39d9   :  { %2885 = vrot.lane.b32.xlu0 %v2883_v53, %s5604_s3 }
0x3a4b   :  { %v2886_v56 = vpop.permute.xlu0 %2885 }
0x3a4c   :  { %2888 = vst.msk [vmem:[#allocation4 + $0x28] sm:$0xff] %vm176_vm1, %v2886_v56  ;;  %4764 = vmatmul.mubr.msk.f32.vlgmr.msra.gmra.mrb[28].mxu1 %vm176_vm1, %v2886_v56 }
0x3a4d   :  { %5072 = vmatpush3.bf16.msra.mxu1 %v5069_v49  ;;  %4793 = vmatprep.mubr.msk.f32.mxu1 %vm2131_vm3, %v6204_v21  ;;  %v2253_v21 = vadd.f32 %v6216_v24, %v6319_v45 }
0x3a4e   :  { %5074 = vmatprep.subr.bf16.mxu1 %v5073_v51 }
0x3a51   :  { %5076 = vmatpush3.bf16.msra.mxu1 %v5073_v51 }
0x3a52   :  { %5078 = vmatprep.subr.bf16.mxu1 %v5077_v55 }
0x3a55   :  { %5080 = vmatpush3.bf16.msra.mxu1 %v5077_v55 }
0x3a56   :  { %5082 = vmatprep.subr.bf16.mxu1 %v5081_v5 }
0x3a59   :  { %5084 = vmatpush3.bf16.msra.mxu1 %v5081_v5 }
0x3a5a   :  { %5103 = vmatprep.subr.bf16.mxu1 %v5600_v1 }
0x3a5c   :  { %4794 = vmatmul.mubr.msk.f32.vlgmr.msra.gmra.mrb[30].mxu1 %vm2131_vm3, %v6208_v10 }
0x3a5d   :  { %4796 = vmatprep.mubr.msk.f32.mxu1 %vm2131_vm3, %v6241_v52  ;;  %5105 = vmatpush3.bf16.msra.mxu1 %v6427_v37 }
0x3a5e   :  { %5106 = vmatprep.subr.bf16.mxu1 %v5600_v1 }
0x3a60   :  { %4797 = vmatmul.mubr.msk.f32.gmra.mrb[32].mxu1 %vm2131_vm3, %v6253_v48 }
0x3a61   :  { %4799 = vmatprep.mubr.msk.f32.mxu1 %vm2131_vm3, %v6275_v4  ;;  %5108 = vmatpush3.bf16.msra.mxu1 %v6431_v39 }
0x3a62   :  { %5115 = vmatprep.subr.bf16.mxu1 %v5600_v1 }
0x3a64   :  { %4800 = vmatmul.mubr.msk.f32.gmra.mrb[34].mxu1 %vm2131_vm3, %v6293_v43  ;;  %v4204_v43 = vld [vmem:[%s6597_s12] ss:$0 sm:$0xff] }
0x3a65   :  { %4802 = vmatprep.mubr.msk.f32.mxu1 %vm2131_vm3, %v6297_v44 }
0x3a68   :  { %4803 = vmatmul.mubr.msk.f32.gmra.mrb[36].mxu1 %vm2131_vm3, %v6301_v46 }
0x3a69   :  { %4846 = vmatprep.mubr.msk.f32.mxu1 %vm5601_vm0, %v5602_v2 }
0x3b1f   :  { %v2958_v10 = vpop.f32.mrb[28].mxu1 }
0x3b20   :  { %v2962_v52 = vadd.f32 %v2958_v10, %v2253_v21  ;;  %v4765_v48 = vpop.f32.mrb[29].mxu1 }
0x3b22   :  { %5324 = vtanh.f32 %v2962_v52  ;;  %v4201_v27 = vmul.f32 -1.442695, %v2962_v52 }
0x3b24   :  { %5326 = vpow2.f32 %v4201_v27 }
0x3b2c   :  { %v5325_v4 = vpop.eup %5324 }
0x3b2d   :  { %2972 = vrot.lane.b32.xlu1 %v5325_v4, %s5603_s24 }
0x3b2e   :  { %v5327_v63 = vpop.eup %5326 }
0x3b2f   :  { %v4795_v44 = vpop.f32.mrb[30].mxu1  ;;  %v2966_v58 = vadd.f32 1.0, %v5327_v63 }
0x3b30   :  { %v6407_v11 = vadd.f32 %v4795_v44, %v4204_v43  ;;  %v3176_v46 = vpop.f32.mrb[31].mxu1 }
0x3b31   :  { %v6409_v9 = vadd.f32 %v4204_v43, %v3176_v46  ;;  %5328 = vrcp.f32 %v2966_v58 }
0x3b33   :  { %v4798_v19 = vpop.f32.mrb[32].mxu1 }
0x3b34   :  { %v6411_v20 = vadd.f32 %v4798_v19, %v4204_v43  ;;  %v3186_v45 = vpop.f32.mrb[33].mxu1 }
0x3b35   :  { %v6413_v22 = vadd.f32 %v4204_v43, %v3186_v45 }
0x3b37   :  { %v4801_v23 = vpop.f32.mrb[34].mxu1 }
0x3b38   :  { %v6415_v17 = vadd.f32 %v4801_v23, %v4204_v43  ;;  %v3196_v3 = vpop.f32.mrb[35].mxu1 }
0x3b39   :  { %v6417_v25 = vadd.f32 %v4204_v43, %v3196_v3 }
0x3b3b   :  { %v4804_v15 = vpop.f32.mrb[36].mxu1  ;;  %v5329_v6 = vpop.eup %5328 }
0x3b3c   :  { %v3206_v31 = vpop.f32.mrb[37].mxu1  ;;  %v2970_v30 = vmul.f32 %v5329_v6, %v6351_v59  ;;  %v3212_v14 = vadd.f32 %v4804_v15, %v4204_v43 }
0x3b3d   :  { %v6419_v26 = vadd.f32 %v4204_v43, %v3206_v31 }
0x3b9f   :  { %v2973_v28 = vpop.permute.xlu1 %2972 }
0x3ba0   :  { %v2975_v29 = vmul.f32 %v5329_v6, %v2973_v28 }
0x3ba2   :  { %2977 = vrot.lane.b32.xlu0 %v2975_v29, %s5604_s3 }
0x3c14   :  { %v2978_v32 = vpop.permute.xlu0 %2977 }
0x3c15   :  { %v6423_v33 = vadd.f32 %v2978_v32, %v2970_v30 }
0x3c17   :  { %5330 = vtanh.f32 %v6423_v33 }
0x3c21   :  { %v5331_v34 = vpop.eup %5330 }
0x3c22   :  { %2983 = vrot.lane.b32.xlu1 %v5331_v34, %s5603_s24 }
0x3c94   :  { %v2984_v40 = vpop.permute.xlu1 %2983 }
0x3c95   :  { %v2986_v41 = vmul.f32 %v5329_v6, %v2984_v40 }
0x3c97   :  { %2988 = vrot.lane.b32.xlu0 %v2986_v41, %s5604_s3 }
0x3d09   :  { %v2989_v42 = vpop.permute.xlu0 %2988 }
0x3d0a   :  { %2991 = vst.msk [vmem:[#allocation4 + $0x30] sm:$0xff] %vm176_vm1, %v2989_v42  ;;  %4775 = vmatmul.mubr.msk.f32.vlgmr.msra.gmra.mrb[40].mxu0 %vm176_vm1, %v2989_v42 }
0x3d0b   :  { %5087 = vmatpush3.bf16.msra.mxu0 %v6427_v37  ;;  %4813 = vmatprep.mubr.msk.f32.mxu0 %vm5601_vm0, %v5602_v2 }
0x3d0c   :  { %5088 = vmatprep.subr.bf16.mxu0 %v5600_v1 }
0x3d0f   :  { %5090 = vmatpush3.bf16.msra.mxu0 %v6431_v39 }
0x3d10   :  { %5091 = vmatprep.subr.bf16.mxu0 %v5600_v1 }
0x3d12   :  { %4814 = vmatmul.mubr.f32.vlgmr.msra.gmra.mrb[42].mxu0 %v5602_v2 }
0x3d13   :  { %5093 = vmatpush3.bf16.msra.mxu0 %v6427_v37  ;;  %4824 = vmatprep.mubr.msk.f32.mxu0 %vm5601_vm0, %v5602_v2 }
0x3d14   :  { %5094 = vmatprep.subr.bf16.mxu0 %v5600_v1 }
0x3d17   :  { %5096 = vmatpush3.bf16.msra.mxu0 %v6431_v39 }
0x3d18   :  { %5097 = vmatprep.subr.bf16.mxu0 %v5600_v1 }
0x3ddd   :  { %v3061_v12 = vpop.f32.mrb[40].mxu0 }
0x3dde   :  { %v6453_v18 = vadd.f32 %v3061_v12, %v2258_v61  ;;  %v4776_v59 = vpop.f32.mrb[41].mxu0 }
0x3de5   :  { %v3294_v47 = vpop.f32.mrb[42].mxu0 }
0x3de6   :  { %v3298_v49 = vadd.f32 %v3294_v47, %v3212_v14  ;;  %v4815_v50 = vpop.f32.mrb[43].mxu0 }
0x3de8   :  { %5332 = vtanh.f32 %v3298_v49  ;;  %v4213_v53 = vmul.f32 -1.442695, %v3298_v49 }
0x3dea   :  { %5334 = vpow2.f32 %v4213_v53 }
0x3df2   :  { %v5333_v16 = vpop.eup %5332 }
0x3df3   :  { %3308 = vrot.lane.b32.xlu1 %v5333_v16, %s5603_s24 }
0x3df4   :  { %v5335_v13 = vpop.eup %5334 }
0x3df5   :  { %v3302_v54 = vadd.f32 1.0, %v5335_v13 }
0x3df7   :  { %5336 = vrcp.f32 %v3302_v54 }
0x3e01   :  { %v5337_v51 = vpop.eup %5336 }
0x3e02   :  { %v3306_v60 = vmul.f32 0.0, %v5337_v51 }
0x3e65   :  { %v3309_v56 = vpop.permute.xlu1 %3308 }
0x3e66   :  { %v3311_v24 = vmul.f32 %v5337_v51, %v3309_v56 }
0x3e68   :  { %3313 = vrot.lane.b32.xlu0 %v3311_v24, %s5604_s3 }
0x3eda   :  { %v3314_v57 = vpop.permute.xlu0 %3313 }
0x3edb   :  { %v3316_v7 = vadd.f32 %v3314_v57, %v3306_v60 }
0x3edd   :  { %5338 = vtanh.f32 %v3316_v7 }
0x3ee7   :  { %v5339_v55 = vpop.eup %5338 }
0x3ee8   :  { %3319 = vrot.lane.b32.xlu1 %v5339_v55, %s5603_s24 }
0x3f5a   :  { %v3320_v0 = vpop.permute.xlu1 %3319 }
0x3f5b   :  { %v6458_v8 = vmul.f32 %v5337_v51, %v3320_v0 }
0x3f5d   :  { %3329 = vrot.lane.b32.xlu0 %v6458_v8, %s5604_s3 }
0x3fcf   :  { %v3330_v5 = vpop.permute.xlu0 %3329 }
0x3fd0   :  { %4825 = vmatmul.mubr.msk.f32.vlgmr.msra.gmra.mrb[44].mxu0 %vm176_vm1, %v3330_v5 }
0x3fd1   :  { %5099 = vmatpush3.bf16.msra.mxu0 %v6427_v37  ;;  %4835 = vmatprep.mubr.msk.f32.mxu0 %vm5601_vm0, %v5602_v2 }
0x3fd2   :  { %5100 = vmatprep.subr.bf16.mxu0 %v5600_v1 }
0x3fd5   :  { %5102 = vmatpush3.bf16.msra.mxu0 %v6431_v39 }
0x3fd6   :  { %5109 = vmatprep.subr.bf16.mxu0 %v5600_v1 }
0x40a3   :  { %v3399_v21 = vpop.f32.mrb[44].mxu0 }
0x40a4   :  { %v3403_v10 = vadd.f32 %v3399_v21, %v6419_v26  ;;  %v4826_v52 = vpop.f32.mrb[45].mxu0 }
0x40a6   :  { %5340 = vtanh.f32 %v3403_v10  ;;  %v4215_v4 = vmul.f32 -1.442695, %v3403_v10 }
0x40a8   :  { %5342 = vpow2.f32 %v4215_v4 }
0x40b0   :  { %v5341_v48 = vpop.eup %5340 }
0x40b1   :  { %3413 = vrot.lane.b32.xlu1 %v5341_v48, %s5603_s24 }
0x40b2   :  { %v5343_v43 = vpop.eup %5342 }
0x40b3   :  { %v3407_v44 = vadd.f32 1.0, %v5343_v43 }
0x40b5   :  { %5344 = vrcp.f32 %v3407_v44 }
0x40bf   :  { %v5345_v46 = vpop.eup %5344 }
0x40c0   :  { %v3411_v23 = vmul.f32 %v5345_v46, %v3316_v7 }
0x4123   :  { %v3414_v19 = vpop.permute.xlu1 %3413 }
0x4124   :  { %v3416_v45 = vmul.f32 %v5345_v46, %v3414_v19 }
0x4126   :  { %3418 = vrot.lane.b32.xlu0 %v3416_v45, %s5604_s3 }
0x4198   :  { %v3419_v3 = vpop.permute.xlu0 %3418 }
0x4199   :  { %v3421_v15 = vadd.f32 %v3419_v3, %v3411_v23 }
0x419b   :  { %5346 = vtanh.f32 %v3421_v15 }
0x41a5   :  { %v5347_v31 = vpop.eup %5346 }
0x41a6   :  { %3424 = vrot.lane.b32.xlu1 %v5347_v31, %s5603_s24 }
0x4218   :  { %v3425_v26 = vpop.permute.xlu1 %3424 }
0x4219   :  { %v6473_v27 = vmul.f32 %v5345_v46, %v3425_v26 }
0x421b   :  { %3434 = vrot.lane.b32.xlu0 %v6473_v27, %s5604_s3 }
0x428d   :  { %v3435_v63 = vpop.permute.xlu0 %3434 }
0x428e   :  { %4836 = vmatmul.mubr.msk.f32.vlgmr.msra.gmra.mrb[46].mxu0 %vm176_vm1, %v3435_v63 }
0x428f   :  { %5111 = vmatpush3.bf16.msra.mxu0 %v6427_v37  ;;  %4857 = vmatprep.mubr.msk.f32.mxu0 %vm5601_vm0, %v5602_v2 }
0x4290   :  { %5112 = vmatprep.subr.bf16.mxu0 %v5600_v1 }
0x4293   :  { %5114 = vmatpush3.bf16.msra.mxu0 %v6431_v39 }
0x4294   :  { %5121 = vmatprep.subr.bf16.mxu0 %v5600_v1 }
0x4361   :  { %v3504_v58 = vpop.f32.mrb[46].mxu0 }
0x4362   :  { %v3508_v6 = vadd.f32 %v3504_v58, %v6415_v17  ;;  %v4837_v28 = vpop.f32.mrb[47].mxu0 }
0x4364   :  { %5348 = vtanh.f32 %v3508_v6  ;;  %v4217_v30 = vmul.f32 -1.442695, %v3508_v6 }
0x4366   :  { %5350 = vpow2.f32 %v4217_v30 }
0x436e   :  { %v5349_v29 = vpop.eup %5348 }
0x436f   :  { %3518 = vrot.lane.b32.xlu1 %v5349_v29, %s5603_s24 }
0x4370   :  { %v5351_v32 = vpop.eup %5350 }
0x4371   :  { %v3512_v34 = vadd.f32 1.0, %v5351_v32 }
0x4373   :  { %5352 = vrcp.f32 %v3512_v34 }
0x437d   :  { %v5353_v35 = vpop.eup %5352 }
0x437e   :  { %v3516_v62 = vmul.f32 %v5353_v35, %v3421_v15 }
0x43e1   :  { %v3519_v36 = vpop.permute.xlu1 %3518 }
0x43e2   :  { %v3521_v38 = vmul.f32 %v5353_v35, %v3519_v36 }
0x43e4   :  { %3523 = vrot.lane.b32.xlu0 %v3521_v38, %s5604_s3 }
0x4456   :  { %v3524_v40 = vpop.permute.xlu0 %3523 }
0x4457   :  { %v3526_v41 = vadd.f32 %v3524_v40, %v3516_v62 }
0x4459   :  { %5354 = vtanh.f32 %v3526_v41 }
0x4463   :  { %v5355_v17 = vpop.eup %5354 }
0x4464   :  { %3529 = vrot.lane.b32.xlu1 %v5355_v17, %s5603_s24 }
0x44d6   :  { %v3530_v42 = vpop.permute.xlu1 %3529 }
0x44d7   :  { %v6488_v61 = vmul.f32 %v5353_v35, %v3530_v42 }
0x44d9   :  { %3539 = vrot.lane.b32.xlu0 %v6488_v61, %s5604_s3 }
0x454b   :  { %v3540_v12 = vpop.permute.xlu0 %3539 }
0x454c   :  { %4847 = vmatmul.mubr.msk.f32.vlgmr.msra.gmra.mrb[38].mxu1 %vm176_vm1, %v3540_v12 }
0x454d   :  { %5117 = vmatpush3.bf16.msra.mxu1 %v6427_v37  ;;  %4868 = vmatprep.mubr.msk.f32.mxu1 %vm5601_vm0, %v5602_v2 }
0x454e   :  { %5118 = vmatprep.subr.bf16.mxu1 %v5600_v1 }
0x4551   :  { %5120 = vmatpush3.bf16.msra.mxu1 %v6431_v39 }
0x4552   :  { %5127 = vmatprep.subr.bf16.mxu1 %v5600_v1 }
0x461f   :  { %v3609_v59 = vpop.f32.mrb[38].mxu1 }
0x4620   :  { %v3613_v14 = vadd.f32 %v3609_v59, %v6417_v25  ;;  %v4848_v47 = vpop.f32.mrb[39].mxu1 }
0x4622   :  { %5356 = vtanh.f32 %v3613_v14  ;;  %v4219_v50 = vmul.f32 -1.442695, %v3613_v14 }
0x4624   :  { %5358 = vpow2.f32 %v4219_v50 }
0x462c   :  { %v5357_v49 = vpop.eup %5356 }
0x462d   :  { %3623 = vrot.lane.b32.xlu1 %v5357_v49, %s5603_s24 }
0x462e   :  { %v5359_v16 = vpop.eup %5358 }
0x462f   :  { %v3617_v53 = vadd.f32 1.0, %v5359_v16 }
0x4631   :  { %5360 = vrcp.f32 %v3617_v53 }
0x463b   :  { %v5361_v13 = vpop.eup %5360 }
0x463c   :  { %v3621_v56 = vmul.f32 %v5361_v13, %v3526_v41 }
0x469f   :  { %v3624_v54 = vpop.permute.xlu1 %3623 }
0x46a0   :  { %v3626_v51 = vmul.f32 %v5361_v13, %v3624_v54 }
0x46a2   :  { %3628 = vrot.lane.b32.xlu0 %v3626_v51, %s5604_s3 }
0x4714   :  { %v3629_v24 = vpop.permute.xlu0 %3628 }
0x4715   :  { %v3631_v60 = vadd.f32 %v3629_v24, %v3621_v56  ;;  %v4203_v56 = vmul.f32 -1.442695, %v6453_v18 }
0x4717   :  { %5362 = vtanh.f32 %v3631_v60 }
0x4721   :  { %v5363_v25 = vpop.eup %5362 }
0x4722   :  { %3634 = vrot.lane.b32.xlu1 %v5363_v25, %s5603_s24 }
0x4794   :  { %v3635_v57 = vpop.permute.xlu1 %3634 }
0x4795   :  { %v6503_v7 = vmul.f32 %v5361_v13, %v3635_v57 }
0x4797   :  { %3644 = vrot.lane.b32.xlu0 %v6503_v7, %s5604_s3 }
0x4809   :  { %v3645_v55 = vpop.permute.xlu0 %3644 }
0x480a   :  { %4858 = vmatmul.mubr.msk.f32.vlgmr.msra.gmra.mrb[48].mxu0 %vm176_vm1, %v3645_v55 }
0x480b   :  { %5123 = vmatpush3.bf16.msra.mxu0 %v6427_v37  ;;  %4879 = vmatprep.mubr.msk.f32.mxu0 %vm5601_vm0, %v5602_v2 }
0x480c   :  { %5124 = vmatprep.subr.bf16.mxu0 %v5600_v1 }
0x480f   :  { %5126 = vmatpush3.bf16.msra.mxu0 %v6431_v39 }
0x48dd   :  { %v3714_v0 = vpop.f32.mrb[48].mxu0 }
0x48de   :  { %v3718_v5 = vadd.f32 %v3714_v0, %v6411_v20  ;;  %v4859_v21 = vpop.f32.mrb[49].mxu0 }
0x48e0   :  { %5364 = vtanh.f32 %v3718_v5  ;;  %v4221_v52 = vmul.f32 -1.442695, %v3718_v5 }
0x48e2   :  { %5366 = vpow2.f32 %v4221_v52 }
0x48ea   :  { %v5365_v10 = vpop.eup %5364 }
0x48eb   :  { %3728 = vrot.lane.b32.xlu1 %v5365_v10, %s5603_s24 }
0x48ec   :  { %v5367_v48 = vpop.eup %5366 }
0x48ed   :  { %v3722_v4 = vadd.f32 1.0, %v5367_v48 }
0x48ef   :  { %5368 = vrcp.f32 %v3722_v4 }
0x48f9   :  { %v5369_v43 = vpop.eup %5368 }
0x48fa   :  { %v3726_v19 = vmul.f32 %v5369_v43, %v3631_v60 }
0x495d   :  { %v3729_v44 = vpop.permute.xlu1 %3728 }
0x495e   :  { %v3731_v46 = vmul.f32 %v5369_v43, %v3729_v44 }
0x4960   :  { %3733 = vrot.lane.b32.xlu0 %v3731_v46, %s5604_s3 }
0x49d2   :  { %v3734_v45 = vpop.permute.xlu0 %3733 }
0x49d3   :  { %v3736_v23 = vadd.f32 %v3734_v45, %v3726_v19 }
0x49d5   :  { %5370 = vtanh.f32 %v3736_v23 }
0x49df   :  { %v5371_v20 = vpop.eup %5370 }
0x49e0   :  { %3739 = vrot.lane.b32.xlu1 %v5371_v20, %s5603_s24 }
0x4a52   :  { %v3740_v3 = vpop.permute.xlu1 %3739 }
0x4a53   :  { %v6517_v15 = vmul.f32 %v5369_v43, %v3740_v3 }
0x4a55   :  { %3749 = vrot.lane.b32.xlu0 %v6517_v15, %s5604_s3 }
0x4ac7   :  { %v3750_v31 = vpop.permute.xlu0 %3749 }
0x4ac8   :  { %4869 = vmatmul.mubr.msk.f32.vlgmr.msra.gmra.mrb[40].mxu1 %vm176_vm1, %v3750_v31 }
0x4ac9   :  { %5129 = vmatpush3.bf16.msra.mxu1 %v6427_v37  ;;  %4890 = vmatprep.mubr.msk.f32.mxu1 %vm5601_vm0, %v5602_v2 }
0x4aca   :  { %5130 = vmatprep.subr.bf16.mxu1 %v5600_v1 }
0x4acd   :  { %5132 = vmatpush3.bf16.msra.mxu1 %v6431_v39 }
0x4b9b   :  { %v3819_v26 = vpop.f32.mrb[40].mxu1 }
0x4b9c   :  { %v3823_v63 = vadd.f32 %v3819_v26, %v6413_v22  ;;  %v4870_v58 = vpop.f32.mrb[41].mxu1 }
0x4b9e   :  { %5372 = vtanh.f32 %v3823_v63  ;;  %v4223_v28 = vmul.f32 -1.442695, %v3823_v63 }
0x4ba0   :  { %5374 = vpow2.f32 %v4223_v28 }
0x4ba8   :  { %v5373_v6 = vpop.eup %5372 }
0x4ba9   :  { %3833 = vrot.lane.b32.xlu1 %v5373_v6, %s5603_s24 }
0x4baa   :  { %v5375_v29 = vpop.eup %5374 }
0x4bab   :  { %v3827_v30 = vadd.f32 1.0, %v5375_v29 }
0x4bad   :  { %5376 = vrcp.f32 %v3827_v30 }
0x4bb7   :  { %v5377_v37 = vpop.eup %5376 }
0x4bb8   :  { %v3831_v1 = vmul.f32 %v5377_v37, %v3736_v23 }
0x4c1b   :  { %v3834_v32 = vpop.permute.xlu1 %3833 }
0x4c1c   :  { %v3836_v2 = vmul.f32 %v5377_v37, %v3834_v32 }
0x4c1e   :  { %3838 = vrot.lane.b32.xlu0 %v3836_v2, %s5604_s3 }
0x4c90   :  { %v3839_v39 = vpop.permute.xlu0 %3838 }
0x4c91   :  { %v3841_v34 = vadd.f32 %v3839_v39, %v3831_v1  ;;  %v4087_v39 = vlaneseq }
0x4c93   :  { %5378 = vtanh.f32 %v3841_v34 }
0x4c9d   :  { %v5379_v22 = vpop.eup %5378 }
0x4c9e   :  { %3844 = vrot.lane.b32.xlu1 %v5379_v22, %s5603_s24 }
0x4d10   :  { %v3845_v35 = vpop.permute.xlu1 %3844 }
0x4d11   :  { %v6531_v36 = vmul.f32 %v5377_v37, %v3845_v35 }
0x4d13   :  { %3854 = vrot.lane.b32.xlu0 %v6531_v36, %s5604_s3 }
0x4d85   :  { %v3855_v38 = vpop.permute.xlu0 %3854 }
0x4d86   :  { %4880 = vmatmul.mubr.msk.f32.vlgmr.msra.gmra.mrb[50].mxu0 %vm176_vm1, %v3855_v38 }
0x4e59   :  { %v3924_v62 = vpop.f32.mrb[50].mxu0 }
0x4e5a   :  { %v3928_v40 = vadd.f32 %v3924_v62, %v6407_v11  ;;  %v4881_v41 = vpop.f32.mrb[51].mxu0 }
0x4e5c   :  { %5380 = vtanh.f32 %v3928_v40  ;;  %v4225_v42 = vmul.f32 -1.442695, %v3928_v40 }
0x4e5e   :  { %5382 = vpow2.f32 %v4225_v42 }
0x4e66   :  { %v5381_v17 = vpop.eup %5380 }
0x4e67   :  { %3938 = vrot.lane.b32.xlu1 %v5381_v17, %s5603_s24  ;;  %v4088_v17 = vshrl.u32 %v4087_v39, 7 }
0x4e68   :  { %v5383_v12 = vpop.eup %5382 }
0x4e69   :  { %v3932_v59 = vadd.f32 1.0, %v5383_v12 }
0x4e6b   :  { %5384 = vrcp.f32 %v3932_v59 }
0x4e75   :  { %v5385_v14 = vpop.eup %5384 }
0x4e76   :  { %v3936_v50 = vmul.f32 %v5385_v14, %v3841_v34 }
0x4ed9   :  { %v3939_v47 = vpop.permute.xlu1 %3938 }
0x4eda   :  { %v3941_v49 = vmul.f32 %v5385_v14, %v3939_v47 }
0x4edc   :  { %3943 = vrot.lane.b32.xlu0 %v3941_v49, %s5604_s3 }
0x4f4e   :  { %v3944_v16 = vpop.permute.xlu0 %3943 }
0x4f4f   :  { %v3946_v53 = vadd.f32 %v3944_v16, %v3936_v50  ;;  %v4097_v16 = vsub.s32 1, %v4088_v17 }
0x4f51   :  { %5386 = vtanh.f32 %v3946_v53 }
0x4f52   :  { %5388 = vtanh.f32 %v6453_v18 }
0x4f53   :  { %5390 = vpow2.f32 %v4203_v56 }
0x4f5b   :  { %v5387_v11 = vpop.eup %5386 }
0x4f5c   :  { %3949 = vrot.lane.b32.xlu1 %v5387_v11, %s5603_s24  ;;  %v5389_v51 = vpop.eup %5388 }
0x4f5d   :  { %v5391_v24 = vpop.eup %5390 }
0x4f5e   :  { %v3069_v60 = vadd.f32 1.0, %v5391_v24 }
0x4f60   :  { %5392 = vrcp.f32 %v3069_v60 }
0x4f6a   :  { %v5393_v57 = vpop.eup %5392 }
0x4f6b   :  { %v3073_v5 = vmul.f32 %v5393_v57, %v6423_v33 }
0x4fce   :  { %v3950_v13 = vpop.permute.xlu1 %3949 }
0x4fcf   :  { %v3952_v54 = vmul.f32 %v5385_v14, %v3950_v13  ;;  %v4089_v14 = vsub.s32 0, %v4088_v17  ;;  %v4086_v13 = vld [vmem:[%s6598_s13] sm:$0x7] }
0x4fd1   :  { %3959 = vrot.lane.b32.xlu0 %v3952_v54, %s5604_s3 }
0x4fd5   :  { %3075 = vrot.lane.b32.xlu0 %v5389_v51, %s5603_s24  ;;  %v4090_v51 = vrot.slane %v4086_v13, %v4089_v14 }
0x5043   :  { %v3960_v25 = vpop.permute.xlu0 %3959 }
0x5044   :  { %4891 = vmatmul.mubr.msk.f32.vlgmr.msra.gmra.mrb[42].mxu1 %vm176_vm1, %v3960_v25  ;;  %v4098_v25 = vrot.slane %v4086_v13, %v4097_v16 }
0x5047   :  { %v3076_v55 = vpop.permute.xlu0 %3075 }
0x5048   :  { %v3078_v0 = vmul.f32 %v5393_v57, %v3076_v55 }
0x504a   :  { %3080 = vrot.lane.b32.xlu0 %v3078_v0, %s5604_s3 }
0x50bc   :  { %v3081_v21 = vpop.permute.xlu0 %3080 }
0x50bd   :  { %v3083_v10 = vadd.f32 %v3081_v21, %v3073_v5 }
0x50bf   :  { %5394 = vtanh.f32 %v3083_v10 }
0x50c9   :  { %v5395_v52 = vpop.eup %5394 }
0x50ca   :  { %3086 = vrot.lane.b32.xlu0 %v5395_v52, %s5603_s24 }
0x5117   :  { %v4029_v18 = vpop.f32.mrb[42].mxu1 }
0x5118   :  { %v4033_v48 = vadd.f32 %v4029_v18, %v6409_v9  ;;  %v4892_v4 = vpop.f32.mrb[43].mxu1 }
0x511a   :  { %5396 = vtanh.f32 %v4033_v48  ;;  %v4227_v44 = vmul.f32 -1.442695, %v4033_v48 }
0x511c   :  { %5398 = vpow2.f32 %v4227_v44  ;;  %v4228_v44 = vld [vmem:[#allocation5] ss:$0 sm:$0xff] }
0x5124   :  { %v5397_v43 = vpop.eup %5396 }
0x5125   :  { %4043 = vrot.lane.b32.xlu1 %v5397_v43, %s5603_s24 }
0x5126   :  { %v5399_v46 = vpop.eup %5398 }
0x5127   :  { %v4037_v19 = vadd.f32 1.0, %v5399_v46 }
0x5129   :  { %5400 = vrcp.f32 %v4037_v19 }
0x5133   :  { %v5401_v33 = vpop.eup %5400 }
0x5134   :  { %v4041_v20 = vmul.f32 %v5401_v33, %v3946_v53  ;;  %v4106_v53 = vsub.s32 2, %v4088_v17 }
0x5197   :  { %v4044_v45 = vpop.permute.xlu1 %4043 }
0x5198   :  { %v4046_v23 = vmul.f32 %v5401_v33, %v4044_v45 }
0x519a   :  { %4048 = vrot.lane.b32.xlu1 %v4046_v23, %s5604_s3 }
0x520c   :  { %v4049_v3 = vpop.permute.xlu1 %4048 }
0x520d   :  { %v4051_v31 = vadd.f32 %v4049_v3, %v4041_v20 }
0x520f   :  { %5402 = vtanh.f32 %v4051_v31 }
0x5219   :  { %v5403_v9 = vpop.eup %5402 }
0x521a   :  { %4054 = vrot.lane.b32.xlu1 %v5403_v9, %s5603_s24 }
0x521e   :  { %3954 = vrot.lane.b32.xlu1 %v3952_v54, %s5603_s24 }
0x5222   :  { %3849 = vrot.lane.b32.xlu1 %v6531_v36, %s5603_s24 }
0x5226   :  { %3639 = vrot.lane.b32.xlu1 %v6503_v7, %s5603_s24  ;;  %v3087_v7 = vpop.permute.xlu0 %3086 }
0x5227   :  { %v3089_v28 = vmul.f32 %v5393_v57, %v3087_v7  ;;  %v4107_v57 = vrot.slane %v4086_v13, %v4106_v53 }
0x522a   :  { %3429 = vrot.lane.b32.xlu1 %v6473_v27, %s5603_s24 }
0x522e   :  { %3324 = vrot.lane.b32.xlu1 %v6458_v8, %s5603_s24 }
0x528c   :  { %v4055_v26 = vpop.permute.xlu1 %4054 }
0x528d   :  { %v4057_v63 = vmul.f32 %v5401_v33, %v4055_v26 }
0x528f   :  { %4059 = vrot.lane.b32.xlu0 %v4057_v63, %s5603_s24 }
0x5290   :  { %v3955_v58 = vpop.permute.xlu1 %3954 }
0x5291   :  { %3957 = vst.msk [vmem:[#allocation4 + $0x8] sm:$0xff] %vm1371_vm2, %v3955_v58 }
0x5293   :  { %3744 = vrot.lane.b32.xlu0 %v6517_v15, %s5603_s24 }
0x5294   :  { %v3850_v6 = vpop.permute.xlu1 %3849 }
0x5295   :  { %3852 = vst.msk [vmem:[#allocation4 + $0x10] sm:$0xff] %vm1371_vm2, %v3850_v6 }
0x5297   :  { %3534 = vrot.lane.b32.xlu0 %v6488_v61, %s5603_s24 }
0x5298   :  { %v3640_v27 = vpop.permute.xlu1 %3639  ;;  %v4065_v32 = vld [vmem:[#allocation4 + $0x8] sm:$0xff] }
0x5299   :  { %3642 = vst.msk [vmem:[#allocation4 + $0x20] sm:$0xff] %vm1371_vm2, %v3640_v27 }
0x529b   :  { %3091 = vrot.lane.b32.xlu0 %v3089_v28, %s5604_s3 }
0x529c   :  { %v3430_v8 = vpop.permute.xlu1 %3429  ;;  %v4068_v1 = vld [vmem:[#allocation4 + $0x10] sm:$0xff] }
0x529d   :  { %3432 = vst.msk [vmem:[#allocation4 + $0x30] sm:$0xff] %vm1371_vm2, %v3430_v8 }
0x52a0   :  { %v3325_v38 = vpop.permute.xlu1 %3324  ;;  %v4074_v41 = vld [vmem:[#allocation4 + $0x20] sm:$0xff] }
0x52a4   :  { %v4080_v50 = vld [vmem:[#allocation4 + $0x30] sm:$0xff] }
0x5301   :  { %v4060_v29 = vpop.permute.xlu0 %4059 }
0x5302   :  { %4062 = vst.msk [vmem:[#allocation4] sm:$0xff] %vm1371_vm2, %v4060_v29 }
0x5305   :  { %v3745_v15 = vpop.permute.xlu0 %3744 }
0x5306   :  { %3747 = vst.msk [vmem:[#allocation4 + $0x18] sm:$0xff] %vm1371_vm2, %v3745_v15 }
0x5309   :  { %v3535_v30 = vpop.permute.xlu0 %3534  ;;  %v4064_v37 = vld [vmem:[#allocation4] sm:$0xff] }
0x530a   :  { %3537 = vst.msk [vmem:[#allocation4 + $0x28] sm:$0xff] %vm1371_vm2, %v3535_v30  ;;  %v4066_v61 = vmax.f32 %v4064_v37, %v4065_v32  ;;  %v4067_v2 = vadd.f32 %v4065_v32, %v4064_v37 }
0x530c   :  { %v4069_v34 = vmax.f32 %v4066_v61, %v4068_v1  ;;  %v4070_v22 = vadd.f32 %v4068_v1, %v4067_v2 }
0x530d   :  { %v3092_v35 = vpop.permute.xlu0 %3091  ;;  %v4071_v36 = vld [vmem:[#allocation4 + $0x18] sm:$0xff] }
0x530e   :  { %3094 = vst.msk [vmem:[#allocation4 + $0x38] sm:$0xff] %vm176_vm1, %v3092_v35  ;;  %v4072_v62 = vmax.f32 %v4069_v34, %v4071_v36  ;;  %v4073_v40 = vadd.f32 %v4071_v36, %v4070_v22 }
0x530f   :  { %3327 = vst.msk [vmem:[#allocation4 + $0x38] sm:$0xff] %vm1371_vm2, %v3325_v38 }
0x5310   :  { %v4075_v42 = vmax.f32 %v4072_v62, %v4074_v41  ;;  %v4076_v12 = vadd.f32 %v4074_v41, %v4073_v40 }
0x5311   :  { %v4077_v59 = vld [vmem:[#allocation4 + $0x28] sm:$0xff] }
0x5312   :  { %v4078_v47 = vmax.f32 %v4075_v42, %v4077_v59  ;;  %v4079_v49 = vadd.f32 %v4077_v59, %v4076_v12 }
0x5314   :  { %v4081_v11 = vmax.f32 %v4078_v47, %v4080_v50  ;;  %v4082_v54 = vadd.f32 %v4080_v50, %v4079_v49 }
0x5316   :  { %v4063_v56 = vld [vmem:[#allocation4 + $0x38] sm:$0xff] }
0x5317   :  { %v4083_v24 = vmax.f32 %v4081_v11, %v4063_v56  ;;  %v4084_v60 = vadd.f32 %v4082_v54, %v4063_v56  ;;  %v4108_v10 = vmul.f32 %v4107_v57, %v4063_v56 }
0x5319   :  { %v4091_v55 = vmul.f32 %v4090_v51, %v4083_v24  ;;  %v4085_v0 = vmul.f32 0.125, %v4084_v60  ;;  %v4109_v18 = vsel %vm2131_vm3, %v4108_v10, 0.0 }
0x531b   :  { %v4092_v5 = vsel %vm2131_vm3, %v4091_v55, 0.0  ;;  %v4099_v21 = vmul.f32 %v4098_v25, %v4085_v0 }
0x531c   :  { %4093 = vadd.xlane.f32.xlu0 %v4092_v5 }
0x531d   :  { %v4100_v52 = vsel %vm2131_vm3, %v4099_v21, 0.0 }
0x531e   :  { %4101 = vadd.xlane.f32.xlu1 %v4100_v52 }
0x5320   :  { %4110 = vadd.xlane.f32.xlu0 %v4109_v18 }
0x53a9   :  { %v4094_v48 = vpop.xlane.xlu0 %4093 }
0x53ab   :  { %v4102_v4 = vpop.xlane.xlu1 %4101 }
0x53ac   :  { %v4103_v43 = vadd.f32 %v4102_v4, %v4094_v48 }
0x53ad   :  { %v4111_v46 = vpop.xlane.xlu0 %4110 }
0x53ae   :  { %v4112_v19 = vadd.f32 %v4111_v46, %v4103_v43 }
0x53b0   :  { %v4120_v33 = vadd.f32 %v4228_v44, %v4112_v19 }
0x53b2   :  { %4122 = vst.msk [vmem:[%s6600_s15] sm:$0xff] %vm4121_vm4, %v4120_v33 }
0x53b3   :  { %4127 = vsyncpa [#allocation7], 1 }
0x53b4   :  { %4128 = vsyncpa [#allocation9], 1 }
0x53b5   :  { %4129 = vsyncpa [#allocation12], 1 }
0x53b6   :  { %4130 = vsyncpa [#allocation15], 1 }
0x53b7   :  { %4131 = vsyncpa [#allocation18], 1 }

</bundles_post_ra>
